<compile_context>
chip_gen: v7x
topology: tpu7x:2x2x1
jax: 0.10.0
libtpu: 0.0.40
codegen_flags: <defaults>
</compile_context>

<pallas_src>
import functools
import math

import jax
import jax.numpy as jnp
import numpy as np
from jax.experimental import pallas as pl
from jax.experimental.pallas import tpu as pltpu

_LANES = 128


# ---------------------------------------------------------------------------
# Host-side, one-time weight packing into a single lane-dense [R, 128] slab
# ---------------------------------------------------------------------------
def pack_params(params, input_dim):
    segs, index, row = [], {}, 0

    def add(name, arr):
        nonlocal row
        a = np.asarray(arr, np.float32)
        if a.ndim == 1:
            a = a[None, :]
        r, c = a.shape
        assert c <= _LANES, (name, a.shape)
        pad_r = (-r) % 8
        buf = np.zeros((r + pad_r, _LANES), np.float32)
        buf[:r, :c] = a
        index[name] = (row, r, c)
        segs.append(buf)
        row += r + pad_r

    mlp = params["mlp"]
    w0, b0 = mlp[0]
    add("mlp.l0.wx", np.asarray(w0)[:input_dim])     # concat(x,y) folded into split weight
    add("mlp.l0.wy", np.asarray(w0)[input_dim:])
    add("mlp.l0.b", b0)
    for i in range(1, len(mlp)):
        w, b = mlp[i]
        add(f"mlp.l{i}.w", w)
        add(f"mlp.l{i}.b", b)

    st = params["st"]

    def add_mab(prefix, m):
        for k in ("wq", "bq", "wk", "bk", "wv", "bv", "wo", "bo"):
            add(f"{prefix}.{k}", m[k])

    add("st.isab1.I", st["isab1"]["I"])
    add_mab("st.isab1.mab0", st["isab1"]["mab0"])
    add_mab("st.isab1.mab1", st["isab1"]["mab1"])
    add("st.isab2.I", st["isab2"]["I"])
    add_mab("st.isab2.mab0", st["isab2"]["mab0"])
    add_mab("st.isab2.mab1", st["isab2"]["mab1"])
    add("st.pma.S", st["pma"]["S"])
    add_mab("st.pma.mab", st["pma"]["mab"])
    add_mab("st.sab1", st["sab1"])
    add_mab("st.sab2", st["sab2"])
    add("st.w_out", st["w_out"])
    add("st.b_out", st["b_out"])

    w_pack = jnp.asarray(np.concatenate(segs, axis=0))
    return w_pack, index, len(mlp)


# ---------------------------------------------------------------------------
# Fused whole-forward kernel: one grid step == one task (batch element)
# ---------------------------------------------------------------------------
def _det_encoder_kernel(x_ref, y_ref, w_ref, o_ref, *, index, num_heads, n_mlp):
    def getp(name):                       # static slice of the resident weight slab
        off, r, c = index[name]
        return w_ref[off:off + r, :c]

    x = x_ref[0].astype(jnp.float32)      # [N, input_dim]
    yv = y_ref[0].astype(jnp.float32)     # [N, num_classes]

    # --- label MLP; concat(x, y) folded into the first matmul ---
    h = (jnp.dot(x, getp("mlp.l0.wx"), preferred_element_type=jnp.float32)
         + jnp.dot(yv, getp("mlp.l0.wy"), preferred_element_type=jnp.float32)
         + getp("mlp.l0.b"))
    if n_mlp > 1:
        h = jnp.maximum(h, 0.0)
    for i in range(1, n_mlp):
        h = jnp.dot(h, getp(f"mlp.l{i}.w"), preferred_element_type=jnp.float32) \
            + getp(f"mlp.l{i}.b")
        if i < n_mlp - 1:
            h = jnp.maximum(h, 0.0)

    # --- one MAB (multi-head attention block) on a single task, 2-D math only ---
    def mab(prefix, Q, K):
        wq, bq = getp(prefix + ".wq"), getp(prefix + ".bq")
        wk, bk = getp(prefix + ".wk"), getp(prefix + ".bk")
        wv, bv = getp(prefix + ".wv"), getp(prefix + ".bv")
        wo, bo = getp(prefix + ".wo"), getp(prefix + ".bo")
        dim_V = wq.shape[1]
        dh = dim_V // num_heads
        scale = 1.0 / math.sqrt(dim_V)

        q = jnp.dot(Q, wq, preferred_element_type=jnp.float32) + bq   # [Sq, V]
        k = jnp.dot(K, wk, preferred_element_type=jnp.float32) + bk   # [Sk, V]
        v = jnp.dot(K, wv, preferred_element_type=jnp.float32) + bv   # [Sk, V]

        outs = []
        for hh in range(num_heads):                     # static unroll; lane-sliced heads
            sl = slice(hh * dh, (hh + 1) * dh)
            qh, kh, vh = q[:, sl], k[:, sl], v[:, sl]
            logits = jax.lax.dot_general(                # q @ k^T without explicit transpose
                qh, kh, (((1,), (1,)), ((), ())),
                preferred_element_type=jnp.float32) * scale            # [Sq, Sk]
            m = jnp.max(logits, axis=-1, keepdims=True)
            e = jnp.exp(logits - m)
            pa = e * pl.reciprocal(jnp.sum(e, axis=-1, keepdims=True), approx=True)
            outs.append(jnp.dot(pa, vh, preferred_element_type=jnp.float32))
        attn = outs[0] if num_heads == 1 else jnp.concatenate(outs, axis=-1)

        o = q + attn                                                    # residual w/ Q_proj
        return o + jnp.maximum(jnp.dot(o, wo, preferred_element_type=jnp.float32) + bo, 0.0)

    # --- encoder: ISAB x2 ---
    H = mab("st.isab1.mab0", getp("st.isab1.I"), h)
    X = mab("st.isab1.mab1", h, H)
    H = mab("st.isab2.mab0", getp("st.isab2.I"), X)
    X = mab("st.isab2.mab1", X, H)
    # --- decoder: PMA -> SAB -> SAB -> Linear ---
    X = mab("st.pma.mab", getp("st.pma.S"), X)
    X = mab("st.sab1", X, X)
    X = mab("st.sab2", X, X)
    out = jnp.dot(X, getp("st.w_out"), preferred_element_type=jnp.float32) + getp("st.b_out")
    o_ref[0] = out.astype(o_ref.dtype)                                  # [seeds, latent]


def det_encoder_forward(w_pack, x, y, x_target, *, index, num_heads, n_mlp):
    # x_target is unused by DetEncoder_v0.forward (kept for signature parity).
    del x_target
    B, N, input_dim = x.shape
    num_classes = y.shape[-1]
    seeds = index["st.pma.S"][1]
    latent = index["st.b_out"][2]
    R, L = w_pack.shape

    kernel = functools.partial(_det_encoder_kernel, index=index,
                               num_heads=num_heads, n_mlp=n_mlp)

    per_task = pl.pallas_call(
        kernel,
        grid=(B,),
        in_specs=[
            pl.BlockSpec((1, N, input_dim), lambda b: (b, 0, 0)),
            pl.BlockSpec((1, N, num_classes), lambda b: (b, 0, 0)),
            pl.BlockSpec((R, L), lambda b: (0, 0)),        # weight slab: resident across grid
        ],
        out_specs=pl.BlockSpec((1, seeds, latent), lambda b: (b, 0, 0)),
        out_shape=jax.ShapeDtypeStruct((B, seeds, latent), x.dtype),
        compiler_params=pltpu.CompilerParams(
            dimension_semantics=("parallel",),             # lets v7x shard B over its 2 TCs
            vmem_limit_bytes=32 * 1024 * 1024,
        ),
    )(x, y, w_pack)
    return per_task.mean(axis=0)                           # torch: s.mean(0) -> [seeds, latent]


# ---------------------------------------------------------------------------
# Plain-JAX reference (same math) for a correctness check
# ---------------------------------------------------------------------------
def _ref_mab(p, Q, K, num_heads):
    dim_V = p["wq"].shape[1]
    q = Q @ p["wq"] + p["bq"]
    k = K @ p["wk"] + p["bk"]
    v = K @ p["wv"] + p["bv"]

    def split(t):  # torch.cat(t.split(dh, 2), 0)
        return jnp.concatenate(jnp.split(t, num_heads, axis=2), axis=0)

    q_, k_, v_ = split(q), split(k), split(v)
    a = jax.nn.softmax(jnp.einsum("bqd,bkd->bqk", q_, k_) / math.sqrt(dim_V), axis=-1)
    o_ = q_ + jnp.einsum("bqk,bkd->bqd", a, v_)
    o = jnp.concatenate(jnp.split(o_, num_heads, axis=0), axis=2)
    return o + jax.nn.relu(o @ p["wo"] + p["bo"])


def ref_det_encoder_forward(params, x, y, x_target, *, num_heads):
    del x_target
    B = x.shape[0]
    d = jnp.concatenate([x, y], axis=-1)
    layers = params["mlp"]
    for i, (w, b) in enumerate(layers):
        d = d @ w + b
        if i < len(layers) - 1:
            d = jax.nn.relu(d)
    st = params["st"]

    def isab(ip, X):
        I = jnp.broadcast_to(ip["I"][None], (B,) + ip["I"].shape)
        H = _ref_mab(ip["mab0"], I, X, num_heads)
        return _ref_mab(ip["mab1"], X, H, num_heads)

    X = isab(st["isab1"], d)
    X = isab(st["isab2"], X)
    S = jnp.broadcast_to(st["pma"]["S"][None], (B,) + st["pma"]["S"].shape)
    X = _ref_mab(st["pma"]["mab"], S, X, num_heads)
    X = _ref_mab(st["sab1"], X, X, num_heads)
    X = _ref_mab(st["sab2"], X, X, num_heads)
    X = X @ st["w_out"] + st["b_out"]
    return X.mean(axis=0)


# ---------------------------------------------------------------------------
# Deterministic parameter init (synthetic, PyTorch-like scales, 2-D shapes)
# ---------------------------------------------------------------------------
def init_linear(key, d_in, d_out):
    kw, kb = jax.random.split(key)
    bound = 1.0 / math.sqrt(d_in)
    w = jax.random.uniform(kw, (d_in, d_out), jnp.float32, -bound, bound)
    b = jax.random.uniform(kb, (1, d_out), jnp.float32, -bound, bound)
    return w, b


def init_mab(key, dim_Q, dim_K, dim_V):
    ks = jax.random.split(key, 4)
    wq, bq = init_linear(ks[0], dim_Q, dim_V)
    wk, bk = init_linear(ks[1], dim_K, dim_V)
    wv, bv = init_linear(ks[2], dim_K, dim_V)
    wo, bo = init_linear(ks[3], dim_V, dim_V)
    return dict(wq=wq, bq=bq, wk=wk, bk=bk, wv=wv, bv=bv, wo=wo, bo=bo)


def init_isab(key, dim_in, dim_out, num_inds):
    ki, k0, k1 = jax.random.split(key, 3)
    bound = math.sqrt(6.0 / (num_inds + dim_out))     # xavier_uniform-like
    I = jax.random.uniform(ki, (num_inds, dim_out), jnp.float32, -bound, bound)
    return dict(I=I,
                mab0=init_mab(k0, dim_out, dim_in, dim_out),
                mab1=init_mab(k1, dim_in, dim_out, dim_out))


def init_pma(key, dim, num_seeds):
    ks_, km = jax.random.split(key)
    bound = math.sqrt(6.0 / (num_seeds + dim))
    S = jax.random.uniform(ks_, (num_seeds, dim), jnp.float32, -bound, bound)
    return dict(S=S, mab=init_mab(km, dim, dim, dim))


def init_set_transformer(key, dim_input, num_outputs, dim_output, num_inds=32, dim_hidden=128):
    ks = jax.random.split(key, 6)
    w_out, b_out = init_linear(ks[5], dim_hidden, dim_output)
    return dict(
        isab1=init_isab(ks[0], dim_input, dim_hidden, num_inds),
        isab2=init_isab(ks[1], dim_hidden, dim_hidden, num_inds),
        pma=init_pma(ks[2], dim_hidden, num_outputs),
        sab1=init_mab(ks[3], dim_hidden, dim_hidden, dim_hidden),
        sab2=init_mab(ks[4], dim_hidden, dim_hidden, dim_hidden),
        w_out=w_out, b_out=b_out)


def init_mlp(key, in_dim, hid_dim, out_dim, num_layers):
    ks = jax.random.split(key, num_layers)
    layers, d = [], in_dim
    for i in range(num_layers - 1):
        layers.append(init_linear(ks[i], d, hid_dim))
        d = hid_dim
    layers.append(init_linear(ks[-1], d, out_dim))
    return layers


def init_det_encoder(key, input_dim, num_classes, latent_dim, num_layers, seeds):
    k_mlp, k_st = jax.random.split(key)
    set_encoding_dim = input_dim + num_classes    # label_embedder=False
    return dict(
        mlp=init_mlp(k_mlp, set_encoding_dim, latent_dim, latent_dim, num_layers),
        st=init_set_transformer(k_st, latent_dim, seeds, latent_dim))


# ---------------------------------------------------------------------------
if __name__ == "__main__":
    B, N = 2, 8                          # batch of tasks, context points per task
    input_dim, num_classes = 16, 4
    latent_dim, num_layers, num_attn_heads, seeds = 32, 2, 1, 1

    key = jax.random.PRNGKey(0)
    kx, ky, kt = jax.random.split(key, 3)
    x = jax.random.normal(kx, (B, N, input_dim), jnp.float32)
    y = jax.nn.one_hot(
        jax.random.randint(ky, (B, N), 0, num_classes), num_classes, dtype=jnp.float32)
    x_target = jax.random.normal(kt, (B, N, input_dim), jnp.float32)   # unused by forward

    params = init_det_encoder(jax.random.PRNGKey(42), input_dim, num_classes,
                              latent_dim, num_layers, seeds)

    # One-time host-side weight packing into a single [R, 128] slab.
    w_pack, index, n_mlp = pack_params(params, input_dim)

    fwd = jax.jit(functools.partial(det_encoder_forward, index=index,
                                    num_heads=num_attn_heads, n_mlp=n_mlp))
    out = jax.block_until_ready(fwd(w_pack, x, y, x_target))

    assert out.shape == (seeds, latent_dim), out.shape
    assert bool(jnp.all(jnp.isfinite(out)))

    # unit test against the plain-JAX reference of the same module (fusion regression guard)
    ref_fwd = jax.jit(functools.partial(ref_det_encoder_forward, num_heads=num_attn_heads))
    ref = jax.block_until_ready(ref_fwd(params, x, y, x_target))
    np.testing.assert_allclose(np.asarray(out), np.asarray(ref), rtol=3e-2, atol=3e-2)

    print("KERNEL_OK")
</pallas_src>

<mosaic_0001>
module attributes {stable_mosaic.version = 11 : i64} {
  func.func @_det_encoder_kernel(%arg0: i32, %arg1: memref<1x8x16xf32, #tpu.memory_space<vmem>>, %arg2: memref<1x8x4xf32, #tpu.memory_space<vmem>>, %arg3: memref<3800x128xf32, #tpu.memory_space<vmem>>, %arg4: memref<1x1x32xf32, #tpu.memory_space<vmem>>) attributes {dimension_semantics = [#tpu.dimension_semantics<parallel>], iteration_bounds = array<i64: 2>, scalar_prefetch = 0 : i64, scratch_operands = 0 : i64, tpu.core_type = #tpu.core_type<tc>, window_params = [{transform_indices = @transform_0, window_bounds = array<i64: 1, 8, 16>}, {transform_indices = @transform_1, window_bounds = array<i64: 1, 8, 4>}, {pipeline_mode = #tpu.pipeline_mode<synchronous>, transform_indices = @transform_2, window_bounds = array<i64: 3800, 128>}, {transform_indices = @transform_3, window_bounds = array<i64: 1, 1, 32>}]} {
    %c0 = arith.constant 0 : index
    %c0_0 = arith.constant 0 : index
    %c0_1 = arith.constant 0 : index
    %0 = vector.load %arg1[%c0, %c0_0, %c0_1] : memref<1x8x16xf32, #tpu.memory_space<vmem>>, vector<1x8x16xf32>
    %1 = vector.shape_cast %0 : vector<1x8x16xf32> to vector<8x16xf32>
    %c0_2 = arith.constant 0 : index
    %c0_3 = arith.constant 0 : index
    %c0_4 = arith.constant 0 : index
    %2 = vector.load %arg2[%c0_2, %c0_3, %c0_4] : memref<1x8x4xf32, #tpu.memory_space<vmem>>, vector<1x8x4xf32>
    %3 = vector.shape_cast %2 : vector<1x8x4xf32> to vector<8x4xf32>
    %c0_5 = arith.constant 0 : index
    %c0_6 = arith.constant 0 : index
    %4 = vector.load %arg3[%c0_5, %c0_6] : memref<3800x128xf32, #tpu.memory_space<vmem>>, vector<16x32xf32>
    %cst = arith.constant dense<0.000000e+00> : vector<8x32xf32>
    %5 = tpu.matmul %1, %4, %cst {dimension_numbers = #tpu.dot_dimension_numbers<[1], [0], [0], [1], [0, 0, 1, 1], [], []>} : vector<8x16xf32>, vector<16x32xf32>, vector<8x32xf32> -> vector<8x32xf32>
    %c16 = arith.constant 16 : index
    %c0_7 = arith.constant 0 : index
    %6 = vector.load %arg3[%c16, %c0_7] : memref<3800x128xf32, #tpu.memory_space<vmem>>, vector<4x32xf32>
    %cst_8 = arith.constant dense<0.000000e+00> : vector<8x32xf32>
    %7 = tpu.matmul %3, %6, %cst_8 {dimension_numbers = #tpu.dot_dimension_numbers<[1], [0], [0], [1], [0, 0, 1, 1], [], []>} : vector<8x4xf32>, vector<4x32xf32>, vector<8x32xf32> -> vector<8x32xf32>
    %8 = arith.addf %5, %7 : vector<8x32xf32>
    %c24 = arith.constant 24 : index
    %c0_9 = arith.constant 0 : index
    %9 = vector.load %arg3[%c24, %c0_9] : memref<3800x128xf32, #tpu.memory_space<vmem>>, vector<1x32xf32>
    %10 = vector.broadcast %9 : vector<1x32xf32> to vector<8x32xf32>
    %11 = arith.addf %8, %10 : vector<8x32xf32>
    %cst_10 = arith.constant 0.000000e+00 : f32
    %12 = vector.broadcast %cst_10 : f32 to vector<8x32xf32>
    %13 = arith.maximumf %11, %12 : vector<8x32xf32>
    %c32 = arith.constant 32 : index
    %c0_11 = arith.constant 0 : index
    %14 = vector.load %arg3[%c32, %c0_11] : memref<3800x128xf32, #tpu.memory_space<vmem>>, vector<32x32xf32>
    %cst_12 = arith.constant dense<0.000000e+00> : vector<8x32xf32>
    %15 = tpu.matmul %13, %14, %cst_12 {dimension_numbers = #tpu.dot_dimension_numbers<[1], [0], [0], [1], [0, 0, 1, 1], [], []>} : vector<8x32xf32>, vector<32x32xf32>, vector<8x32xf32> -> vector<8x32xf32>
    %c64 = arith.constant 64 : index
    %c0_13 = arith.constant 0 : index
    %16 = vector.load %arg3[%c64, %c0_13] : memref<3800x128xf32, #tpu.memory_space<vmem>>, vector<1x32xf32>
    %17 = vector.broadcast %16 : vector<1x32xf32> to vector<8x32xf32>
    %18 = arith.addf %15, %17 : vector<8x32xf32>
    %c72 = arith.constant 72 : index
    %c0_14 = arith.constant 0 : index
    %19 = vector.load %arg3[%c72, %c0_14] : memref<3800x128xf32, #tpu.memory_space<vmem>>, vector<32x128xf32>
    %c104 = arith.constant 104 : index
    %c0_15 = arith.constant 0 : index
    %20 = vector.load %arg3[%c104, %c0_15] : memref<3800x128xf32, #tpu.memory_space<vmem>>, vector<128x128xf32>
    %c232 = arith.constant 232 : index
    %c0_16 = arith.constant 0 : index
    %21 = vector.load %arg3[%c232, %c0_16] : memref<3800x128xf32, #tpu.memory_space<vmem>>, vector<1x128xf32>
    %c240 = arith.constant 240 : index
    %c0_17 = arith.constant 0 : index
    %22 = vector.load %arg3[%c240, %c0_17] : memref<3800x128xf32, #tpu.memory_space<vmem>>, vector<32x128xf32>
    %c272 = arith.constant 272 : index
    %c0_18 = arith.constant 0 : index
    %23 = vector.load %arg3[%c272, %c0_18] : memref<3800x128xf32, #tpu.memory_space<vmem>>, vector<1x128xf32>
    %c280 = arith.constant 280 : index
    %c0_19 = arith.constant 0 : index
    %24 = vector.load %arg3[%c280, %c0_19] : memref<3800x128xf32, #tpu.memory_space<vmem>>, vector<32x128xf32>
    %c312 = arith.constant 312 : index
    %c0_20 = arith.constant 0 : index
    %25 = vector.load %arg3[%c312, %c0_20] : memref<3800x128xf32, #tpu.memory_space<vmem>>, vector<1x128xf32>
    %c320 = arith.constant 320 : index
    %c0_21 = arith.constant 0 : index
    %26 = vector.load %arg3[%c320, %c0_21] : memref<3800x128xf32, #tpu.memory_space<vmem>>, vector<128x128xf32>
    %c448 = arith.constant 448 : index
    %c0_22 = arith.constant 0 : index
    %27 = vector.load %arg3[%c448, %c0_22] : memref<3800x128xf32, #tpu.memory_space<vmem>>, vector<1x128xf32>
    %cst_23 = arith.constant dense<0.000000e+00> : vector<32x128xf32>
    %28 = tpu.matmul %19, %20, %cst_23 {dimension_numbers = #tpu.dot_dimension_numbers<[1], [0], [0], [1], [0, 0, 1, 1], [], []>} : vector<32x128xf32>, vector<128x128xf32>, vector<32x128xf32> -> vector<32x128xf32>
    %29 = vector.broadcast %21 : vector<1x128xf32> to vector<32x128xf32>
    %30 = arith.addf %28, %29 : vector<32x128xf32>
    %cst_24 = arith.constant dense<0.000000e+00> : vector<8x128xf32>
    %31 = tpu.matmul %18, %22, %cst_24 {dimension_numbers = #tpu.dot_dimension_numbers<[1], [0], [0], [1], [0, 0, 1, 1], [], []>} : vector<8x32xf32>, vector<32x128xf32>, vector<8x128xf32> -> vector<8x128xf32>
    %32 = vector.broadcast %23 : vector<1x128xf32> to vector<8x128xf32>
    %33 = arith.addf %31, %32 : vector<8x128xf32>
    %cst_25 = arith.constant dense<0.000000e+00> : vector<8x128xf32>
    %34 = tpu.matmul %18, %24, %cst_25 {dimension_numbers = #tpu.dot_dimension_numbers<[1], [0], [0], [1], [0, 0, 1, 1], [], []>} : vector<8x32xf32>, vector<32x128xf32>, vector<8x128xf32> -> vector<8x128xf32>
    %35 = vector.broadcast %25 : vector<1x128xf32> to vector<8x128xf32>
    %36 = arith.addf %34, %35 : vector<8x128xf32>
    %cst_26 = arith.constant dense<0.000000e+00> : vector<32x8xf32>
    %37 = tpu.matmul %30, %33, %cst_26 {dimension_numbers = #tpu.dot_dimension_numbers<[1], [1], [0], [0], [0, 0, 1, 0], [], []>} : vector<32x128xf32>, vector<8x128xf32>, vector<32x8xf32> -> vector<32x8xf32>
    %cst_27 = arith.constant 0.0883883461 : f32
    %38 = vector.broadcast %cst_27 : f32 to vector<32x8xf32>
    %39 = arith.mulf %37, %38 : vector<32x8xf32>
    %cst_28 = arith.constant dense<0xFF800000> : vector<32xf32>
    %40 = vector.multi_reduction <maximumf>, %39, %cst_28 [1] : vector<32x8xf32> to vector<32xf32>
    %41 = vector.shape_cast %40 : vector<32xf32> to vector<32x1xf32>
    %42 = vector.broadcast %41 : vector<32x1xf32> to vector<32x8xf32>
    %43 = arith.subf %39, %42 : vector<32x8xf32>
    %44 = math.exp %43 : vector<32x8xf32>
    %cst_29 = arith.constant dense<0.000000e+00> : vector<32xf32>
    %45 = vector.multi_reduction <add>, %44, %cst_29 [1] : vector<32x8xf32> to vector<32xf32>
    %46 = vector.shape_cast %45 : vector<32xf32> to vector<32x1xf32>
    %47 = tpu.reciprocal %46 {approx = true} : vector<32x1xf32> -> vector<32x1xf32>
    %48 = vector.broadcast %47 : vector<32x1xf32> to vector<32x8xf32>
    %49 = arith.mulf %44, %48 : vector<32x8xf32>
    %cst_30 = arith.constant dense<0.000000e+00> : vector<32x128xf32>
    %50 = tpu.matmul %49, %36, %cst_30 {dimension_numbers = #tpu.dot_dimension_numbers<[1], [0], [0], [1], [0, 0, 1, 1], [], []>} : vector<32x8xf32>, vector<8x128xf32>, vector<32x128xf32> -> vector<32x128xf32>
    %51 = arith.addf %30, %50 : vector<32x128xf32>
    %cst_31 = arith.constant dense<0.000000e+00> : vector<32x128xf32>
    %52 = tpu.matmul %51, %26, %cst_31 {dimension_numbers = #tpu.dot_dimension_numbers<[1], [0], [0], [1], [0, 0, 1, 1], [], []>} : vector<32x128xf32>, vector<128x128xf32>, vector<32x128xf32> -> vector<32x128xf32>
    %53 = vector.broadcast %27 : vector<1x128xf32> to vector<32x128xf32>
    %54 = arith.addf %52, %53 : vector<32x128xf32>
    %cst_32 = arith.constant 0.000000e+00 : f32
    %55 = vector.broadcast %cst_32 : f32 to vector<32x128xf32>
    %56 = arith.maximumf %54, %55 : vector<32x128xf32>
    %57 = arith.addf %51, %56 : vector<32x128xf32>
    %c456 = arith.constant 456 : index
    %c0_33 = arith.constant 0 : index
    %58 = vector.load %arg3[%c456, %c0_33] : memref<3800x128xf32, #tpu.memory_space<vmem>>, vector<32x128xf32>
    %c488 = arith.constant 488 : index
    %c0_34 = arith.constant 0 : index
    %59 = vector.load %arg3[%c488, %c0_34] : memref<3800x128xf32, #tpu.memory_space<vmem>>, vector<1x128xf32>
    %c496 = arith.constant 496 : index
    %c0_35 = arith.constant 0 : index
    %60 = vector.load %arg3[%c496, %c0_35] : memref<3800x128xf32, #tpu.memory_space<vmem>>, vector<128x128xf32>
    %c624 = arith.constant 624 : index
    %c0_36 = arith.constant 0 : index
    %61 = vector.load %arg3[%c624, %c0_36] : memref<3800x128xf32, #tpu.memory_space<vmem>>, vector<1x128xf32>
    %c632 = arith.constant 632 : index
    %c0_37 = arith.constant 0 : index
    %62 = vector.load %arg3[%c632, %c0_37] : memref<3800x128xf32, #tpu.memory_space<vmem>>, vector<128x128xf32>
    %c760 = arith.constant 760 : index
    %c0_38 = arith.constant 0 : index
    %63 = vector.load %arg3[%c760, %c0_38] : memref<3800x128xf32, #tpu.memory_space<vmem>>, vector<1x128xf32>
    %c768 = arith.constant 768 : index
    %c0_39 = arith.constant 0 : index
    %64 = vector.load %arg3[%c768, %c0_39] : memref<3800x128xf32, #tpu.memory_space<vmem>>, vector<128x128xf32>
    %c896 = arith.constant 896 : index
    %c0_40 = arith.constant 0 : index
    %65 = vector.load %arg3[%c896, %c0_40] : memref<3800x128xf32, #tpu.memory_space<vmem>>, vector<1x128xf32>
    %cst_41 = arith.constant dense<0.000000e+00> : vector<8x128xf32>
    %66 = tpu.matmul %18, %58, %cst_41 {dimension_numbers = #tpu.dot_dimension_numbers<[1], [0], [0], [1], [0, 0, 1, 1], [], []>} : vector<8x32xf32>, vector<32x128xf32>, vector<8x128xf32> -> vector<8x128xf32>
    %67 = vector.broadcast %59 : vector<1x128xf32> to vector<8x128xf32>
    %68 = arith.addf %66, %67 : vector<8x128xf32>
    %cst_42 = arith.constant dense<0.000000e+00> : vector<32x128xf32>
    %69 = tpu.matmul %57, %60, %cst_42 {dimension_numbers = #tpu.dot_dimension_numbers<[1], [0], [0], [1], [0, 0, 1, 1], [], []>} : vector<32x128xf32>, vector<128x128xf32>, vector<32x128xf32> -> vector<32x128xf32>
    %70 = vector.broadcast %61 : vector<1x128xf32> to vector<32x128xf32>
    %71 = arith.addf %69, %70 : vector<32x128xf32>
    %cst_43 = arith.constant dense<0.000000e+00> : vector<32x128xf32>
    %72 = tpu.matmul %57, %62, %cst_43 {dimension_numbers = #tpu.dot_dimension_numbers<[1], [0], [0], [1], [0, 0, 1, 1], [], []>} : vector<32x128xf32>, vector<128x128xf32>, vector<32x128xf32> -> vector<32x128xf32>
    %73 = vector.broadcast %63 : vector<1x128xf32> to vector<32x128xf32>
    %74 = arith.addf %72, %73 : vector<32x128xf32>
    %cst_44 = arith.constant dense<0.000000e+00> : vector<8x32xf32>
    %75 = tpu.matmul %68, %71, %cst_44 {dimension_numbers = #tpu.dot_dimension_numbers<[1], [1], [0], [0], [0, 0, 1, 0], [], []>} : vector<8x128xf32>, vector<32x128xf32>, vector<8x32xf32> -> vector<8x32xf32>
    %cst_45 = arith.constant 0.0883883461 : f32
    %76 = vector.broadcast %cst_45 : f32 to vector<8x32xf32>
    %77 = arith.mulf %75, %76 : vector<8x32xf32>
    %cst_46 = arith.constant dense<0xFF800000> : vector<8xf32>
    %78 = vector.multi_reduction <maximumf>, %77, %cst_46 [1] : vector<8x32xf32> to vector<8xf32>
    %79 = vector.shape_cast %78 : vector<8xf32> to vector<8x1xf32>
    %80 = vector.broadcast %79 : vector<8x1xf32> to vector<8x32xf32>
    %81 = arith.subf %77, %80 : vector<8x32xf32>
    %82 = math.exp %81 : vector<8x32xf32>
    %cst_47 = arith.constant dense<0.000000e+00> : vector<8xf32>
    %83 = vector.multi_reduction <add>, %82, %cst_47 [1] : vector<8x32xf32> to vector<8xf32>
    %84 = vector.shape_cast %83 : vector<8xf32> to vector<8x1xf32>
    %85 = tpu.reciprocal %84 {approx = true} : vector<8x1xf32> -> vector<8x1xf32>
    %86 = vector.broadcast %85 : vector<8x1xf32> to vector<8x32xf32>
    %87 = arith.mulf %82, %86 : vector<8x32xf32>
    %cst_48 = arith.constant dense<0.000000e+00> : vector<8x128xf32>
    %88 = tpu.matmul %87, %74, %cst_48 {dimension_numbers = #tpu.dot_dimension_numbers<[1], [0], [0], [1], [0, 0, 1, 1], [], []>} : vector<8x32xf32>, vector<32x128xf32>, vector<8x128xf32> -> vector<8x128xf32>
    %89 = arith.addf %68, %88 : vector<8x128xf32>
    %cst_49 = arith.constant dense<0.000000e+00> : vector<8x128xf32>
    %90 = tpu.matmul %89, %64, %cst_49 {dimension_numbers = #tpu.dot_dimension_numbers<[1], [0], [0], [1], [0, 0, 1, 1], [], []>} : vector<8x128xf32>, vector<128x128xf32>, vector<8x128xf32> -> vector<8x128xf32>
    %91 = vector.broadcast %65 : vector<1x128xf32> to vector<8x128xf32>
    %92 = arith.addf %90, %91 : vector<8x128xf32>
    %cst_50 = arith.constant 0.000000e+00 : f32
    %93 = vector.broadcast %cst_50 : f32 to vector<8x128xf32>
    %94 = arith.maximumf %92, %93 : vector<8x128xf32>
    %95 = arith.addf %89, %94 : vector<8x128xf32>
    %c904 = arith.constant 904 : index
    %c0_51 = arith.constant 0 : index
    %96 = vector.load %arg3[%c904, %c0_51] : memref<3800x128xf32, #tpu.memory_space<vmem>>, vector<32x128xf32>
    %c936 = arith.constant 936 : index
    %c0_52 = arith.constant 0 : index
    %97 = vector.load %arg3[%c936, %c0_52] : memref<3800x128xf32, #tpu.memory_space<vmem>>, vector<128x128xf32>
    %c1064 = arith.constant 1064 : index
    %c0_53 = arith.constant 0 : index
    %98 = vector.load %arg3[%c1064, %c0_53] : memref<3800x128xf32, #tpu.memory_space<vmem>>, vector<1x128xf32>
    %c1072 = arith.constant 1072 : index
    %c0_54 = arith.constant 0 : index
    %99 = vector.load %arg3[%c1072, %c0_54] : memref<3800x128xf32, #tpu.memory_space<vmem>>, vector<128x128xf32>
    %c1200 = arith.constant 1200 : index
    %c0_55 = arith.constant 0 : index
    %100 = vector.load %arg3[%c1200, %c0_55] : memref<3800x128xf32, #tpu.memory_space<vmem>>, vector<1x128xf32>
    %c1208 = arith.constant 1208 : index
    %c0_56 = arith.constant 0 : index
    %101 = vector.load %arg3[%c1208, %c0_56] : memref<3800x128xf32, #tpu.memory_space<vmem>>, vector<128x128xf32>
    %c1336 = arith.constant 1336 : index
    %c0_57 = arith.constant 0 : index
    %102 = vector.load %arg3[%c1336, %c0_57] : memref<3800x128xf32, #tpu.memory_space<vmem>>, vector<1x128xf32>
    %c1344 = arith.constant 1344 : index
    %c0_58 = arith.constant 0 : index
    %103 = vector.load %arg3[%c1344, %c0_58] : memref<3800x128xf32, #tpu.memory_space<vmem>>, vector<128x128xf32>
    %c1472 = arith.constant 1472 : index
    %c0_59 = arith.constant 0 : index
    %104 = vector.load %arg3[%c1472, %c0_59] : memref<3800x128xf32, #tpu.memory_space<vmem>>, vector<1x128xf32>
    %cst_60 = arith.constant dense<0.000000e+00> : vector<32x128xf32>
    %105 = tpu.matmul %96, %97, %cst_60 {dimension_numbers = #tpu.dot_dimension_numbers<[1], [0], [0], [1], [0, 0, 1, 1], [], []>} : vector<32x128xf32>, vector<128x128xf32>, vector<32x128xf32> -> vector<32x128xf32>
    %106 = vector.broadcast %98 : vector<1x128xf32> to vector<32x128xf32>
    %107 = arith.addf %105, %106 : vector<32x128xf32>
    %cst_61 = arith.constant dense<0.000000e+00> : vector<8x128xf32>
    %108 = tpu.matmul %95, %99, %cst_61 {dimension_numbers = #tpu.dot_dimension_numbers<[1], [0], [0], [1], [0, 0, 1, 1], [], []>} : vector<8x128xf32>, vector<128x128xf32>, vector<8x128xf32> -> vector<8x128xf32>
    %109 = vector.broadcast %100 : vector<1x128xf32> to vector<8x128xf32>
    %110 = arith.addf %108, %109 : vector<8x128xf32>
    %cst_62 = arith.constant dense<0.000000e+00> : vector<8x128xf32>
    %111 = tpu.matmul %95, %101, %cst_62 {dimension_numbers = #tpu.dot_dimension_numbers<[1], [0], [0], [1], [0, 0, 1, 1], [], []>} : vector<8x128xf32>, vector<128x128xf32>, vector<8x128xf32> -> vector<8x128xf32>
    %112 = vector.broadcast %102 : vector<1x128xf32> to vector<8x128xf32>
    %113 = arith.addf %111, %112 : vector<8x128xf32>
    %cst_63 = arith.constant dense<0.000000e+00> : vector<32x8xf32>
    %114 = tpu.matmul %107, %110, %cst_63 {dimension_numbers = #tpu.dot_dimension_numbers<[1], [1], [0], [0], [0, 0, 1, 0], [], []>} : vector<32x128xf32>, vector<8x128xf32>, vector<32x8xf32> -> vector<32x8xf32>
    %cst_64 = arith.constant 0.0883883461 : f32
    %115 = vector.broadcast %cst_64 : f32 to vector<32x8xf32>
    %116 = arith.mulf %114, %115 : vector<32x8xf32>
    %cst_65 = arith.constant dense<0xFF800000> : vector<32xf32>
    %117 = vector.multi_reduction <maximumf>, %116, %cst_65 [1] : vector<32x8xf32> to vector<32xf32>
    %118 = vector.shape_cast %117 : vector<32xf32> to vector<32x1xf32>
    %119 = vector.broadcast %118 : vector<32x1xf32> to vector<32x8xf32>
    %120 = arith.subf %116, %119 : vector<32x8xf32>
    %121 = math.exp %120 : vector<32x8xf32>
    %cst_66 = arith.constant dense<0.000000e+00> : vector<32xf32>
    %122 = vector.multi_reduction <add>, %121, %cst_66 [1] : vector<32x8xf32> to vector<32xf32>
    %123 = vector.shape_cast %122 : vector<32xf32> to vector<32x1xf32>
    %124 = tpu.reciprocal %123 {approx = true} : vector<32x1xf32> -> vector<32x1xf32>
    %125 = vector.broadcast %124 : vector<32x1xf32> to vector<32x8xf32>
    %126 = arith.mulf %121, %125 : vector<32x8xf32>
    %cst_67 = arith.constant dense<0.000000e+00> : vector<32x128xf32>
    %127 = tpu.matmul %126, %113, %cst_67 {dimension_numbers = #tpu.dot_dimension_numbers<[1], [0], [0], [1], [0, 0, 1, 1], [], []>} : vector<32x8xf32>, vector<8x128xf32>, vector<32x128xf32> -> vector<32x128xf32>
    %128 = arith.addf %107, %127 : vector<32x128xf32>
    %cst_68 = arith.constant dense<0.000000e+00> : vector<32x128xf32>
    %129 = tpu.matmul %128, %103, %cst_68 {dimension_numbers = #tpu.dot_dimension_numbers<[1], [0], [0], [1], [0, 0, 1, 1], [], []>} : vector<32x128xf32>, vector<128x128xf32>, vector<32x128xf32> -> vector<32x128xf32>
    %130 = vector.broadcast %104 : vector<1x128xf32> to vector<32x128xf32>
    %131 = arith.addf %129, %130 : vector<32x128xf32>
    %cst_69 = arith.constant 0.000000e+00 : f32
    %132 = vector.broadcast %cst_69 : f32 to vector<32x128xf32>
    %133 = arith.maximumf %131, %132 : vector<32x128xf32>
    %134 = arith.addf %128, %133 : vector<32x128xf32>
    %c1480 = arith.constant 1480 : index
    %c0_70 = arith.constant 0 : index
    %135 = vector.load %arg3[%c1480, %c0_70] : memref<3800x128xf32, #tpu.memory_space<vmem>>, vector<128x128xf32>
    %c1608 = arith.constant 1608 : index
    %c0_71 = arith.constant 0 : index
    %136 = vector.load %arg3[%c1608, %c0_71] : memref<3800x128xf32, #tpu.memory_space<vmem>>, vector<1x128xf32>
    %c1616 = arith.constant 1616 : index
    %c0_72 = arith.constant 0 : index
    %137 = vector.load %arg3[%c1616, %c0_72] : memref<3800x128xf32, #tpu.memory_space<vmem>>, vector<128x128xf32>
    %c1744 = arith.constant 1744 : index
    %c0_73 = arith.constant 0 : index
    %138 = vector.load %arg3[%c1744, %c0_73] : memref<3800x128xf32, #tpu.memory_space<vmem>>, vector<1x128xf32>
    %c1752 = arith.constant 1752 : index
    %c0_74 = arith.constant 0 : index
    %139 = vector.load %arg3[%c1752, %c0_74] : memref<3800x128xf32, #tpu.memory_space<vmem>>, vector<128x128xf32>
    %c1880 = arith.constant 1880 : index
    %c0_75 = arith.constant 0 : index
    %140 = vector.load %arg3[%c1880, %c0_75] : memref<3800x128xf32, #tpu.memory_space<vmem>>, vector<1x128xf32>
    %c1888 = arith.constant 1888 : index
    %c0_76 = arith.constant 0 : index
    %141 = vector.load %arg3[%c1888, %c0_76] : memref<3800x128xf32, #tpu.memory_space<vmem>>, vector<128x128xf32>
    %c2016 = arith.constant 2016 : index
    %c0_77 = arith.constant 0 : index
    %142 = vector.load %arg3[%c2016, %c0_77] : memref<3800x128xf32, #tpu.memory_space<vmem>>, vector<1x128xf32>
    %cst_78 = arith.constant dense<0.000000e+00> : vector<8x128xf32>
    %143 = tpu.matmul %95, %135, %cst_78 {dimension_numbers = #tpu.dot_dimension_numbers<[1], [0], [0], [1], [0, 0, 1, 1], [], []>} : vector<8x128xf32>, vector<128x128xf32>, vector<8x128xf32> -> vector<8x128xf32>
    %144 = vector.broadcast %136 : vector<1x128xf32> to vector<8x128xf32>
    %145 = arith.addf %143, %144 : vector<8x128xf32>
    %cst_79 = arith.constant dense<0.000000e+00> : vector<32x128xf32>
    %146 = tpu.matmul %134, %137, %cst_79 {dimension_numbers = #tpu.dot_dimension_numbers<[1], [0], [0], [1], [0, 0, 1, 1], [], []>} : vector<32x128xf32>, vector<128x128xf32>, vector<32x128xf32> -> vector<32x128xf32>
    %147 = vector.broadcast %138 : vector<1x128xf32> to vector<32x128xf32>
    %148 = arith.addf %146, %147 : vector<32x128xf32>
    %cst_80 = arith.constant dense<0.000000e+00> : vector<32x128xf32>
    %149 = tpu.matmul %134, %139, %cst_80 {dimension_numbers = #tpu.dot_dimension_numbers<[1], [0], [0], [1], [0, 0, 1, 1], [], []>} : vector<32x128xf32>, vector<128x128xf32>, vector<32x128xf32> -> vector<32x128xf32>
    %150 = vector.broadcast %140 : vector<1x128xf32> to vector<32x128xf32>
    %151 = arith.addf %149, %150 : vector<32x128xf32>
    %cst_81 = arith.constant dense<0.000000e+00> : vector<8x32xf32>
    %152 = tpu.matmul %145, %148, %cst_81 {dimension_numbers = #tpu.dot_dimension_numbers<[1], [1], [0], [0], [0, 0, 1, 0], [], []>} : vector<8x128xf32>, vector<32x128xf32>, vector<8x32xf32> -> vector<8x32xf32>
    %cst_82 = arith.constant 0.0883883461 : f32
    %153 = vector.broadcast %cst_82 : f32 to vector<8x32xf32>
    %154 = arith.mulf %152, %153 : vector<8x32xf32>
    %cst_83 = arith.constant dense<0xFF800000> : vector<8xf32>
    %155 = vector.multi_reduction <maximumf>, %154, %cst_83 [1] : vector<8x32xf32> to vector<8xf32>
    %156 = vector.shape_cast %155 : vector<8xf32> to vector<8x1xf32>
    %157 = vector.broadcast %156 : vector<8x1xf32> to vector<8x32xf32>
    %158 = arith.subf %154, %157 : vector<8x32xf32>
    %159 = math.exp %158 : vector<8x32xf32>
    %cst_84 = arith.constant dense<0.000000e+00> : vector<8xf32>
    %160 = vector.multi_reduction <add>, %159, %cst_84 [1] : vector<8x32xf32> to vector<8xf32>
    %161 = vector.shape_cast %160 : vector<8xf32> to vector<8x1xf32>
    %162 = tpu.reciprocal %161 {approx = true} : vector<8x1xf32> -> vector<8x1xf32>
    %163 = vector.broadcast %162 : vector<8x1xf32> to vector<8x32xf32>
    %164 = arith.mulf %159, %163 : vector<8x32xf32>
    %cst_85 = arith.constant dense<0.000000e+00> : vector<8x128xf32>
    %165 = tpu.matmul %164, %151, %cst_85 {dimension_numbers = #tpu.dot_dimension_numbers<[1], [0], [0], [1], [0, 0, 1, 1], [], []>} : vector<8x32xf32>, vector<32x128xf32>, vector<8x128xf32> -> vector<8x128xf32>
    %166 = arith.addf %145, %165 : vector<8x128xf32>
    %cst_86 = arith.constant dense<0.000000e+00> : vector<8x128xf32>
    %167 = tpu.matmul %166, %141, %cst_86 {dimension_numbers = #tpu.dot_dimension_numbers<[1], [0], [0], [1], [0, 0, 1, 1], [], []>} : vector<8x128xf32>, vector<128x128xf32>, vector<8x128xf32> -> vector<8x128xf32>
    %168 = vector.broadcast %142 : vector<1x128xf32> to vector<8x128xf32>
    %169 = arith.addf %167, %168 : vector<8x128xf32>
    %cst_87 = arith.constant 0.000000e+00 : f32
    %170 = vector.broadcast %cst_87 : f32 to vector<8x128xf32>
    %171 = arith.maximumf %169, %170 : vector<8x128xf32>
    %172 = arith.addf %166, %171 : vector<8x128xf32>
    %c2024 = arith.constant 2024 : index
    %c0_88 = arith.constant 0 : index
    %173 = vector.load %arg3[%c2024, %c0_88] : memref<3800x128xf32, #tpu.memory_space<vmem>>, vector<1x128xf32>
    %c2032 = arith.constant 2032 : index
    %c0_89 = arith.constant 0 : index
    %174 = vector.load %arg3[%c2032, %c0_89] : memref<3800x128xf32, #tpu.memory_space<vmem>>, vector<128x128xf32>
    %c2160 = arith.constant 2160 : index
    %c0_90 = arith.constant 0 : index
    %175 = vector.load %arg3[%c2160, %c0_90] : memref<3800x128xf32, #tpu.memory_space<vmem>>, vector<1x128xf32>
    %c2168 = arith.constant 2168 : index
    %c0_91 = arith.constant 0 : index
    %176 = vector.load %arg3[%c2168, %c0_91] : memref<3800x128xf32, #tpu.memory_space<vmem>>, vector<128x128xf32>
    %c2296 = arith.constant 2296 : index
    %c0_92 = arith.constant 0 : index
    %177 = vector.load %arg3[%c2296, %c0_92] : memref<3800x128xf32, #tpu.memory_space<vmem>>, vector<1x128xf32>
    %c2304 = arith.constant 2304 : index
    %c0_93 = arith.constant 0 : index
    %178 = vector.load %arg3[%c2304, %c0_93] : memref<3800x128xf32, #tpu.memory_space<vmem>>, vector<128x128xf32>
    %c2432 = arith.constant 2432 : index
    %c0_94 = arith.constant 0 : index
    %179 = vector.load %arg3[%c2432, %c0_94] : memref<3800x128xf32, #tpu.memory_space<vmem>>, vector<1x128xf32>
    %c2440 = arith.constant 2440 : index
    %c0_95 = arith.constant 0 : index
    %180 = vector.load %arg3[%c2440, %c0_95] : memref<3800x128xf32, #tpu.memory_space<vmem>>, vector<128x128xf32>
    %c2568 = arith.constant 2568 : index
    %c0_96 = arith.constant 0 : index
    %181 = vector.load %arg3[%c2568, %c0_96] : memref<3800x128xf32, #tpu.memory_space<vmem>>, vector<1x128xf32>
    %cst_97 = arith.constant dense<0.000000e+00> : vector<1x128xf32>
    %182 = tpu.matmul %173, %174, %cst_97 {dimension_numbers = #tpu.dot_dimension_numbers<[1], [0], [0], [1], [0, 0, 1, 1], [], []>} : vector<1x128xf32>, vector<128x128xf32>, vector<1x128xf32> -> vector<1x128xf32>
    %183 = arith.addf %182, %175 : vector<1x128xf32>
    %cst_98 = arith.constant dense<0.000000e+00> : vector<8x128xf32>
    %184 = tpu.matmul %172, %176, %cst_98 {dimension_numbers = #tpu.dot_dimension_numbers<[1], [0], [0], [1], [0, 0, 1, 1], [], []>} : vector<8x128xf32>, vector<128x128xf32>, vector<8x128xf32> -> vector<8x128xf32>
    %185 = vector.broadcast %177 : vector<1x128xf32> to vector<8x128xf32>
    %186 = arith.addf %184, %185 : vector<8x128xf32>
    %cst_99 = arith.constant dense<0.000000e+00> : vector<8x128xf32>
    %187 = tpu.matmul %172, %178, %cst_99 {dimension_numbers = #tpu.dot_dimension_numbers<[1], [0], [0], [1], [0, 0, 1, 1], [], []>} : vector<8x128xf32>, vector<128x128xf32>, vector<8x128xf32> -> vector<8x128xf32>
    %188 = vector.broadcast %179 : vector<1x128xf32> to vector<8x128xf32>
    %189 = arith.addf %187, %188 : vector<8x128xf32>
    %cst_100 = arith.constant dense<0.000000e+00> : vector<1x8xf32>
    %190 = tpu.matmul %183, %186, %cst_100 {dimension_numbers = #tpu.dot_dimension_numbers<[1], [1], [0], [0], [0, 0, 1, 0], [], []>} : vector<1x128xf32>, vector<8x128xf32>, vector<1x8xf32> -> vector<1x8xf32>
    %cst_101 = arith.constant 0.0883883461 : f32
    %191 = vector.broadcast %cst_101 : f32 to vector<1x8xf32>
    %192 = arith.mulf %190, %191 : vector<1x8xf32>
    %cst_102 = arith.constant dense<0xFF800000> : vector<1xf32>
    %193 = vector.multi_reduction <maximumf>, %192, %cst_102 [1] : vector<1x8xf32> to vector<1xf32>
    %194 = vector.shape_cast %193 : vector<1xf32> to vector<1x1xf32>
    %195 = vector.broadcast %194 : vector<1x1xf32> to vector<1x8xf32>
    %196 = arith.subf %192, %195 : vector<1x8xf32>
    %197 = math.exp %196 : vector<1x8xf32>
    %cst_103 = arith.constant dense<0.000000e+00> : vector<1xf32>
    %198 = vector.multi_reduction <add>, %197, %cst_103 [1] : vector<1x8xf32> to vector<1xf32>
    %199 = vector.shape_cast %198 : vector<1xf32> to vector<1x1xf32>
    %200 = tpu.reciprocal %199 {approx = true} : vector<1x1xf32> -> vector<1x1xf32>
    %201 = vector.broadcast %200 : vector<1x1xf32> to vector<1x8xf32>
    %202 = arith.mulf %197, %201 : vector<1x8xf32>
    %cst_104 = arith.constant dense<0.000000e+00> : vector<1x128xf32>
    %203 = tpu.matmul %202, %189, %cst_104 {dimension_numbers = #tpu.dot_dimension_numbers<[1], [0], [0], [1], [0, 0, 1, 1], [], []>} : vector<1x8xf32>, vector<8x128xf32>, vector<1x128xf32> -> vector<1x128xf32>
    %204 = arith.addf %183, %203 : vector<1x128xf32>
    %cst_105 = arith.constant dense<0.000000e+00> : vector<1x128xf32>
    %205 = tpu.matmul %204, %180, %cst_105 {dimension_numbers = #tpu.dot_dimension_numbers<[1], [0], [0], [1], [0, 0, 1, 1], [], []>} : vector<1x128xf32>, vector<128x128xf32>, vector<1x128xf32> -> vector<1x128xf32>
    %206 = arith.addf %205, %181 : vector<1x128xf32>
    %cst_106 = arith.constant 0.000000e+00 : f32
    %207 = vector.broadcast %cst_106 : f32 to vector<1x128xf32>
    %208 = arith.maximumf %206, %207 : vector<1x128xf32>
    %209 = arith.addf %204, %208 : vector<1x128xf32>
    %c2576 = arith.constant 2576 : index
    %c0_107 = arith.constant 0 : index
    %210 = vector.load %arg3[%c2576, %c0_107] : memref<3800x128xf32, #tpu.memory_space<vmem>>, vector<128x128xf32>
    %c2704 = arith.constant 2704 : index
    %c0_108 = arith.constant 0 : index
    %211 = vector.load %arg3[%c2704, %c0_108] : memref<3800x128xf32, #tpu.memory_space<vmem>>, vector<1x128xf32>
    %c2712 = arith.constant 2712 : index
    %c0_109 = arith.constant 0 : index
    %212 = vector.load %arg3[%c2712, %c0_109] : memref<3800x128xf32, #tpu.memory_space<vmem>>, vector<128x128xf32>
    %c2840 = arith.constant 2840 : index
    %c0_110 = arith.constant 0 : index
    %213 = vector.load %arg3[%c2840, %c0_110] : memref<3800x128xf32, #tpu.memory_space<vmem>>, vector<1x128xf32>
    %c2848 = arith.constant 2848 : index
    %c0_111 = arith.constant 0 : index
    %214 = vector.load %arg3[%c2848, %c0_111] : memref<3800x128xf32, #tpu.memory_space<vmem>>, vector<128x128xf32>
    %c2976 = arith.constant 2976 : index
    %c0_112 = arith.constant 0 : index
    %215 = vector.load %arg3[%c2976, %c0_112] : memref<3800x128xf32, #tpu.memory_space<vmem>>, vector<1x128xf32>
    %c2984 = arith.constant 2984 : index
    %c0_113 = arith.constant 0 : index
    %216 = vector.load %arg3[%c2984, %c0_113] : memref<3800x128xf32, #tpu.memory_space<vmem>>, vector<128x128xf32>
    %c3112 = arith.constant 3112 : index
    %c0_114 = arith.constant 0 : index
    %217 = vector.load %arg3[%c3112, %c0_114] : memref<3800x128xf32, #tpu.memory_space<vmem>>, vector<1x128xf32>
    %cst_115 = arith.constant dense<0.000000e+00> : vector<1x128xf32>
    %218 = tpu.matmul %209, %210, %cst_115 {dimension_numbers = #tpu.dot_dimension_numbers<[1], [0], [0], [1], [0, 0, 1, 1], [], []>} : vector<1x128xf32>, vector<128x128xf32>, vector<1x128xf32> -> vector<1x128xf32>
    %219 = arith.addf %218, %211 : vector<1x128xf32>
    %cst_116 = arith.constant dense<0.000000e+00> : vector<1x128xf32>
    %220 = tpu.matmul %209, %212, %cst_116 {dimension_numbers = #tpu.dot_dimension_numbers<[1], [0], [0], [1], [0, 0, 1, 1], [], []>} : vector<1x128xf32>, vector<128x128xf32>, vector<1x128xf32> -> vector<1x128xf32>
    %221 = arith.addf %220, %213 : vector<1x128xf32>
    %cst_117 = arith.constant dense<0.000000e+00> : vector<1x128xf32>
    %222 = tpu.matmul %209, %214, %cst_117 {dimension_numbers = #tpu.dot_dimension_numbers<[1], [0], [0], [1], [0, 0, 1, 1], [], []>} : vector<1x128xf32>, vector<128x128xf32>, vector<1x128xf32> -> vector<1x128xf32>
    %223 = arith.addf %222, %215 : vector<1x128xf32>
    %cst_118 = arith.constant dense<0.000000e+00> : vector<1x1xf32>
    %224 = tpu.matmul %219, %221, %cst_118 {dimension_numbers = #tpu.dot_dimension_numbers<[1], [1], [0], [0], [0, 0, 1, 0], [], []>} : vector<1x128xf32>, vector<1x128xf32>, vector<1x1xf32> -> vector<1x1xf32>
    %cst_119 = arith.constant 0.0883883461 : f32
    %225 = vector.broadcast %cst_119 : f32 to vector<1x1xf32>
    %226 = arith.mulf %224, %225 : vector<1x1xf32>
    %cst_120 = arith.constant dense<0xFF800000> : vector<1xf32>
    %227 = vector.multi_reduction <maximumf>, %226, %cst_120 [1] : vector<1x1xf32> to vector<1xf32>
    %228 = vector.shape_cast %227 : vector<1xf32> to vector<1x1xf32>
    %229 = arith.subf %226, %228 : vector<1x1xf32>
    %230 = math.exp %229 : vector<1x1xf32>
    %cst_121 = arith.constant dense<0.000000e+00> : vector<1xf32>
    %231 = vector.multi_reduction <add>, %230, %cst_121 [1] : vector<1x1xf32> to vector<1xf32>
    %232 = vector.shape_cast %231 : vector<1xf32> to vector<1x1xf32>
    %233 = tpu.reciprocal %232 {approx = true} : vector<1x1xf32> -> vector<1x1xf32>
    %234 = arith.mulf %230, %233 : vector<1x1xf32>
    %cst_122 = arith.constant dense<0.000000e+00> : vector<1x128xf32>
    %235 = tpu.matmul %234, %223, %cst_122 {dimension_numbers = #tpu.dot_dimension_numbers<[1], [0], [0], [1], [0, 0, 1, 1], [], []>} : vector<1x1xf32>, vector<1x128xf32>, vector<1x128xf32> -> vector<1x128xf32>
    %236 = arith.addf %219, %235 : vector<1x128xf32>
    %cst_123 = arith.constant dense<0.000000e+00> : vector<1x128xf32>
    %237 = tpu.matmul %236, %216, %cst_123 {dimension_numbers = #tpu.dot_dimension_numbers<[1], [0], [0], [1], [0, 0, 1, 1], [], []>} : vector<1x128xf32>, vector<128x128xf32>, vector<1x128xf32> -> vector<1x128xf32>
    %238 = arith.addf %237, %217 : vector<1x128xf32>
    %cst_124 = arith.constant 0.000000e+00 : f32
    %239 = vector.broadcast %cst_124 : f32 to vector<1x128xf32>
    %240 = arith.maximumf %238, %239 : vector<1x128xf32>
    %241 = arith.addf %236, %240 : vector<1x128xf32>
    %c3120 = arith.constant 3120 : index
    %c0_125 = arith.constant 0 : index
    %242 = vector.load %arg3[%c3120, %c0_125] : memref<3800x128xf32, #tpu.memory_space<vmem>>, vector<128x128xf32>
    %c3248 = arith.constant 3248 : index
    %c0_126 = arith.constant 0 : index
    %243 = vector.load %arg3[%c3248, %c0_126] : memref<3800x128xf32, #tpu.memory_space<vmem>>, vector<1x128xf32>
    %c3256 = arith.constant 3256 : index
    %c0_127 = arith.constant 0 : index
    %244 = vector.load %arg3[%c3256, %c0_127] : memref<3800x128xf32, #tpu.memory_space<vmem>>, vector<128x128xf32>
    %c3384 = arith.constant 3384 : index
    %c0_128 = arith.constant 0 : index
    %245 = vector.load %arg3[%c3384, %c0_128] : memref<3800x128xf32, #tpu.memory_space<vmem>>, vector<1x128xf32>
    %c3392 = arith.constant 3392 : index
    %c0_129 = arith.constant 0 : index
    %246 = vector.load %arg3[%c3392, %c0_129] : memref<3800x128xf32, #tpu.memory_space<vmem>>, vector<128x128xf32>
    %c3520 = arith.constant 3520 : index
    %c0_130 = arith.constant 0 : index
    %247 = vector.load %arg3[%c3520, %c0_130] : memref<3800x128xf32, #tpu.memory_space<vmem>>, vector<1x128xf32>
    %c3528 = arith.constant 3528 : index
    %c0_131 = arith.constant 0 : index
    %248 = vector.load %arg3[%c3528, %c0_131] : memref<3800x128xf32, #tpu.memory_space<vmem>>, vector<128x128xf32>
    %c3656 = arith.constant 3656 : index
    %c0_132 = arith.constant 0 : index
    %249 = vector.load %arg3[%c3656, %c0_132] : memref<3800x128xf32, #tpu.memory_space<vmem>>, vector<1x128xf32>
    %cst_133 = arith.constant dense<0.000000e+00> : vector<1x128xf32>
    %250 = tpu.matmul %241, %242, %cst_133 {dimension_numbers = #tpu.dot_dimension_numbers<[1], [0], [0], [1], [0, 0, 1, 1], [], []>} : vector<1x128xf32>, vector<128x128xf32>, vector<1x128xf32> -> vector<1x128xf32>
    %251 = arith.addf %250, %243 : vector<1x128xf32>
    %cst_134 = arith.constant dense<0.000000e+00> : vector<1x128xf32>
    %252 = tpu.matmul %241, %244, %cst_134 {dimension_numbers = #tpu.dot_dimension_numbers<[1], [0], [0], [1], [0, 0, 1, 1], [], []>} : vector<1x128xf32>, vector<128x128xf32>, vector<1x128xf32> -> vector<1x128xf32>
    %253 = arith.addf %252, %245 : vector<1x128xf32>
    %cst_135 = arith.constant dense<0.000000e+00> : vector<1x128xf32>
    %254 = tpu.matmul %241, %246, %cst_135 {dimension_numbers = #tpu.dot_dimension_numbers<[1], [0], [0], [1], [0, 0, 1, 1], [], []>} : vector<1x128xf32>, vector<128x128xf32>, vector<1x128xf32> -> vector<1x128xf32>
    %255 = arith.addf %254, %247 : vector<1x128xf32>
    %cst_136 = arith.constant dense<0.000000e+00> : vector<1x1xf32>
    %256 = tpu.matmul %251, %253, %cst_136 {dimension_numbers = #tpu.dot_dimension_numbers<[1], [1], [0], [0], [0, 0, 1, 0], [], []>} : vector<1x128xf32>, vector<1x128xf32>, vector<1x1xf32> -> vector<1x1xf32>
    %cst_137 = arith.constant 0.0883883461 : f32
    %257 = vector.broadcast %cst_137 : f32 to vector<1x1xf32>
    %258 = arith.mulf %256, %257 : vector<1x1xf32>
    %cst_138 = arith.constant dense<0xFF800000> : vector<1xf32>
    %259 = vector.multi_reduction <maximumf>, %258, %cst_138 [1] : vector<1x1xf32> to vector<1xf32>
    %260 = vector.shape_cast %259 : vector<1xf32> to vector<1x1xf32>
    %261 = arith.subf %258, %260 : vector<1x1xf32>
    %262 = math.exp %261 : vector<1x1xf32>
    %cst_139 = arith.constant dense<0.000000e+00> : vector<1xf32>
    %263 = vector.multi_reduction <add>, %262, %cst_139 [1] : vector<1x1xf32> to vector<1xf32>
    %264 = vector.shape_cast %263 : vector<1xf32> to vector<1x1xf32>
    %265 = tpu.reciprocal %264 {approx = true} : vector<1x1xf32> -> vector<1x1xf32>
    %266 = arith.mulf %262, %265 : vector<1x1xf32>
    %cst_140 = arith.constant dense<0.000000e+00> : vector<1x128xf32>
    %267 = tpu.matmul %266, %255, %cst_140 {dimension_numbers = #tpu.dot_dimension_numbers<[1], [0], [0], [1], [0, 0, 1, 1], [], []>} : vector<1x1xf32>, vector<1x128xf32>, vector<1x128xf32> -> vector<1x128xf32>
    %268 = arith.addf %251, %267 : vector<1x128xf32>
    %cst_141 = arith.constant dense<0.000000e+00> : vector<1x128xf32>
    %269 = tpu.matmul %268, %248, %cst_141 {dimension_numbers = #tpu.dot_dimension_numbers<[1], [0], [0], [1], [0, 0, 1, 1], [], []>} : vector<1x128xf32>, vector<128x128xf32>, vector<1x128xf32> -> vector<1x128xf32>
    %270 = arith.addf %269, %249 : vector<1x128xf32>
    %cst_142 = arith.constant 0.000000e+00 : f32
    %271 = vector.broadcast %cst_142 : f32 to vector<1x128xf32>
    %272 = arith.maximumf %270, %271 : vector<1x128xf32>
    %273 = arith.addf %268, %272 : vector<1x128xf32>
    %c3664 = arith.constant 3664 : index
    %c0_143 = arith.constant 0 : index
    %274 = vector.load %arg3[%c3664, %c0_143] : memref<3800x128xf32, #tpu.memory_space<vmem>>, vector<128x32xf32>
    %cst_144 = arith.constant dense<0.000000e+00> : vector<1x32xf32>
    %275 = tpu.matmul %273, %274, %cst_144 {dimension_numbers = #tpu.dot_dimension_numbers<[1], [0], [0], [1], [0, 0, 1, 1], [], []>} : vector<1x128xf32>, vector<128x32xf32>, vector<1x32xf32> -> vector<1x32xf32>
    %c3792 = arith.constant 3792 : index
    %c0_145 = arith.constant 0 : index
    %276 = vector.load %arg3[%c3792, %c0_145] : memref<3800x128xf32, #tpu.memory_space<vmem>>, vector<1x32xf32>
    %277 = arith.addf %275, %276 : vector<1x32xf32>
    %c0_146 = arith.constant 0 : index
    %c0_147 = arith.constant 0 : index
    %c0_148 = arith.constant 0 : index
    %278 = vector.load %arg4[%c0_146, %c0_147, %c0_148] : memref<1x1x32xf32, #tpu.memory_space<vmem>>, vector<1x1x32xf32>
    %279 = vector.shape_cast %278 : vector<1x1x32xf32> to vector<1x32xf32>
    %280 = vector.shape_cast %277 : vector<1x32xf32> to vector<1x1x32xf32>
    tpu.vector_store %arg4[%c0_146, %c0_147, %c0_148], %280 {strides = array<i32>} : memref<1x1x32xf32, #tpu.memory_space<vmem>>, vector<1x1x32xf32>,
    return
  }
  func.func @transform_0(%arg0: i32) -> (i32, i32, i32) {
    %c0_i32 = arith.constant 0 : i32
    %c0_i32_0 = arith.constant 0 : i32
    %c0_i32_1 = arith.constant 0 : i32
    return %arg0, %c0_i32, %c0_i32_0 : i32, i32, i32
  }
  func.func @transform_1(%arg0: i32) -> (i32, i32, i32) {
    %c0_i32 = arith.constant 0 : i32
    %c0_i32_0 = arith.constant 0 : i32
    %c0_i32_1 = arith.constant 0 : i32
    return %arg0, %c0_i32, %c0_i32_0 : i32, i32, i32
  }
  func.func @transform_2(%arg0: i32) -> (i32, i32) {
    %c0_i32 = arith.constant 0 : i32
    %c0_i32_0 = arith.constant 0 : i32
    %c0_i32_1 = arith.constant 0 : i32
    return %c0_i32, %c0_i32_0 : i32, i32
  }
  func.func @transform_3(%arg0: i32) -> (i32, i32, i32) {
    %c0_i32 = arith.constant 0 : i32
    %c0_i32_0 = arith.constant 0 : i32
    %c0_i32_1 = arith.constant 0 : i32
    return %arg0, %c0_i32, %c0_i32_0 : i32, i32, i32
  }
}

</mosaic_0001>

<bundles_post_ra>
// kernel: det_encoder_forward.1
= control target key start
LH: loop header
LB: loop body
LE: loop exit
PB: predicated region body
PF: predicated region fallthrough
CT: control target
= control target key end

     0   :  { %8 = vsyncpa [#allocation3], 0  ;;  %s7561_s0 = inlined_call_operand.hbm [shape: f32[2,8,16], index: 0, kind: input, shape index: {}]   ;;  %s7562_s1 = inlined_call_operand.vmem [shape: f32[2,8,4], index: 1, kind: input, shape index: {}]   ;;  %s7563_s2 = inlined_call_operand.hbm [shape: f32[3800,128], index: 2, kind: input, shape index: {}]   ;;  %s7564_s3 = inlined_call_operand.vmem [shape: f32[2,1,32], index: 3, kind: output, shape index: {}]  }
   0x1   :  { %10 = vsyncpa [#allocation3 + $0x1], 0 }
   0x2   :  { %11 = vsyncpa [#allocation5], 0  ;;  %s7029_s12 = smov 0   ;;  %s7031_s13 = smov 0  }
   0x3   :  { %s7033_s14 = smov 0   ;;  %s7035_s15 = smov 0  }
   0x4 LB: > { %s7048_s16 = sadd.s32 4294967295, %s7000_s15   ;;  %p37_p0 = scmp.ne.s32.totalorder %s6992_s13, %s6988_s12  ;;  %s7000_s15 = sphi %s7035_s15, %s7579_s15   ;;  %s6996_s14 = sphi %s7033_s14, %s7578_s14   ;;  %s6992_s13 = sphi %s7031_s13, %s7577_s13   ;;  %s6988_s12 = sphi %s7029_s12, %s7576_s12  }
   0x5   : > { %p7565_p1 = scmp.eq.s32.totalorder %s7048_s16, 0  ;;  %p4380_p2 = scmp.ge.s32.totalorder %s7000_s15, 1 }
   0x6   : > { %p121_p3 = scmp.lt.s32.totalorder %s7000_s15, 3  ;;  %s7002_s19 = smov [#allocation4]  }
   0x7   : > { %p7056_p4 = por %p7565_p1, %p37_p0  ;;  %s133_s20 = sshll.u32 %s7002_s19, 4  ;;  %s134_s20 = int_to_ptr.vmem [resolvable:$true] %s133_s20 }
   0x8   : > { %p7060_p5 = pnand %p4380_p2, %p121_p3  ;;  %s7073_s22 = sadd.s32 1, %s7000_s15  }
   0x9   : > { %s7568_s17 = scalar_select %p7056_p4, 1, 0 }
   0xa   : > { %s7569_s18 = scalar_select %p7060_p5, 1, 0 }
   0xb   : > { %p6803_p6 = pneg %p7060_p5  ;;  %s24_s23 = sadd.s32 1, %s6996_s14 }
   0xc   : > { %s21_s24 = ssub.s32 %s7000_s15, %s7073_s22  ;;  %s6904_s27 = scalar_lea.hbm %s7563_s2, 60800 }
   0xd   : > { %p7068_p7 = pnand %p6803_p6, %p7565_p1  ;;  %p6905_p8 = scmp.ne.s32.totalorder %s7563_s2, %s6904_s27 }
   0xe   : > { %p6911_p12 = scmp.lt.u32.totalorder %s6904_s27, %s7563_s2 }
   0xf   : > { %p6906_p9 = pneg %p7068_p7 }
  0x11   : > { %p6907_p10 = pnand %p6906_p9, %p6905_p8 }
  0x13   : > { %p6908_p11 = pneg %p6907_p10 }
  0x15   : > { %p6913_p13 = pnand %p6911_p12, %p6908_p11 }
  0x17   : > { %6916 = shalt.err (!%p6913_p13)
}
  0x18   : > { %s6917_s5 = scalar_lea.vmem %s134_s20, 60800  ;;  %p6925_p6 = scmp.lt.s32.totalorder %s134_s20, %s134_s20 }
  0x19   : > { %p6918_p0 = scmp.ne.s32.totalorder %s134_s20, %s6917_s5  ;;  %p6926_p1 = scmp.lt.s32.totalorder %s6917_s5, %s6917_s5 }
  0x1b   : > { %p6920_p2 = pnand %p6918_p0, %p6906_p9  ;;  %p6927_p4 = por %p6926_p1, %p6925_p6 }
  0x1d   : > { %p6921_p3 = pneg %p6920_p2 }
  0x1f   : > { %p6928_p5 = pnand %p6927_p4, %p6921_p3 }
  0x21   : > { %6931 = shalt.err (!%p6928_p5)
}
  0x22   : > { %s7003_s6 = smov 128   ;;  %s7004_s7 = smov 8  }
  0x23   : > { %6806 = dma.hbm_to_vmem [thread:$0]  (!%p7068_p7), %s7563_s2, 60800, %s134_s20, [#allocation5], %s7003_s6, %s7003_s6, %s7004_s7  }
  0x24   : > { %p22_p8 = scmp.eq.s32.totalorder %s21_s24, 0  ;;  %p31_p9 = scmp.ne.s32.totalorder %s6996_s14, %s6992_s13 }
  0x25   : > { %p32_p1 = scmp.eq.s32.totalorder %s7000_s15, 0  ;;  %p6812_p4 = scmp.lt.s32.totalorder %s7000_s15, 2 }
  0x26   : > { %s7099_s10 = scalar_select %p22_p8, %s6996_s14, %s24_s23  }
  0x27   : > { %p33_p5 = por %p32_p1, %p31_p9  ;;  %s147_s11 = sand.u32 1, %s6996_s14  }
  0x28   : > { %s4383_s12 = sshll.u32 %s147_s11, 3  ;;  %s4384_s19 = sshll.u32 %s7000_s15, 7 }
  0x29   : > { %s7106_s27 = scalar_lea.hbm %s7561_s0, %s4384_s19  ;;  %s151_s20 = scalar_lea.vmem [#allocation2], %s4383_s12 }
  0x2a   : > { %s158_s21 = sshll.u32 %s151_s20, 4  ;;  %p7110_p7 = pnand %p6812_p4, %p33_p5  ;;  %s7108_s21 = int_to_ptr.vmem [resolvable:$true] %s158_s21 }
  0x2b   : > { %s148_s15 = scalar_lea.sflag [#allocation3], %s147_s11  ;;  %s6932_s24 = scalar_lea.hbm %s7106_s27, 128 }
  0x2c   : > { %p6933_p10 = scmp.ne.s32.totalorder %s7106_s27, %s6932_s24  ;;  %p6934_p11 = pneg %p7110_p7 }
  0x2d   : > { %s6937_s30 = scalar_lea.hbm %s7561_s0, 256  ;;  %p6938_p0 = scmp.lt.u32.totalorder %s7106_s27, %s7561_s0 }
  0x2e   : > { %p6935_p12 = pnand %p6934_p11, %p6933_p10  ;;  %p6939_p2 = scmp.lt.u32.totalorder %s6937_s30, %s6932_s24 }
  0x2f   : > { %p6941_p6 = scmp.lt.u32.totalorder %s6932_s24, %s7106_s27 }
  0x30   : > { %p6936_p13 = pneg %p6935_p12  ;;  %p6940_p3 = por %p6939_p2, %p6938_p0 }
  0x32   : > { %p6942_p8 = por %p6941_p6, %p6940_p3 }
  0x34   : > { %p6943_p9 = pnand %p6942_p8, %p6936_p13 }
  0x36   : > { %6946 = shalt.err (!%p6943_p9)
}
  0x37   : > { %s6947_s6 = scalar_lea.vmem %s7108_s21, 128  ;;  %s7005_s7 = smov [#allocation2]  }
  0x38   : > { %p6948_p1 = scmp.ne.s32.totalorder %s7108_s21, %s6947_s6  ;;  %s6952_s8 = sshll.u32 %s7005_s7, 4  ;;  %s6953_s8 = int_to_ptr.vmem [resolvable:$false] %s6952_s8 }
  0x39   : > { %s6954_s9 = scalar_lea.vmem %s6953_s8, 256  ;;  %p6955_p10 = scmp.lt.s32.totalorder %s7108_s21, %s6953_s8 }
  0x3a   : > { %p6950_p4 = pnand %p6948_p1, %p6934_p11  ;;  %p6956_p12 = scmp.lt.s32.totalorder %s6954_s9, %s6947_s6 }
  0x3c   : > { %p6951_p5 = pneg %p6950_p4  ;;  %p6957_p0 = por %p6956_p12, %p6955_p10 }
  0x3e   : > { %p6958_p2 = pnand %p6957_p0, %p6951_p5 }
  0x40   : > { %6961 = shalt.err (!%p6958_p2)
}
  0x41   : > { %6810 = dma.hbm_to_vmem [thread:$0]  (!%p7110_p7), %s7106_s27, 128, %s7108_s21, %s148_s15  }
  0x42   : > { %p7572_p13 = scmp.ne.s32.totalorder %s7569_s18, 0 }
  0x43   : > { %s176_s11 = sand.u32 (!%p7572_p13), 1, %s6992_s13   ;;  %p7573_p11 = scmp.ne.s32.totalorder (!%p7572_p13), %s7568_s17, 0 }
  0x44   : > { %174 = sbr.rel (%p7572_p13) target bundleno = 8307 (0x2073), region = 32  ;;  %s7142_s12 = sshll.u32 (!%p7572_p13), %s176_s11, 3 }
  0x45   : > { %s177_s19 = scalar_lea.sflag (!%p7572_p13), [#allocation3], %s176_s11  ;;  %s180_s25 = scalar_lea.vmem (!%p7572_p13), [#allocation2], %s7142_s12 }
  0x4b   : > { %6979 = dma.done.wait (%p7573_p11), %s177_s19, 128  }
  0x4c   : > { %6981 = vsyncadd (%p7573_p11), %s177_s19, 4294967168  ;;  %p7574_p3 = scmp.eq.s32.totalorder %s7048_s16, 0 }
  0x4e   : > { %6983 = dma.done.wait (%p7574_p3), [#allocation5], 60800   ;;  %p7575_p7 = pmov %p7574_p3 }
  0x4f   : > { %v7006_v0 = vmov 0.0|0.0   ;;  %v7007_v1 = vmov 0.0   ;;  %p209_p6 = scmp.lt.s32.totalorder %s7048_s16, 1  ;;  %vm7008_vm0 = vmmov 0   ;;  %vm225_vm1 = vcmask 1043456   ;;  %v218_v2 = vld [vmem:[#allocation4] sm:$0xff] }
  0x50   : > { %6985 = vsyncadd (%p7575_p7), [#allocation5], 4294906496  ;;  %6058 = vmatprep.subr.bf16.mxu1 %v7006_v0  ;;  %4972 = vmatprep.subr.mxu0 %v7007_v1  ;;  %vm221_vm2 = vcmask 31744   ;;  %v219_v3 = vld [vmem:[#allocation4 + $0x8] sm:$0xff]  ;;  %v220_v4 = vld [vmem:[#allocation4 + $0x10] sm:$0xf] }
  0x51   : > { %4974 = vmatprep.mubr.msk.f32.mxu0 %vm7008_vm0, %v7007_v1  ;;  %4981 = vmatprep.mubr.msk.f32.mxu1 %vm7008_vm0, %v7007_v1  ;;  %s7581_s16 = smov (!%p209_p6, %s7048_s16), 1  ;;  %v6059_v5 = vpack.c.bf16 %v219_v3, %v218_v2  ;;  %v216_v7 = vld [vmem:[%s180_s25] sm:$0xff]  ;;  %vm299_vm3 = vcmask 130048   ;;  %v380_v8 = vld [vmem:[#allocation4 + $0x20] sm:$0xff]  ;;  %v381_v9 = vld [vmem:[#allocation4 + $0x28] sm:$0xff]  ;;  %vm389_vm4 = vcmask 261120  }
  0x52   : > { %s4388_s17 = sshll.u32 %s7581_s16, 3  ;;  %4973 = vmatpush3.msk.msra.mxu0 %vm225_vm1, %v220_v4  ;;  %v6062_v10 = vpack.c.bf16 %v381_v9, %v380_v8  ;;  %v382_v11 = vld [vmem:[#allocation4 + $0x30] sm:$0xff]  ;;  %v383_v12 = vld [vmem:[#allocation4 + $0x38] sm:$0xff]  ;;  %v467_v14 = vld [vmem:[#allocation4 + $0x68] sm:$0xff]  ;;  %vm840_vm5 = vcmask 64512   ;;  %vm3173_vm6 = vcmask 57344   ;;  %s215_s23 = scalar_lea.vmem %s7564_s3, %s7581_s16 }
  0x53   : > { %s212_s27 = scalar_lea.vmem %s7562_s1, %s4388_s17  ;;  %6061 = vmatprep.subr.bf16.mxu0 %v7006_v0  ;;  %6060 = vmatpush3.bf16.msra.mxu1 %v6059_v5  ;;  %v6065_v13 = vpack.c.bf16 %v383_v12, %v382_v11  ;;  %v468_v15 = vld [vmem:[#allocation4 + $0x70] sm:$0xff]  ;;  %v469_v16 = vld [vmem:[#allocation4 + $0x78] sm:$0xff]  ;;  %v470_v18 = vld [vmem:[#allocation4 + $0x80] sm:$0xff]  ;;  %vm3610_vm7 = vcmask 1040384   ;;  %vm3621_vm8 = vcmask 7168   ;;  %vm4296_vm9 = vcmask 253952  }
  0x54   : > { %v217_v6 = vld [vmem:[%s212_s27] sm:$0xff]  ;;  %v6067_v17 = vpack.c.bf16 %v468_v15, %v467_v14  ;;  %v6071_v19 = vpack.c.bf16 %v470_v18, %v469_v16  ;;  %v471_v20 = vld [vmem:[#allocation4 + $0x88] sm:$0xff]  ;;  %v473_v23 = vld [vmem:[#allocation4 + $0x98] sm:$0xff] }
  0x55   : > { %4975 = vmatmul.mubr.msk.f32.vlgmr.msra.gmra.mrb[0].mxu0 %vm221_vm2, %v217_v6  ;;  %v472_v21 = vld [vmem:[#allocation4 + $0x90] sm:$0xff]  ;;  %v474_v24 = vld [vmem:[#allocation4 + $0xa0] sm:$0xff]  ;;  %v475_v26 = vld [vmem:[#allocation4 + $0xa8] sm:$0xff] }
  0x56   : > { %4992 = vmatprep.mubr.msk.f32.mxu0 %vm7008_vm0, %v7007_v1  ;;  %4982 = vmatmul.mubr.msk.f32.vlgmr.msra.gmra.mrb[0].mxu1 %vm299_vm3, %v216_v7  ;;  %v6075_v22 = vpack.c.bf16 %v472_v21, %v471_v20  ;;  %v6079_v25 = vpack.c.bf16 %v474_v24, %v473_v23  ;;  %v476_v27 = vld [vmem:[#allocation4 + $0xb0] sm:$0xff]  ;;  %v477_v29 = vld [vmem:[#allocation4 + $0xb8] sm:$0xff]  ;;  %v478_v30 = vld [vmem:[#allocation4 + $0xc0] sm:$0xff] }
  0x57   : > { %6063 = vmatpush3.bf16.msra.mxu0 %v6062_v10  ;;  %6068 = vmatprep.subr.bf16.mxu1 %v6067_v17  ;;  %v6083_v28 = vpack.c.bf16 %v476_v27, %v475_v26  ;;  %v6087_v31 = vpack.c.bf16 %v478_v30, %v477_v29  ;;  %v479_v32 = vld [vmem:[#allocation4 + $0xc8] sm:$0xff]  ;;  %v480_v33 = vld [vmem:[#allocation4 + $0xd0] sm:$0xff]  ;;  %v4392_v38 = vld [vmem:[#allocation4 + $0x18] ss:$0 sm:$0xff] }
  0x58   : > { %6064 = vmatprep.subr.bf16.mxu0 %v7006_v0  ;;  %6070 = vmatpush3.bf16.msra.mxu1 %v6067_v17  ;;  %v6091_v34 = vpack.c.bf16 %v480_v33, %v479_v32  ;;  %v484_v41 = vld [vmem:[#allocation4 + $0xf0] sm:$0xff]  ;;  %v485_v42 = vld [vmem:[#allocation4 + $0xf8] sm:$0xff]  ;;  %v486_v46 = vld [vmem:[#allocation4 + $0x100] sm:$0xff] }
  0x59   : > { %6072 = vmatprep.subr.bf16.mxu1 %v6071_v19  ;;  %v6100_v44 = vpack.c.bf16 %v485_v42, %v484_v41  ;;  %v487_v47 = vld [vmem:[#allocation4 + $0x108] sm:$0xff]  ;;  %v481_v49 = vld [vmem:[#allocation4 + $0xd8] sm:$0xff]  ;;  %v482_v50 = vld [vmem:[#allocation4 + $0xe0] sm:$0xff] }
  0x5a   : > { %v6103_v48 = vpack.c.bf16 %v487_v47, %v486_v46  ;;  %v6095_v51 = vpack.c.bf16 %v482_v50, %v481_v49  ;;  %v463_v52 = vld [vmem:[#allocation4 + $0x48] sm:$0xff]  ;;  %v464_v53 = vld [vmem:[#allocation4 + $0x50] sm:$0xff]  ;;  %v465_v54 = vld [vmem:[#allocation4 + $0x58] sm:$0xff] }
  0x5b   : > { %6066 = vmatpush3.bf16.msra.mxu0 %v6065_v13  ;;  %5027 = vmatprep.mubr.f32.mxu1 %v463_v52  ;;  %v466_v55 = vld [vmem:[#allocation4 + $0x60] sm:$0xff]  ;;  %v489_v56 = vld [vmem:[#allocation4 + $0x118] sm:$0xff]  ;;  %v491_v63 = vld [vmem:[#allocation4 + $0x128] sm:$0xff] }
  0x5c   : > { %6099 = vmatprep.subr.bf16.mxu0 %v7006_v0  ;;  %6074 = vmatpush3.bf16.msra.mxu1 %v6071_v19  ;;  %v490_v57 = vld [vmem:[#allocation4 + $0x120] sm:$0xff]  ;;  %v492_v2 = vld [vmem:[#allocation4 + $0x130] sm:$0xff]  ;;  %v4395_v4 = vld [vmem:[#allocation4 + $0xe8] ss:$0 sm:$0xff] }
  0x5d   : > { %6076 = vmatprep.subr.bf16.mxu1 %v6075_v22  ;;  %v4393_v58 = vld [vmem:[#allocation4 + $0x40] ss:$0 sm:$0xff]  ;;  %v6106_v60 = vpack.c.bf16 %v490_v57, %v489_v56  ;;  %v6109_v3 = vpack.c.bf16 %v492_v2, %v491_v63  ;;  %v4396_v13 = vld [vmem:[#allocation4 + $0x110] ss:$0 sm:$0xff]  ;;  %v4398_v17 = vld [vmem:[#allocation4 + $0x138] ss:$0 sm:$0xff] }
  0x5e   : > { %v497_v57 = vld [vmem:[#allocation4 + $0x158] sm:$0xff]  ;;  %v500_v63 = vld [vmem:[#allocation4 + $0x170] sm:$0xff] }
  0x5f   : > { %v501_v2 = vld [vmem:[#allocation4 + $0x178] sm:$0xff] }
  0x60   : > { %6078 = vmatpush3.bf16.msra.mxu1 %v6075_v22 }
  0x61   : > { %6080 = vmatprep.subr.bf16.mxu1 %v6079_v25 }
  0x64   : > { %6082 = vmatpush3.bf16.msra.mxu1 %v6079_v25 }
  0x65   : > { %6084 = vmatprep.subr.bf16.mxu1 %v6083_v28 }
  0x68   : > { %6086 = vmatpush3.bf16.msra.mxu1 %v6083_v28 }
  0x69   : > { %6088 = vmatprep.subr.bf16.mxu1 %v6087_v31 }
  0x6c   : > { %6090 = vmatpush3.bf16.msra.mxu1 %v6087_v31 }
  0x6d   : > { %6092 = vmatprep.subr.bf16.mxu1 %v6091_v34 }
  0x70   : > { %6094 = vmatpush3.bf16.msra.mxu1 %v6091_v34 }
  0x71   : > { %6096 = vmatprep.subr.bf16.mxu1 %v6095_v51 }
  0x74   : > { %6098 = vmatpush3.bf16.msra.mxu1 %v6095_v51 }
  0x77   : > { %5028 = vmatmul.mubr.f32.vlgmr.msra.gmra.mrb[2].mxu1 %v464_v53  ;;  %v494_v53 = vld [vmem:[#allocation4 + $0x140] sm:$0xff] }
  0x78   : > { %5030 = vmatprep.mubr.f32.mxu1 %v465_v54  ;;  %v495_v54 = vld [vmem:[#allocation4 + $0x148] sm:$0xff] }
  0x79   : > { %v6111_v56 = vpack.c.bf16 %v495_v54, %v494_v53  ;;  %v1097_v53 = vld [vmem:[#allocation4 + $0x238] sm:$0xff] }
  0x7b   : > { %5031 = vmatmul.mubr.f32.gmra.mrb[4].mxu1 %v466_v55  ;;  %v496_v55 = vld [vmem:[#allocation4 + $0x150] sm:$0xff]  ;;  %6112 = vmatprep.subr.bf16.mxu1 %v6111_v56 }
  0x7c   : > { %6114 = vmatpush3.bf16.msra.mxu1 %v6111_v56  ;;  %v1099_v56 = vld [vmem:[#allocation4 + $0x248] sm:$0xff] }
 0x128   : > { %v295_v35 = vpop.f32.mrb[0].mxu0 }
 0x129   : > { %v4976_v36 = vpop.f32.mrb[1].mxu0  ;;  %v369_v37 = vpop.f32.mrb[0].mxu1 }
 0x12a   : > { %v370_v39 = vadd.f32 %v369_v37, %v295_v35  ;;  %v4983_v40 = vpop.f32.mrb[1].mxu1 }
 0x12c   : > { %v378_v43 = vadd.f32 %v4392_v38, %v370_v39 }
 0x12e   : > { %v379_v45 = vmax.f32 %v378_v43, 0.0 }
 0x130   : > { %4993 = vmatmul.mubr.msk.f32.vlgmr.msra.gmra.mrb[2].mxu0 %vm389_vm4, %v379_v45 }
 0x131   : > { %6101 = vmatpush3.bf16.msra.mxu0 %v6100_v44  ;;  %5041 = vmatprep.mubr.msk.f32.mxu0 %vm7008_vm0, %v7007_v1 }
 0x132   : > { %6102 = vmatprep.subr.bf16.mxu0 %v7006_v0 }
 0x135   : > { %6104 = vmatpush3.bf16.msra.mxu0 %v6103_v48 }
 0x136   : > { %6105 = vmatprep.subr.bf16.mxu0 %v7006_v0 }
 0x14a   : > { %v5029_v5 = vpop.f32.mrb[2].mxu1 }
 0x14b   : > { %v7186_v6 = vadd.f32 %v5029_v5, %v4395_v4  ;;  %v581_v7 = vpop.f32.mrb[3].mxu1  ;;  %v503_v5 = vld [vmem:[#allocation4 + $0x188] sm:$0xff] }
 0x14c   : > { %v7188_v8 = vadd.f32 %v4395_v4, %v581_v7 }
 0x14e   : > { %v5032_v9 = vpop.f32.mrb[4].mxu1 }
 0x14f   : > { %v7191_v10 = vadd.f32 %v5032_v9, %v4395_v4  ;;  %v591_v11 = vpop.f32.mrb[5].mxu1  ;;  %v504_v9 = vld [vmem:[#allocation4 + $0x190] sm:$0xff] }
 0x150   : > { %v7193_v12 = vadd.f32 %v4395_v4, %v591_v11  ;;  %v502_v4 = vld [vmem:[#allocation4 + $0x180] sm:$0xff]  ;;  %v505_v11 = vld [vmem:[#allocation4 + $0x198] sm:$0xff] }
 0x151   : > { %v6127_v7 = vpack.c.bf16 %v503_v5, %v502_v4  ;;  %v1109_v5 = vld [vmem:[#allocation4 + $0x298] sm:$0xff] }
 0x203   : > { %v459_v59 = vpop.f32.mrb[2].mxu0 }
 0x204   : > { %v7177_v61 = vadd.f32 %v4393_v58, %v459_v59  ;;  %v4994_v62 = vpop.f32.mrb[3].mxu0  ;;  %v6115_v58 = vpack.c.bf16 %v497_v57, %v496_v55  ;;  %v498_v59 = vld [vmem:[#allocation4 + $0x160] sm:$0xff] }
 0x205   : > { %v1098_v55 = vld [vmem:[#allocation4 + $0x240] sm:$0xff] }
 0x206   : > { %5042 = vmatmul.mubr.msk.f32.vlgmr.msra.gmra.mrb[4].mxu0 %vm389_vm4, %v7177_v61  ;;  %6116 = vmatprep.subr.bf16.mxu1 %v6115_v58  ;;  %v6169_v57 = vpack.c.bf16 %v1099_v56, %v1098_v55 }
 0x207   : > { %6107 = vmatpush3.bf16.msra.mxu0 %v6106_v60  ;;  %5052 = vmatprep.mubr.msk.f32.mxu0 %vm7008_vm0, %v7007_v1  ;;  %v499_v60 = vld [vmem:[#allocation4 + $0x168] sm:$0xff] }
 0x208   : > { %6108 = vmatprep.subr.bf16.mxu0 %v7006_v0  ;;  %v6119_v62 = vpack.c.bf16 %v499_v60, %v498_v59  ;;  %6118 = vmatpush3.bf16.msra.mxu1 %v6115_v58  ;;  %v1107_v59 = vld [vmem:[#allocation4 + $0x288] sm:$0xff]  ;;  %v1108_v60 = vld [vmem:[#allocation4 + $0x290] sm:$0xff] }
 0x20a   : > { %6120 = vmatprep.subr.bf16.mxu1 %v6119_v62 }
 0x20b   : > { %6110 = vmatpush3.bf16.msra.mxu0 %v6109_v3  ;;  %v6123_v3 = vpack.c.bf16 %v501_v2, %v500_v63 }
 0x20c   : > { %6122 = vmatpush3.bf16.msra.mxu1 %v6119_v62 }
 0x20d   : > { %6124 = vmatprep.subr.bf16.mxu1 %v6123_v3 }
 0x20e   : > { %5053 = vmatmul.mubr.msk.f32.vlgmr.msra.gmra.mrb[6].mxu0 %vm389_vm4, %v7177_v61 }
 0x20f   : > { %5057 = vmatprep.mubr.f32.mxu0 %v7188_v8 }
 0x210   : > { %6126 = vmatpush3.bf16.msra.mxu1 %v6123_v3  ;;  %v6185_v3 = vpack.c.bf16 %v1108_v60, %v1107_v59 }
 0x211   : > { %6128 = vmatprep.subr.bf16.mxu1 %v6127_v7 }
 0x214   : > { %6130 = vmatpush3.bf16.msra.mxu1 %v6127_v7  ;;  %v1110_v7 = vld [vmem:[#allocation4 + $0x2a0] sm:$0xff] }
 0x2d9   : > { %v673_v14 = vpop.f32.mrb[4].mxu0 }
 0x2da   : > { %v674_v15 = vadd.f32 %v4396_v13, %v673_v14  ;;  %v5043_v16 = vpop.f32.mrb[5].mxu0  ;;  %v6131_v13 = vpack.c.bf16 %v505_v11, %v504_v9  ;;  %v506_v14 = vld [vmem:[#allocation4 + $0x1a0] sm:$0xff] }
 0x2dc   : > { %5055 = vmatprep.subr.mxu0 %v674_v15  ;;  %6132 = vmatprep.subr.bf16.mxu1 %v6131_v13 }
 0x2dd   : > { %5056 = vmatpush3.xpose.msra.mxu0 %v674_v15  ;;  %v507_v15 = vld [vmem:[#allocation4 + $0x1a8] sm:$0xff]  ;;  %6134 = vmatpush3.bf16.msra.mxu1 %v6131_v13 }
 0x2de   : > { %v6135_v16 = vpack.c.bf16 %v507_v15, %v506_v14  ;;  %v1111_v14 = vld [vmem:[#allocation4 + $0x2a8] sm:$0xff]  ;;  %v1112_v15 = vld [vmem:[#allocation4 + $0x2b0] sm:$0xff] }
 0x2e0   : > { %5058 = vmatmul.mubr.f32.vlgmr.msra.gmra.mrb[8].mxu0 %v7186_v6  ;;  %6136 = vmatprep.subr.bf16.mxu1 %v6135_v16 }
 0x2e1   : > { %v747_v18 = vpop.f32.mrb[6].mxu0  ;;  %5060 = vmatprep.mubr.f32.mxu0 %v7193_v12  ;;  %6138 = vmatpush3.bf16.msra.mxu1 %v6135_v16 }
 0x2e2   : > { %v748_v19 = vadd.f32 %v4398_v17, %v747_v18  ;;  %v5054_v20 = vpop.f32.mrb[7].mxu0 }
 0x2e4   : > { %5063 = vmatprep.subr.mxu0 %v748_v19  ;;  %5061 = vmatmul.mubr.f32.gmra.mrb[10].mxu0 %v7191_v10 }
 0x2e5   : > { %5064 = vmatpush3.msra.mxu0 %v748_v19 }
 0x2e6   : > { %6143 = vmatprep.subr.bf16.mxu0 %v7006_v0 }
 0x3b3   : > { %v5059_v21 = vpop.f32.mrb[8].mxu0 }
 0x3b4   : > { %v817_v22 = vpop.f32.mrb[9].mxu0  ;;  %v837_v24 = vmul.f32 0.088388346, %v5059_v21 }
 0x3b5   : > { %v836_v23 = vmul.f32 0.088388346, %v817_v22 }
 0x3b6   : > { %v844_v30 = vsel %vm840_vm5, %v837_v24, -inf }
 0x3b7   : > { %v5062_v25 = vpop.f32.mrb[10].mxu0  ;;  %v841_v26 = vsel %vm840_vm5, %v836_v23, -inf }
 0x3b8   : > { %842 = vmax.xlane.f32.xlu0 %v841_v26  ;;  %v827_v27 = vpop.f32.mrb[11].mxu0  ;;  %v839_v29 = vmul.f32 0.088388346, %v5062_v25 }
 0x3b9   : > { %v838_v28 = vmul.f32 0.088388346, %v827_v27 }
 0x3ba   : > { %v850_v32 = vsel %vm840_vm5, %v839_v29, -inf }
 0x3bb   : > { %v847_v31 = vsel %vm840_vm5, %v838_v28, -inf }
 0x3bc   : > { %845 = vmax.xlane.f32.xlu0 %v844_v30  ;;  %848 = vmax.xlane.f32.xlu1 %v847_v31  ;;  %v1086_v30 = vld [vmem:[#allocation4 + $0x1e0] sm:$0xff] }
 0x3c0   : > { %851 = vmax.xlane.f32.xlu1 %v850_v32 }
 0x445   : > { %v843_v33 = vpop.xlane.xlu0 %842 }
 0x446   : > { %v853_v34 = vsub.f32 %v836_v23, %v843_v33  ;;  %v1083_v23 = vld [vmem:[#allocation4 + $0x1c8] sm:$0xff] }
 0x448   : > { %v857_v35 = vmul.f32 1.442695, %v853_v34 }
 0x449   : > { %v846_v36 = vpop.xlane.xlu0 %845  ;;  %v849_v37 = vpop.xlane.xlu1 %848 }
 0x44a   : > { %6852 = vpow2.f32 %v857_v35  ;;  %v854_v38 = vsub.f32 %v837_v24, %v846_v36  ;;  %v855_v39 = vsub.f32 %v838_v28, %v849_v37  ;;  %v1084_v24 = vld [vmem:[#allocation4 + $0x1d0] sm:$0xff]  ;;  %v509_v36 = vld [vmem:[#allocation4 + $0x1b8] sm:$0xff] }
 0x44b   : > { %v6144_v26 = vpack.c.bf16 %v1084_v24, %v1083_v23  ;;  %v508_v35 = vld [vmem:[#allocation4 + $0x1b0] sm:$0xff]  ;;  %v1101_v23 = vld [vmem:[#allocation4 + $0x258] sm:$0xff] }
 0x44c   : > { %v859_v40 = vmul.f32 1.442695, %v854_v38  ;;  %v861_v41 = vmul.f32 1.442695, %v855_v39  ;;  %v6139_v37 = vpack.c.bf16 %v509_v36, %v508_v35  ;;  %v1088_v38 = vld [vmem:[#allocation4 + $0x1f0] sm:$0xff]  ;;  %v1089_v39 = vld [vmem:[#allocation4 + $0x1f8] sm:$0xff] }
 0x44d   : > { %v852_v42 = vpop.xlane.xlu1 %851  ;;  %v1117_v24 = vld [vmem:[#allocation4 + $0x2d8] sm:$0xff] }
 0x44e   : > { %6854 = vpow2.f32 %v859_v40  ;;  %v856_v43 = vsub.f32 %v839_v29, %v852_v42  ;;  %v1085_v29 = vld [vmem:[#allocation4 + $0x1d8] sm:$0xff]  ;;  %6140 = vmatprep.subr.bf16.mxu1 %v6139_v37  ;;  %v1106_v42 = vld [vmem:[#allocation4 + $0x280] sm:$0xff] }
 0x44f   : > { %6856 = vpow2.f32 %v861_v41  ;;  %v6147_v33 = vpack.c.bf16 %v1086_v30, %v1085_v29  ;;  %6142 = vmatpush3.bf16.msra.mxu1 %v6139_v37  ;;  %v1105_v40 = vld [vmem:[#allocation4 + $0x278] sm:$0xff]  ;;  %v6149_v41 = vpack.c.bf16 %v1089_v39, %v1088_v38  ;;  %v1103_v29 = vld [vmem:[#allocation4 + $0x268] sm:$0xff] }
 0x450   : > { %v863_v44 = vmul.f32 1.442695, %v856_v43  ;;  %v1090_v43 = vld [vmem:[#allocation4 + $0x200] sm:$0xff]  ;;  %v1119_v30 = vld [vmem:[#allocation4 + $0x2e8] sm:$0xff] }
 0x452   : > { %6858 = vpow2.f32 %v863_v44  ;;  %v1091_v44 = vld [vmem:[#allocation4 + $0x208] sm:$0xff] }
 0x454   : > { %v6853_v45 = vpop.eup %6852 }
 0x455   : > { %v865_v46 = vsel %vm840_vm5, %v6853_v45, 0.0 }
 0x456   : > { %866 = vadd.xlane.f32.xlu0 %v865_v46  ;;  %v6153_v46 = vpack.c.bf16 %v1091_v44, %v1090_v43 }
 0x458   : > { %v6855_v47 = vpop.eup %6854 }
 0x459   : > { %v6857_v48 = vpop.eup %6856  ;;  %v868_v49 = vsel %vm840_vm5, %v6855_v47, 0.0 }
 0x45a   : > { %869 = vadd.xlane.f32.xlu1 %v868_v49  ;;  %v871_v50 = vsel %vm840_vm5, %v6857_v48, 0.0  ;;  %v1094_v49 = vld [vmem:[#allocation4 + $0x220] sm:$0xff] }
 0x45b   : > { %872 = vadd.xlane.f32.xlu0 %v871_v50  ;;  %v1095_v50 = vld [vmem:[#allocation4 + $0x228] sm:$0xff] }
 0x45c   : > { %v7206_v51 = vpop.eup %6858 }
 0x45d   : > { %v874_v52 = vsel %vm840_vm5, %v7206_v51, 0.0 }
 0x45e   : > { %875 = vadd.xlane.f32.xlu1 %v874_v52  ;;  %v1096_v52 = vld [vmem:[#allocation4 + $0x230] sm:$0xff] }
 0x45f   : > { %v6165_v54 = vpack.c.bf16 %v1097_v53, %v1096_v52 }
 0x4e3   : > { %v867_v17 = vpop.xlane.xlu0 %866 }
 0x4e4   : > { %6860 = vrcp.f32 %v867_v17  ;;  %v6193_v17 = vpack.c.bf16 %v1112_v15, %v1111_v14  ;;  %v4405_v14 = vld [vmem:[#allocation4 + $0x1e8] ss:$0 sm:$0xff] }
 0x4e7   : > { %v870_v18 = vpop.xlane.xlu1 %869 }
 0x4e8   : > { %v873_v19 = vpop.xlane.xlu0 %872  ;;  %6862 = vrcp.f32 %v870_v18  ;;  %v1114_v18 = vld [vmem:[#allocation4 + $0x2c0] sm:$0xff] }
 0x4e9   : > { %6864 = vrcp.f32 %v873_v19  ;;  %v1115_v19 = vld [vmem:[#allocation4 + $0x2c8] sm:$0xff] }
 0x4eb   : > { %v876_v20 = vpop.xlane.xlu1 %875 }
 0x4ec   : > { %6866 = vrcp.f32 %v876_v20  ;;  %v1116_v20 = vld [vmem:[#allocation4 + $0x2d0] sm:$0xff] }
 0x4ee   : > { %v6861_v21 = vpop.eup %6860 }
 0x4ef   : > { %v881_v22 = vmul.f32 %v6861_v21, %v6853_v45  ;;  %v6181_v45 = vpack.c.bf16 %v1106_v42, %v1105_v40  ;;  %v6201_v21 = vpack.c.bf16 %v1116_v20, %v1115_v19 }
 0x4f1   : > { %5065 = vmatprep.mubr.msk.f32.mxu0 %vm840_vm5, %v881_v22  ;;  %6182 = vmatprep.subr.bf16.mxu1 %v6181_v45  ;;  %v1100_v22 = vld [vmem:[#allocation4 + $0x250] sm:$0xff] }
 0x4f2   : > { %v6863_v25 = vpop.eup %6862 }
 0x4f3   : > { %v6865_v27 = vpop.eup %6864  ;;  %v882_v28 = vmul.f32 %v6863_v25, %v6855_v47  ;;  %v1092_v47 = vld [vmem:[#allocation4 + $0x210] sm:$0xff]  ;;  %v6173_v25 = vpack.c.bf16 %v1101_v23, %v1100_v22  ;;  %v1122_v22 = vld [vmem:[#allocation4 + $0x300] sm:$0xff]  ;;  %v1123_v23 = vld [vmem:[#allocation4 + $0x308] sm:$0xff] }
 0x4f4   : > { %v883_v31 = vmul.f32 %v6865_v27, %v6857_v48  ;;  %v1093_v48 = vld [vmem:[#allocation4 + $0x218] sm:$0xff] }
 0x4f5   : > { %5066 = vmatmul.mubr.msk.f32.vlgmr.msra.gmra.mrb[12].mxu0 %vm840_vm5, %v882_v28  ;;  %v1102_v28 = vld [vmem:[#allocation4 + $0x260] sm:$0xff] }
 0x4f6   : > { %v6867_v32 = vpop.eup %6866  ;;  %5068 = vmatprep.mubr.msk.f32.mxu0 %vm840_vm5, %v883_v31  ;;  %6145 = vmatpush3.bf16.msra.mxu0 %v6144_v26  ;;  %v1118_v26 = vld [vmem:[#allocation4 + $0x2e0] sm:$0xff]  ;;  %v6177_v31 = vpack.c.bf16 %v1103_v29, %v1102_v28  ;;  %v1127_v29 = vld [vmem:[#allocation4 + $0x328] sm:$0xff] }
 0x4f7   : > { %v884_v34 = vmul.f32 %v6867_v32, %v7206_v51  ;;  %6146 = vmatprep.subr.bf16.mxu0 %v7006_v0  ;;  %v6161_v51 = vpack.c.bf16 %v1095_v50, %v1094_v49  ;;  %v6205_v27 = vpack.c.bf16 %v1118_v26, %v1117_v24  ;;  %v1120_v32 = vld [vmem:[#allocation4 + $0x2f0] sm:$0xff]  ;;  %v1125_v26 = vld [vmem:[#allocation4 + $0x318] sm:$0xff]  ;;  %v1126_v28 = vld [vmem:[#allocation4 + $0x320] sm:$0xff] }
 0x4f8   : > { %v4407_v50 = vld [vmem:[#allocation4 + $0x270] ss:$0 sm:$0xff] }
 0x4f9   : > { %5069 = vmatmul.mubr.msk.f32.gmra.mrb[14].mxu0 %vm840_vm5, %v884_v34  ;;  %v4404_v34 = vld [vmem:[#allocation4 + $0x1c0] ss:$0 sm:$0xff]  ;;  %v1124_v24 = vld [vmem:[#allocation4 + $0x310] sm:$0xff] }
 0x4fa   : > { %6148 = vmatpush3.bf16.msra.mxu0 %v6147_v33  ;;  %5117 = vmatprep.mubr.msk.f32.mxu0 %vm7008_vm0, %v7007_v1  ;;  %v6209_v33 = vpack.c.bf16 %v1120_v32, %v1119_v30  ;;  %v6232_v30 = vpack.c.bf16 %v1127_v29, %v1126_v28  ;;  %v1129_v32 = vld [vmem:[#allocation4 + $0x338] sm:$0xff]  ;;  %v1671_v29 = vld [vmem:[#allocation4 + $0x508] sm:$0xff] }
 0x4fb   : > { %6150 = vmatprep.subr.bf16.mxu0 %v6149_v41 }
 0x4fd   : > { %5118 = vmatmul.mubr.msk.f32.vlgmr.msra.gmra.mrb[16].mxu0 %vm389_vm4, %v7177_v61  ;;  %v6157_v61 = vpack.c.bf16 %v1093_v48, %v1092_v47 }
 0x4fe   : > { %6152 = vmatpush3.bf16.msra.mxu0 %v6149_v41 }
 0x4ff   : > { %6154 = vmatprep.subr.bf16.mxu0 %v6153_v46 }
 0x502   : > { %6156 = vmatpush3.bf16.msra.mxu0 %v6153_v46 }
 0x503   : > { %6158 = vmatprep.subr.bf16.mxu0 %v6157_v61 }
 0x506   : > { %6160 = vmatpush3.bf16.msra.mxu0 %v6157_v61 }
 0x507   : > { %6162 = vmatprep.subr.bf16.mxu0 %v6161_v51 }
 0x50a   : > { %6164 = vmatpush3.bf16.msra.mxu0 %v6161_v51  ;;  %v4408_v51 = vld [vmem:[#allocation4 + $0x2f8] ss:$0 sm:$0xff] }
 0x50b   : > { %6166 = vmatprep.subr.bf16.mxu0 %v6165_v54 }
 0x50e   : > { %6168 = vmatpush3.bf16.msra.mxu0 %v6165_v54 }
 0x50f   : > { %6170 = vmatprep.subr.bf16.mxu0 %v6169_v57 }
 0x512   : > { %6172 = vmatpush3.bf16.msra.mxu0 %v6169_v57 }
 0x513   : > { %6174 = vmatprep.subr.bf16.mxu0 %v6173_v25 }
 0x516   : > { %6176 = vmatpush3.bf16.msra.mxu0 %v6173_v25  ;;  %v6226_v25 = vpack.c.bf16 %v1123_v23, %v1122_v22  ;;  %v1667_v23 = vld [vmem:[#allocation4 + $0x4e8] sm:$0xff] }
 0x517   : > { %6178 = vmatprep.subr.bf16.mxu0 %v6177_v31 }
 0x51a   : > { %6180 = vmatpush3.bf16.msra.mxu0 %v6177_v31  ;;  %v1128_v31 = vld [vmem:[#allocation4 + $0x330] sm:$0xff] }
 0x51b   : > { %6213 = vmatprep.subr.bf16.mxu0 %v7006_v0 }
 0x5c8   : > { %v5067_v58 = vpop.f32.mrb[12].mxu0 }
 0x5c9   : > { %v963_v62 = vpop.f32.mrb[13].mxu0  ;;  %v7224_v2 = vadd.f32 %v5067_v58, %v7186_v6 }
 0x5ca   : > { %v7221_v63 = vadd.f32 %v963_v62, %v7188_v8  ;;  %v6189_v8 = vpack.c.bf16 %v1110_v7, %v1109_v5 }
 0x5cc   : > { %v5070_v4 = vpop.f32.mrb[14].mxu0  ;;  %5103 = vmatprep.mubr.f32.mxu1 %v7221_v63 }
 0x5cd   : > { %v973_v9 = vpop.f32.mrb[15].mxu0  ;;  %5104 = vmatmul.mubr.f32.vlgmr.msra.gmra.mrb[6].mxu1 %v7224_v2  ;;  %v7232_v13 = vadd.f32 %v5070_v4, %v7191_v10 }
 0x5ce   : > { %v7229_v11 = vadd.f32 %v973_v9, %v7193_v12  ;;  %6184 = vmatpush3.bf16.msra.mxu1 %v6181_v45  ;;  %v1113_v12 = vld [vmem:[#allocation4 + $0x2b8] sm:$0xff] }
 0x5cf   : > { %6186 = vmatprep.subr.bf16.mxu1 %v6185_v3  ;;  %v6197_v10 = vpack.c.bf16 %v1114_v18, %v1113_v12 }
 0x5d0   : > { %5106 = vmatprep.mubr.f32.mxu1 %v7229_v11  ;;  %v7235_v6 = vpop.f32.mrb[16].mxu0 }
 0x5d1   : > { %5107 = vmatmul.mubr.f32.gmra.mrb[8].mxu1 %v7232_v13  ;;  %v5119_v16 = vpop.f32.mrb[17].mxu0  ;;  %v7251_v15 = vadd.f32 %v4405_v14, %v7235_v6 }
 0x5d2   : > { %6188 = vmatpush3.bf16.msra.mxu1 %v6185_v3 }
 0x5d3   : > { %6190 = vmatprep.subr.bf16.mxu1 %v6189_v8 }
 0x5d6   : > { %6192 = vmatpush3.bf16.msra.mxu1 %v6189_v8 }
 0x5d7   : > { %6194 = vmatprep.subr.bf16.mxu1 %v6193_v17 }
 0x5da   : > { %6196 = vmatpush3.bf16.msra.mxu1 %v6193_v17 }
 0x5db   : > { %6198 = vmatprep.subr.bf16.mxu1 %v6197_v10 }
 0x5de   : > { %6200 = vmatpush3.bf16.msra.mxu1 %v6197_v10 }
 0x5df   : > { %6202 = vmatprep.subr.bf16.mxu1 %v6201_v21 }
 0x5e2   : > { %6204 = vmatpush3.bf16.msra.mxu1 %v6201_v21 }
 0x5e3   : > { %6206 = vmatprep.subr.bf16.mxu1 %v6205_v27 }
 0x5e6   : > { %6208 = vmatpush3.bf16.msra.mxu1 %v6205_v27  ;;  %v6229_v27 = vpack.c.bf16 %v1125_v26, %v1124_v24  ;;  %v1668_v24 = vld [vmem:[#allocation4 + $0x4f0] sm:$0xff]  ;;  %v1669_v26 = vld [vmem:[#allocation4 + $0x4f8] sm:$0xff] }
 0x5e7   : > { %6210 = vmatprep.subr.bf16.mxu1 %v6209_v33 }
 0x5ea   : > { %6212 = vmatpush3.bf16.msra.mxu1 %v6209_v33  ;;  %v6235_v33 = vpack.c.bf16 %v1129_v32, %v1128_v31  ;;  %v1644_v32 = vld [vmem:[#allocation4 + $0x430] sm:$0xff] }
 0x5eb   : > { %6225 = vmatprep.subr.bf16.mxu1 %v7006_v0 }
 0x6a0   : > { %v5105_v35 = vpop.f32.mrb[6].mxu1 }
 0x6a1   : > { %v1062_v36 = vadd.f32 %v5105_v35, %v4404_v34  ;;  %v1056_v37 = vpop.f32.mrb[7].mxu1  ;;  %v1131_v35 = vld [vmem:[#allocation4 + $0x348] sm:$0xff] }
 0x6a2   : > { %v1057_v38 = vadd.f32 %v4404_v34, %v1056_v37  ;;  %v1132_v37 = vld [vmem:[#allocation4 + $0x350] sm:$0xff] }
 0x6a3   : > { %v1076_v39 = vmax.f32 %v1062_v36, 0.0 }
 0x6a4   : > { %v1075_v40 = vmax.f32 %v1057_v38, 0.0  ;;  %v5108_v41 = vpop.f32.mrb[8].mxu1  ;;  %v1133_v38 = vld [vmem:[#allocation4 + $0x358] sm:$0xff] }
 0x6a5   : > { %v1072_v42 = vadd.f32 %v5108_v41, %v4404_v34  ;;  %v1066_v43 = vpop.f32.mrb[9].mxu1  ;;  %v1080_v46 = vadd.f32 %v1076_v39, %v7224_v2  ;;  %v6241_v39 = vpack.c.bf16 %v1133_v38, %v1132_v37  ;;  %v1135_v41 = vld [vmem:[#allocation4 + $0x368] sm:$0xff]  ;;  %v1646_v38 = vld [vmem:[#allocation4 + $0x440] sm:$0xff] }
 0x6a6   : > { %v1079_v44 = vadd.f32 %v1075_v40, %v7221_v63  ;;  %v1067_v45 = vadd.f32 %v4404_v34, %v1066_v43  ;;  %v1130_v34 = vld [vmem:[#allocation4 + $0x340] sm:$0xff] }
 0x6a7   : > { %v1078_v47 = vmax.f32 %v1072_v42, 0.0  ;;  %v6238_v36 = vpack.c.bf16 %v1131_v35, %v1130_v34  ;;  %v1134_v40 = vld [vmem:[#allocation4 + $0x360] sm:$0xff] }
 0x6a8   : > { %v1077_v48 = vmax.f32 %v1067_v45, 0.0  ;;  %5152 = vmatprep.mubr.f32.mxu0 %v1079_v44  ;;  %5190 = vmatprep.mubr.f32.mxu1 %v1079_v44  ;;  %v6244_v42 = vpack.c.bf16 %v1135_v41, %v1134_v40  ;;  %v1648_v41 = vld [vmem:[#allocation4 + $0x450] sm:$0xff] }
 0x6a9   : > { %5153 = vmatmul.mubr.f32.vlgmr.msra.gmra.mrb[18].mxu0 %v1080_v46  ;;  %5191 = vmatmul.mubr.f32.vlgmr.msra.gmra.mrb[10].mxu1 %v1080_v46  ;;  %v1082_v49 = vadd.f32 %v1078_v47, %v7232_v13  ;;  %v1136_v46 = vld [vmem:[#allocation4 + $0x370] sm:$0xff]  ;;  %v1137_v47 = vld [vmem:[#allocation4 + $0x378] sm:$0xff] }
 0x6aa   : > { %v1081_v61 = vadd.f32 %v1077_v48, %v7229_v11  ;;  %6227 = vmatpush3.bf16.msra.mxu1 %v6226_v25  ;;  %v6247_v48 = vpack.c.bf16 %v1137_v47, %v1136_v46  ;;  %v6315_v25 = vpack.c.bf16 %v1668_v24, %v1667_v23  ;;  %v1652_v46 = vld [vmem:[#allocation4 + $0x470] sm:$0xff]  ;;  %v1653_v47 = vld [vmem:[#allocation4 + $0x478] sm:$0xff] }
 0x6ab   : > { %6228 = vmatprep.subr.bf16.mxu1 %v7006_v0 }
 0x6ac   : > { %5155 = vmatprep.mubr.f32.mxu0 %v1081_v61  ;;  %5193 = vmatprep.mubr.f32.mxu1 %v1081_v61  ;;  %v1627_v61 = vld [vmem:[#allocation4 + $0x3a8] sm:$0xff] }
 0x6ad   : > { %5156 = vmatmul.mubr.f32.gmra.mrb[20].mxu0 %v1082_v49  ;;  %5194 = vmatmul.mubr.f32.gmra.mrb[12].mxu1 %v1082_v49  ;;  %v1628_v49 = vld [vmem:[#allocation4 + $0x3b0] sm:$0xff] }
 0x6ae   : > { %5204 = vmatprep.mubr.msk.f32.mxu0 %vm7008_vm0, %v7007_v1  ;;  %5250 = vmatprep.mubr.msk.f32.mxu1 %vm7008_vm0, %v7007_v1 }
 0x6af   : > { %6230 = vmatpush3.bf16.msra.mxu1 %v6229_v27  ;;  %v1670_v27 = vld [vmem:[#allocation4 + $0x500] sm:$0xff] }
 0x6b0   : > { %6231 = vmatprep.subr.bf16.mxu1 %v7006_v0  ;;  %v6318_v28 = vpack.c.bf16 %v1670_v27, %v1669_v26 }
 0x6b3   : > { %6233 = vmatpush3.bf16.msra.mxu1 %v6232_v30  ;;  %v1672_v30 = vld [vmem:[#allocation4 + $0x510] sm:$0xff] }
 0x6b4   : > { %6234 = vmatprep.subr.bf16.mxu1 %v7006_v0  ;;  %v6321_v31 = vpack.c.bf16 %v1672_v30, %v1671_v29 }
 0x6b7   : > { %6236 = vmatpush3.bf16.msra.mxu1 %v6235_v33  ;;  %v1645_v33 = vld [vmem:[#allocation4 + $0x438] sm:$0xff] }
 0x6b8   : > { %6237 = vmatprep.subr.bf16.mxu1 %v7006_v0  ;;  %v6282_v35 = vpack.c.bf16 %v1645_v33, %v1644_v32 }
 0x6bb   : > { %6239 = vmatpush3.bf16.msra.mxu1 %v6238_v36 }
 0x6bc   : > { %6240 = vmatprep.subr.bf16.mxu1 %v7006_v0 }
 0x6bf   : > { %6242 = vmatpush3.bf16.msra.mxu1 %v6241_v39  ;;  %v1647_v39 = vld [vmem:[#allocation4 + $0x448] sm:$0xff] }
 0x6c0   : > { %6243 = vmatprep.subr.bf16.mxu1 %v7006_v0  ;;  %v6285_v40 = vpack.c.bf16 %v1647_v39, %v1646_v38 }
 0x6c3   : > { %6245 = vmatpush3.bf16.msra.mxu1 %v6244_v42  ;;  %v1649_v42 = vld [vmem:[#allocation4 + $0x458] sm:$0xff] }
 0x6c4   : > { %6246 = vmatprep.subr.bf16.mxu1 %v7006_v0 }
 0x6c7   : > { %6248 = vmatpush3.bf16.msra.mxu1 %v6247_v48  ;;  %v6294_v48 = vpack.c.bf16 %v1653_v47, %v1652_v46 }
 0x6c8   : > { %6281 = vmatprep.subr.bf16.mxu1 %v7006_v0 }
 0x77c   : > { %v5154_v52 = vpop.f32.mrb[18].mxu0  ;;  %v5192_v53 = vpop.f32.mrb[10].mxu1 }
 0x77d   : > { %v1289_v54 = vadd.f32 %v5154_v52, %v4407_v50  ;;  %v1378_v55 = vadd.f32 %v5192_v53, %v4408_v51  ;;  %v1283_v56 = vpop.f32.mrb[19].mxu0  ;;  %v1372_v57 = vpop.f32.mrb[11].mxu1  ;;  %v1630_v52 = vld [vmem:[#allocation4 + $0x3c0] sm:$0xff] }
 0x77e   : > { %v1284_v58 = vadd.f32 %v4407_v50, %v1283_v56  ;;  %v1373_v59 = vadd.f32 %v4408_v51, %v1372_v57  ;;  %v1623_v57 = vld [vmem:[#allocation4 + $0x388] sm:$0xff] }
 0x780   : > { %v6214_v60 = vpack.c.bf16 %v1289_v54, %v1284_v58  ;;  %v6220_v62 = vpack.c.bf16 %v1378_v55, %v1373_v59  ;;  %v5157_v63 = vpop.f32.mrb[20].mxu0  ;;  %v5195_v2 = vpop.f32.mrb[12].mxu1  ;;  %v1631_v54 = vld [vmem:[#allocation4 + $0x3c8] sm:$0xff]  ;;  %v1632_v55 = vld [vmem:[#allocation4 + $0x3d0] sm:$0xff]  ;;  %v1633_v58 = vld [vmem:[#allocation4 + $0x3d8] sm:$0xff] }
 0x781   : > { %v1299_v3 = vadd.f32 %v5157_v63, %v4407_v50  ;;  %v1388_v4 = vadd.f32 %v5195_v2, %v4408_v51  ;;  %v1293_v5 = vpop.f32.mrb[21].mxu0  ;;  %v1382_v7 = vpop.f32.mrb[13].mxu1  ;;  %v6257_v56 = vpack.c.bf16 %v1632_v55, %v1631_v54  ;;  %v1634_v59 = vld [vmem:[#allocation4 + $0x3e0] sm:$0xff]  ;;  %v1636_v63 = vld [vmem:[#allocation4 + $0x3f0] sm:$0xff] }
 0x782   : > { %v1294_v9 = vadd.f32 %v4407_v50, %v1293_v5  ;;  %v1383_v11 = vadd.f32 %v4408_v51, %v1382_v7  ;;  %6215 = vmatpush3.bf16.xpose.msra.mxu0 %v6214_v60  ;;  %v1629_v50 = vld [vmem:[#allocation4 + $0x3b8] sm:$0xff]  ;;  %v6249_v51 = vpack.c.bf16 %v1628_v49, %v1627_v61  ;;  %v6261_v60 = vpack.c.bf16 %v1634_v59, %v1633_v58  ;;  %v1639_v7 = vld [vmem:[#allocation4 + $0x408] sm:$0xff]  ;;  %v1654_v61 = vld [vmem:[#allocation4 + $0x480] sm:$0xff] }
 0x783   : > { %6216 = vmatprep.subr.bf16.mxu0 %v7006_v0  ;;  %v6253_v53 = vpack.c.bf16 %v1630_v52, %v1629_v50  ;;  %v1655_v49 = vld [vmem:[#allocation4 + $0x488] sm:$0xff]  ;;  %v1657_v52 = vld [vmem:[#allocation4 + $0x498] sm:$0xff]  ;;  %v1674_v55 = vld [vmem:[#allocation4 + $0x520] sm:$0xff] }
 0x784   : > { %v6217_v13 = vpack.c.bf16 %v1299_v3, %v1294_v9  ;;  %v6223_v8 = vpack.c.bf16 %v1388_v4, %v1383_v11  ;;  %v1637_v3 = vld [vmem:[#allocation4 + $0x3f8] sm:$0xff]  ;;  %v1638_v4 = vld [vmem:[#allocation4 + $0x400] sm:$0xff]  ;;  %v1640_v9 = vld [vmem:[#allocation4 + $0x410] sm:$0xff]  ;;  %v6297_v50 = vpack.c.bf16 %v1655_v49, %v1654_v61 }
 0x785   : > { %v6269_v5 = vpack.c.bf16 %v1638_v4, %v1637_v3  ;;  %v6273_v11 = vpack.c.bf16 %v1640_v9, %v1639_v7  ;;  %v1658_v58 = vld [vmem:[#allocation4 + $0x4a0] sm:$0xff]  ;;  %v1659_v59 = vld [vmem:[#allocation4 + $0x4a8] sm:$0xff] }
 0x786   : > { %v4410_v7 = vld [vmem:[#allocation4 + $0x380] ss:$0 sm:$0xff] }
 0x78a   : > { %6218 = vmatpush3.bf16.xpose.msra.mxu0 %v6217_v13  ;;  %v1641_v13 = vld [vmem:[#allocation4 + $0x418] sm:$0xff] }
 0x78b   : > { %6219 = vmatprep.subr.bf16.mxu0 %v7006_v0 }
 0x791   : > { %5205 = vmatmul.mubr.f32.vlgmr.msra.gmra.mrb[22].mxu0 %v7251_v15 }
 0x792   : > { %6221 = vmatpush3.bf16.msra.mxu0 %v6220_v62  ;;  %5215 = vmatprep.mubr.msk.f32.mxu0 %vm7008_vm0, %v7007_v1  ;;  %v1635_v62 = vld [vmem:[#allocation4 + $0x3e8] sm:$0xff] }
 0x793   : > { %6222 = vmatprep.subr.bf16.mxu0 %v7006_v0  ;;  %v6265_v2 = vpack.c.bf16 %v1636_v63, %v1635_v62  ;;  %v6303_v62 = vpack.c.bf16 %v1659_v59, %v1658_v58  ;;  %v1675_v63 = vld [vmem:[#allocation4 + $0x528] sm:$0xff]  ;;  %v1678_v58 = vld [vmem:[#allocation4 + $0x540] sm:$0xff] }
 0x794   : > { %v1679_v59 = vld [vmem:[#allocation4 + $0x548] sm:$0xff] }
 0x796   : > { %6224 = vmatpush3.bf16.msra.mxu0 %v6223_v8  ;;  %v1642_v8 = vld [vmem:[#allocation4 + $0x420] sm:$0xff] }
 0x797   : > { %6250 = vmatprep.subr.bf16.mxu0 %v6249_v51  ;;  %v6277_v14 = vpack.c.bf16 %v1642_v8, %v1641_v13  ;;  %v4411_v8 = vld [vmem:[#allocation4 + $0x428] ss:$0 sm:$0xff] }
 0x864   : > { %v1457_v16 = vpop.f32.mrb[22].mxu0 }
 0x865   : > { %v1461_v17 = vmul.f32 0.088388346, %v1457_v16  ;;  %v5206_v12 = vpop.f32.mrb[23].mxu0  ;;  %v1661_v16 = vld [vmem:[#allocation4 + $0x4b8] sm:$0xff] }
 0x866   : > { %v1624_v12 = vld [vmem:[#allocation4 + $0x390] sm:$0xff] }
 0x867   : > { %v1462_v18 = vsel %vm389_vm4, %v1461_v17, -inf }
 0x868   : > { %1463 = vmax.xlane.f32.xlu0 %v1462_v18 }
 0x8f5   : > { %v1464_v10 = vpop.xlane.xlu0 %1463 }
 0x8f6   : > { %v1465_v19 = vsub.f32 %v1461_v17, %v1464_v10  ;;  %v1662_v17 = vld [vmem:[#allocation4 + $0x4c0] sm:$0xff]  ;;  %v1663_v10 = vld [vmem:[#allocation4 + $0x4c8] sm:$0xff] }
 0x8f7   : > { %v6306_v18 = vpack.c.bf16 %v1662_v17, %v1661_v16 }
 0x8f8   : > { %v1466_v20 = vmul.f32 1.442695, %v1465_v19  ;;  %v1664_v19 = vld [vmem:[#allocation4 + $0x4d0] sm:$0xff] }
 0x8fa   : > { %6868 = vpow2.f32 %v1466_v20  ;;  %v6309_v20 = vpack.c.bf16 %v1664_v19, %v1663_v10  ;;  %v4412_v10 = vld [vmem:[#allocation4 + $0x4b0] ss:$0 sm:$0xff]  ;;  %v4413_v19 = vld [vmem:[#allocation4 + $0x538] ss:$0 sm:$0xff] }
 0x904   : > { %v6869_v6 = vpop.eup %6868 }
 0x905   : > { %v1468_v21 = vsel %vm389_vm4, %v6869_v6, 0.0 }
 0x906   : > { %1469 = vadd.xlane.f32.xlu1 %v1468_v21  ;;  %v1666_v21 = vld [vmem:[#allocation4 + $0x4e0] sm:$0xff] }
 0x993   : > { %v1470_v43 = vpop.xlane.xlu1 %1469 }
 0x994   : > { %6870 = vrcp.f32 %v1470_v43  ;;  %v6288_v43 = vpack.c.bf16 %v1649_v42, %v1648_v41 }
 0x99e   : > { %v6871_v44 = vpop.eup %6870 }
 0x99f   : > { %v1472_v45 = vmul.f32 %v6871_v44, %v6869_v6  ;;  %v1665_v6 = vld [vmem:[#allocation4 + $0x4d8] sm:$0xff]  ;;  %v1651_v44 = vld [vmem:[#allocation4 + $0x468] sm:$0xff] }
 0x9a0   : > { %v6312_v22 = vpack.c.bf16 %v1666_v21, %v1665_v6 }
 0x9a1   : > { %5216 = vmatmul.mubr.msk.f32.vlgmr.msra.gmra.mrb[24].mxu0 %vm389_vm4, %v1472_v45 }
 0x9a2   : > { %6252 = vmatpush3.bf16.msra.mxu0 %v6249_v51  ;;  %5285 = vmatprep.mubr.f32.mxu0 %v1623_v57  ;;  %v1656_v51 = vld [vmem:[#allocation4 + $0x490] sm:$0xff]  ;;  %v1625_v57 = vld [vmem:[#allocation4 + $0x398] sm:$0xff] }
 0x9a3   : > { %6254 = vmatprep.subr.bf16.mxu0 %v6253_v53  ;;  %v6300_v54 = vpack.c.bf16 %v1657_v52, %v1656_v51 }
 0x9a6   : > { %6256 = vmatpush3.bf16.msra.mxu0 %v6253_v53  ;;  %v1673_v53 = vld [vmem:[#allocation4 + $0x518] sm:$0xff] }
 0x9a7   : > { %6258 = vmatprep.subr.bf16.mxu0 %v6257_v56 }
 0x9aa   : > { %6260 = vmatpush3.bf16.msra.mxu0 %v6257_v56  ;;  %v6324_v56 = vpack.c.bf16 %v1674_v55, %v1673_v53 }
 0x9ab   : > { %6262 = vmatprep.subr.bf16.mxu0 %v6261_v60 }
 0x9ae   : > { %6264 = vmatpush3.bf16.msra.mxu0 %v6261_v60  ;;  %v1626_v60 = vld [vmem:[#allocation4 + $0x3a0] sm:$0xff] }
 0x9af   : > { %6266 = vmatprep.subr.bf16.mxu0 %v6265_v2 }
 0x9b2   : > { %6268 = vmatpush3.bf16.msra.mxu0 %v6265_v2  ;;  %v1676_v2 = vld [vmem:[#allocation4 + $0x530] sm:$0xff] }
 0x9b3   : > { %6270 = vmatprep.subr.bf16.mxu0 %v6269_v5  ;;  %v6327_v3 = vpack.c.bf16 %v1676_v2, %v1675_v63  ;;  %v1681_v63 = vld [vmem:[#allocation4 + $0x558] sm:$0xff] }
 0x9b6   : > { %6272 = vmatpush3.bf16.msra.mxu0 %v6269_v5 }
 0x9b7   : > { %6274 = vmatprep.subr.bf16.mxu0 %v6273_v11 }
 0x9ba   : > { %6276 = vmatpush3.bf16.msra.mxu0 %v6273_v11 }
 0x9bb   : > { %6278 = vmatprep.subr.bf16.mxu0 %v6277_v14 }
 0x9be   : > { %6280 = vmatpush3.bf16.msra.mxu0 %v6277_v14 }
 0x9bf   : > { %6305 = vmatprep.subr.bf16.mxu0 %v7006_v0 }
 0x9c1   : > { %5286 = vmatmul.mubr.f32.vlgmr.msra.gmra.mrb[26].mxu0 %v1624_v12 }
 0x9c2   : > { %6307 = vmatpush3.bf16.msra.mxu0 %v6306_v18  ;;  %5288 = vmatprep.mubr.f32.mxu0 %v1625_v57 }
 0x9c3   : > { %6308 = vmatprep.subr.bf16.mxu0 %v7006_v0 }
 0x9c5   : > { %5289 = vmatmul.mubr.f32.gmra.mrb[28].mxu0 %v1626_v60  ;;  %v1680_v60 = vld [vmem:[#allocation4 + $0x550] sm:$0xff] }
 0x9c6   : > { %6310 = vmatpush3.bf16.msra.mxu0 %v6309_v20  ;;  %5358 = vmatprep.mubr.msk.f32.mxu0 %vm7008_vm0, %v7007_v1  ;;  %v6333_v2 = vpack.c.bf16 %v1681_v63, %v1680_v60  ;;  %v2281_v63 = vld [vmem:[#allocation4 + $0x658] sm:$0xff] }
 0x9c7   : > { %6311 = vmatprep.subr.bf16.mxu0 %v7006_v0 }
 0x9ca   : > { %6313 = vmatpush3.bf16.msra.mxu0 %v6312_v22 }
 0x9cb   : > { %6314 = vmatprep.subr.bf16.mxu0 %v7006_v0 }
 0x9ce   : > { %6316 = vmatpush3.bf16.msra.mxu0 %v6315_v25 }
 0x9cf   : > { %6317 = vmatprep.subr.bf16.mxu0 %v7006_v0 }
 0x9d2   : > { %6319 = vmatpush3.bf16.msra.mxu0 %v6318_v28 }
 0x9d3   : > { %6320 = vmatprep.subr.bf16.mxu0 %v7006_v0 }
 0x9d6   : > { %6322 = vmatpush3.bf16.msra.mxu0 %v6321_v31 }
 0x9d7   : > { %6323 = vmatprep.subr.bf16.mxu0 %v7006_v0 }
 0x9da   : > { %6325 = vmatpush3.bf16.msra.mxu0 %v6324_v56 }
 0x9db   : > { %6326 = vmatprep.subr.bf16.mxu0 %v7006_v0 }
 0x9de   : > { %6328 = vmatpush3.bf16.msra.mxu0 %v6327_v3  ;;  %v1682_v3 = vld [vmem:[#allocation4 + $0x560] sm:$0xff] }
 0xa74   : > { %v1542_v34 = vpop.f32.mrb[24].mxu0 }
 0xa75   : > { %v7276_v36 = vadd.f32 %v1542_v34, %v7251_v15  ;;  %v5217_v37 = vpop.f32.mrb[25].mxu0  ;;  %v1650_v15 = vld [vmem:[#allocation4 + $0x460] sm:$0xff] }
 0xa76   : > { %v6291_v45 = vpack.c.bf16 %v1651_v44, %v1650_v15 }
 0xa77   : > { %5251 = vmatmul.mubr.f32.vlgmr.msra.gmra.mrb[14].mxu1 %v7276_v36 }
 0xa78   : > { %6283 = vmatpush3.bf16.msra.mxu1 %v6282_v35  ;;  %5323 = vmatprep.mubr.msk.f32.mxu1 %vm7008_vm0, %v7007_v1 }
 0xa79   : > { %6284 = vmatprep.subr.bf16.mxu1 %v7006_v0 }
 0xa7c   : > { %6286 = vmatpush3.bf16.msra.mxu1 %v6285_v40 }
 0xa7d   : > { %6287 = vmatprep.subr.bf16.mxu1 %v7006_v0 }
 0xa80   : > { %6289 = vmatpush3.bf16.msra.mxu1 %v6288_v43 }
 0xa81   : > { %6290 = vmatprep.subr.bf16.mxu1 %v7006_v0 }
 0xa84   : > { %6292 = vmatpush3.bf16.msra.mxu1 %v6291_v45 }
 0xa85   : > { %6293 = vmatprep.subr.bf16.mxu1 %v7006_v0 }
 0xa88   : > { %6295 = vmatpush3.bf16.msra.mxu1 %v6294_v48 }
 0xa89   : > { %6296 = vmatprep.subr.bf16.mxu1 %v7006_v0 }
 0xa8c   : > { %6298 = vmatpush3.bf16.msra.mxu1 %v6297_v50 }
 0xa8d   : > { %6299 = vmatprep.subr.bf16.mxu1 %v7006_v0 }
 0xa90   : > { %6301 = vmatpush3.bf16.msra.mxu1 %v6300_v54 }
 0xa91   : > { %6302 = vmatprep.subr.bf16.mxu1 %v7006_v0 }
 0xa94   : > { %6304 = vmatpush3.bf16.msra.mxu1 %v6303_v62  ;;  %v5287_v4 = vpop.f32.mrb[26].mxu0  ;;  %v6329_v62 = vpack.c.bf16 %v1679_v59, %v1678_v58  ;;  %v1692_v58 = vld [vmem:[#allocation4 + $0x5b0] sm:$0xff]  ;;  %v1693_v59 = vld [vmem:[#allocation4 + $0x5b8] sm:$0xff] }
 0xa95   : > { %v1765_v5 = vpop.f32.mrb[27].mxu0  ;;  %v7301_v26 = vadd.f32 %v5287_v4, %v4411_v8  ;;  %v1683_v4 = vld [vmem:[#allocation4 + $0x568] sm:$0xff]  ;;  %v6357_v60 = vpack.c.bf16 %v1693_v59, %v1692_v58 }
 0xa96   : > { %v7291_v16 = vadd.f32 %v4411_v8, %v1765_v5  ;;  %v6337_v5 = vpack.c.bf16 %v1683_v4, %v1682_v3  ;;  %v2298_v4 = vld [vmem:[#allocation4 + $0x6e0] sm:$0xff] }
 0xa98   : > { %v5290_v12 = vpop.f32.mrb[28].mxu0 }
 0xa99   : > { %v1775_v18 = vpop.f32.mrb[29].mxu0  ;;  %v7304_v27 = vadd.f32 %v5290_v12, %v4411_v8  ;;  %v1688_v12 = vld [vmem:[#allocation4 + $0x590] sm:$0xff] }
 0xa9a   : > { %v7299_v25 = vadd.f32 %v4411_v8, %v1775_v18  ;;  %v1687_v8 = vld [vmem:[#allocation4 + $0x588] sm:$0xff]  ;;  %v1689_v18 = vld [vmem:[#allocation4 + $0x598] sm:$0xff] }
 0xb4a   : > { %v1617_v9 = vpop.f32.mrb[14].mxu1 }
 0xb4b   : > { %v1618_v11 = vadd.f32 %v4410_v7, %v1617_v9  ;;  %v5252_v13 = vpop.f32.mrb[15].mxu1  ;;  %v1684_v7 = vld [vmem:[#allocation4 + $0x570] sm:$0xff]  ;;  %v1685_v9 = vld [vmem:[#allocation4 + $0x578] sm:$0xff] }
 0xb4c   : > { %v1686_v13 = vld [vmem:[#allocation4 + $0x580] sm:$0xff] }
 0xb4d   : > { %v1621_v14 = vmax.f32 %v1618_v11, 0.0  ;;  %v6341_v11 = vpack.c.bf16 %v1685_v9, %v1684_v7  ;;  %v2299_v7 = vld [vmem:[#allocation4 + $0x6e8] sm:$0xff]  ;;  %v2300_v9 = vld [vmem:[#allocation4 + $0x6f0] sm:$0xff] }
 0xb4f   : > { %v7294_v17 = vadd.f32 %v1621_v14, %v7276_v36  ;;  %v6345_v14 = vpack.c.bf16 %v1687_v8, %v1686_v13  ;;  %v2301_v13 = vld [vmem:[#allocation4 + $0x6f8] sm:$0xff]  ;;  %v2302_v8 = vld [vmem:[#allocation4 + $0x700] sm:$0xff] }
 0xb51   : > { %5324 = vmatmul.mubr.f32.vlgmr.msra.gmra.mrb[16].mxu1 %v7294_v17  ;;  %5359 = vmatmul.mubr.f32.vlgmr.msra.gmra.mrb[30].mxu0 %v7294_v17 }
 0xb52   : > { %5363 = vmatprep.mubr.f32.mxu1 %v7291_v16 }
 0xc24   : > { %v1854_v20 = vpop.f32.mrb[16].mxu1  ;;  %v1928_v6 = vpop.f32.mrb[30].mxu0 }
 0xc25   : > { %v1855_v21 = vadd.f32 %v4412_v10, %v1854_v20  ;;  %v1929_v22 = vadd.f32 %v4413_v19, %v1928_v6  ;;  %v5325_v23 = vpop.f32.mrb[17].mxu1  ;;  %v5360_v24 = vpop.f32.mrb[31].mxu0  ;;  %v6349_v10 = vpack.c.bf16 %v1689_v18, %v1688_v12  ;;  %v1690_v19 = vld [vmem:[#allocation4 + $0x5a0] sm:$0xff]  ;;  %v1691_v20 = vld [vmem:[#allocation4 + $0x5a8] sm:$0xff]  ;;  %v2304_v12 = vld [vmem:[#allocation4 + $0x710] sm:$0xff] }
 0xc26   : > { %v6353_v6 = vpack.c.bf16 %v1691_v20, %v1690_v19  ;;  %v2306_v19 = vld [vmem:[#allocation4 + $0x720] sm:$0xff] }
 0xc27   : > { %5361 = vmatprep.subr.mxu1 %v1855_v21  ;;  %5369 = vmatprep.subr.mxu0 %v1929_v22 }
 0xc28   : > { %5362 = vmatpush3.xpose.msra.mxu1 %v1855_v21  ;;  %5370 = vmatpush3.msra.mxu0 %v1929_v22 }
 0xc29   : > { %6361 = vmatprep.subr.bf16.mxu0 %v7006_v0  ;;  %6330 = vmatprep.subr.bf16.mxu1 %v6329_v62 }
 0xc2b   : > { %5364 = vmatmul.mubr.f32.vlgmr.msra.gmra.mrb[18].mxu1 %v7301_v26 }
 0xc2c   : > { %5366 = vmatprep.mubr.f32.mxu1 %v7299_v25  ;;  %6332 = vmatpush3.bf16.msra.mxu1 %v6329_v62  ;;  %v2280_v62 = vld [vmem:[#allocation4 + $0x650] sm:$0xff] }
 0xc2d   : > { %6334 = vmatprep.subr.bf16.mxu1 %v6333_v2  ;;  %v6385_v3 = vpack.c.bf16 %v2281_v63, %v2280_v62 }
 0xc2f   : > { %5367 = vmatmul.mubr.f32.gmra.mrb[20].mxu1 %v7304_v27 }
 0xc30   : > { %6336 = vmatpush3.bf16.msra.mxu1 %v6333_v2  ;;  %v2297_v2 = vld [vmem:[#allocation4 + $0x6d8] sm:$0xff] }
 0xc31   : > { %6338 = vmatprep.subr.bf16.mxu1 %v6337_v5 }
 0xc34   : > { %6340 = vmatpush3.bf16.msra.mxu1 %v6337_v5  ;;  %v6417_v5 = vpack.c.bf16 %v2298_v4, %v2297_v2 }
 0xc35   : > { %6342 = vmatprep.subr.bf16.mxu1 %v6341_v11 }
 0xc38   : > { %6344 = vmatpush3.bf16.msra.mxu1 %v6341_v11  ;;  %v6421_v11 = vpack.c.bf16 %v2300_v9, %v2299_v7 }
 0xc39   : > { %6346 = vmatprep.subr.bf16.mxu1 %v6345_v14 }
 0xc3c   : > { %6348 = vmatpush3.bf16.msra.mxu1 %v6345_v14  ;;  %v2303_v14 = vld [vmem:[#allocation4 + $0x708] sm:$0xff] }
 0xc3d   : > { %6350 = vmatprep.subr.bf16.mxu1 %v6349_v10  ;;  %v6429_v18 = vpack.c.bf16 %v2304_v12, %v2303_v14  ;;  %v4420_v12 = vld [vmem:[#allocation4 + $0x6d0] ss:$0 sm:$0xff] }
 0xc40   : > { %6352 = vmatpush3.bf16.msra.mxu1 %v6349_v10  ;;  %v2305_v10 = vld [vmem:[#allocation4 + $0x718] sm:$0xff] }
 0xc41   : > { %6354 = vmatprep.subr.bf16.mxu1 %v6353_v6  ;;  %v6433_v20 = vpack.c.bf16 %v2306_v19, %v2305_v10 }
 0xc44   : > { %6356 = vmatpush3.bf16.msra.mxu1 %v6353_v6  ;;  %v2307_v6 = vld [vmem:[#allocation4 + $0x728] sm:$0xff] }
 0xc45   : > { %6358 = vmatprep.subr.bf16.mxu1 %v6357_v60 }
 0xc48   : > { %6360 = vmatpush3.bf16.msra.mxu1 %v6357_v60 }
 0xc49   : > { %6386 = vmatprep.subr.bf16.mxu1 %v6385_v3 }
 0xcfe   : > { %v5365_v28 = vpop.f32.mrb[18].mxu1 }
 0xcff   : > { %v2018_v29 = vmul.f32 0.088388346, %v5365_v28  ;;  %v1998_v30 = vpop.f32.mrb[19].mxu1  ;;  %v2263_v28 = vld [vmem:[#allocation4 + $0x5c8] sm:$0xff] }
 0xd00   : > { %v2017_v31 = vmul.f32 0.088388346, %v1998_v30 }
 0xd01   : > { %v2024_v32 = vsel %vm840_vm5, %v2018_v29, -inf }
 0xd02   : > { %2025 = vmax.xlane.f32.xlu1 %v2024_v32  ;;  %v5368_v33 = vpop.f32.mrb[20].mxu1  ;;  %v2021_v34 = vsel %vm840_vm5, %v2017_v31, -inf }
 0xd03   : > { %v2020_v35 = vmul.f32 0.088388346, %v5368_v33  ;;  %2022 = vmax.xlane.f32.xlu0 %v2021_v34  ;;  %v2008_v36 = vpop.f32.mrb[21].mxu1 }
 0xd04   : > { %v2019_v37 = vmul.f32 0.088388346, %v2008_v36  ;;  %v2266_v36 = vld [vmem:[#allocation4 + $0x5e0] sm:$0xff] }
 0xd05   : > { %v2030_v38 = vsel %vm840_vm5, %v2020_v35, -inf }
 0xd06   : > { %2031 = vmax.xlane.f32.xlu1 %v2030_v38  ;;  %v2027_v39 = vsel %vm840_vm5, %v2019_v37, -inf }
 0xd07   : > { %2028 = vmax.xlane.f32.xlu0 %v2027_v39 }
 0xd8f   : > { %v2026_v40 = vpop.xlane.xlu1 %2025 }
 0xd90   : > { %v2034_v41 = vsub.f32 %v2018_v29, %v2026_v40  ;;  %v2023_v42 = vpop.xlane.xlu0 %2022  ;;  %v2264_v29 = vld [vmem:[#allocation4 + $0x5d0] sm:$0xff] }
 0xd91   : > { %v2033_v43 = vsub.f32 %v2017_v31, %v2023_v42  ;;  %v6362_v33 = vpack.c.bf16 %v2264_v29, %v2263_v28  ;;  %v2267_v42 = vld [vmem:[#allocation4 + $0x5e8] sm:$0xff] }
 0xd92   : > { %v2039_v15 = vmul.f32 1.442695, %v2034_v41  ;;  %v2283_v28 = vld [vmem:[#allocation4 + $0x668] sm:$0xff] }
 0xd93   : > { %v2037_v44 = vmul.f32 1.442695, %v2033_v43  ;;  %v2032_v45 = vpop.xlane.xlu1 %2031  ;;  %v2268_v43 = vld [vmem:[#allocation4 + $0x5f0] sm:$0xff] }
 0xd94   : > { %6872 = vpow2.f32 %v2039_v15  ;;  %v2036_v46 = vsub.f32 %v2020_v35, %v2032_v45  ;;  %v2029_v47 = vpop.xlane.xlu0 %2028  ;;  %v2265_v35 = vld [vmem:[#allocation4 + $0x5d8] sm:$0xff]  ;;  %v6368_v15 = vpack.c.bf16 %v2268_v43, %v2267_v42  ;;  %v2270_v45 = vld [vmem:[#allocation4 + $0x600] sm:$0xff] }
 0xd95   : > { %6874 = vpow2.f32 %v2037_v44  ;;  %v2035_v48 = vsub.f32 %v2019_v37, %v2029_v47  ;;  %v6365_v40 = vpack.c.bf16 %v2266_v36, %v2265_v35  ;;  %v2269_v44 = vld [vmem:[#allocation4 + $0x5f8] sm:$0xff]  ;;  %v2271_v47 = vld [vmem:[#allocation4 + $0x608] sm:$0xff]  ;;  %v2290_v43 = vld [vmem:[#allocation4 + $0x6a0] sm:$0xff] }
 0xd96   : > { %v2043_v61 = vmul.f32 1.442695, %v2036_v46  ;;  %v6371_v46 = vpack.c.bf16 %v2270_v45, %v2269_v44  ;;  %v2285_v35 = vld [vmem:[#allocation4 + $0x678] sm:$0xff] }
 0xd97   : > { %v2041_v49 = vmul.f32 1.442695, %v2035_v48  ;;  %v2272_v48 = vld [vmem:[#allocation4 + $0x610] sm:$0xff]  ;;  %v2289_v42 = vld [vmem:[#allocation4 + $0x698] sm:$0xff] }
 0xd98   : > { %6876 = vpow2.f32 %v2043_v61  ;;  %v6374_v61 = vpack.c.bf16 %v2272_v48, %v2271_v47  ;;  %v2293_v47 = vld [vmem:[#allocation4 + $0x6b8] sm:$0xff] }
 0xd99   : > { %6878 = vpow2.f32 %v2041_v49  ;;  %v2273_v49 = vld [vmem:[#allocation4 + $0x618] sm:$0xff] }
 0xd9a   : > { %v2309_v48 = vld [vmem:[#allocation4 + $0x738] sm:$0xff] }
 0xd9e   : > { %v6873_v50 = vpop.eup %6872 }
 0xd9f   : > { %v6875_v51 = vpop.eup %6874  ;;  %v2048_v52 = vsel %vm840_vm5, %v6873_v50, 0.0 }
 0xda0   : > { %2049 = vadd.xlane.f32.xlu1 %v2048_v52  ;;  %v2045_v53 = vsel %vm840_vm5, %v6875_v51, 0.0  ;;  %v2275_v52 = vld [vmem:[#allocation4 + $0x628] sm:$0xff] }
 0xda1   : > { %2046 = vadd.xlane.f32.xlu0 %v2045_v53  ;;  %v2276_v53 = vld [vmem:[#allocation4 + $0x630] sm:$0xff] }
 0xda2   : > { %v7315_v54 = vpop.eup %6876 }
 0xda3   : > { %v6879_v55 = vpop.eup %6878  ;;  %v2054_v56 = vsel %vm840_vm5, %v7315_v54, 0.0 }
 0xda4   : > { %2055 = vadd.xlane.f32.xlu1 %v2054_v56  ;;  %v2051_v57 = vsel %vm840_vm5, %v6879_v55, 0.0  ;;  %v2278_v56 = vld [vmem:[#allocation4 + $0x640] sm:$0xff] }
 0xda5   : > { %2052 = vadd.xlane.f32.xlu0 %v2051_v57 }
 0xe2d   : > { %v2050_v21 = vpop.xlane.xlu1 %2049 }
 0xe2e   : > { %6880 = vrcp.f32 %v2050_v21  ;;  %v2047_v22 = vpop.xlane.xlu0 %2046  ;;  %v2308_v21 = vld [vmem:[#allocation4 + $0x730] sm:$0xff] }
 0xe2f   : > { %6882 = vrcp.f32 %v2047_v22  ;;  %v6437_v22 = vpack.c.bf16 %v2308_v21, %v2307_v6 }
 0xe31   : > { %v2056_v23 = vpop.xlane.xlu1 %2055 }
 0xe32   : > { %6884 = vrcp.f32 %v2056_v23  ;;  %v2053_v24 = vpop.xlane.xlu0 %2052 }
 0xe33   : > { %6886 = vrcp.f32 %v2053_v24  ;;  %v2282_v24 = vld [vmem:[#allocation4 + $0x660] sm:$0xff] }
 0xe38   : > { %v6881_v30 = vpop.eup %6880 }
 0xe39   : > { %v6883_v31 = vpop.eup %6882  ;;  %v2062_v34 = vmul.f32 %v6881_v30, %v6873_v50  ;;  %v2274_v50 = vld [vmem:[#allocation4 + $0x620] sm:$0xff] }
 0xe3a   : > { %v2061_v32 = vmul.f32 %v6883_v31, %v6875_v51  ;;  %v6377_v51 = vpack.c.bf16 %v2274_v50, %v2273_v49  ;;  %v2310_v49 = vld [vmem:[#allocation4 + $0x740] sm:$0xff] }
 0xe3b   : > { %v6441_v50 = vpack.c.bf16 %v2310_v49, %v2309_v48  ;;  %v2315_v48 = vld [vmem:[#allocation4 + $0x768] sm:$0xff] }
 0xe3c   : > { %v6885_v37 = vpop.eup %6884  ;;  %5371 = vmatprep.mubr.msk.f32.mxu0 %vm840_vm5, %v2061_v32  ;;  %v6389_v32 = vpack.c.bf16 %v2283_v28, %v2282_v24 }
 0xe3d   : > { %v6887_v38 = vpop.eup %6886  ;;  %5372 = vmatmul.mubr.msk.f32.vlgmr.msra.gmra.mrb[32].mxu0 %vm840_vm5, %v2062_v34  ;;  %v2064_v41 = vmul.f32 %v6885_v37, %v7315_v54  ;;  %v6380_v54 = vpack.c.bf16 %v2276_v53, %v2275_v52  ;;  %v2284_v34 = vld [vmem:[#allocation4 + $0x670] sm:$0xff]  ;;  %v2295_v52 = vld [vmem:[#allocation4 + $0x6c8] sm:$0xff] }
 0xe3e   : > { %6363 = vmatpush3.bf16.msra.mxu0 %v6362_v33  ;;  %v2063_v39 = vmul.f32 %v6887_v38, %v6879_v55  ;;  %v2277_v55 = vld [vmem:[#allocation4 + $0x638] sm:$0xff]  ;;  %v2311_v53 = vld [vmem:[#allocation4 + $0x748] sm:$0xff] }
 0xe3f   : > { %6364 = vmatprep.subr.bf16.mxu0 %v7006_v0  ;;  %v6383_v57 = vpack.c.bf16 %v2278_v56, %v2277_v55  ;;  %v2312_v55 = vld [vmem:[#allocation4 + $0x750] sm:$0xff] }
 0xe40   : > { %5374 = vmatprep.mubr.msk.f32.mxu0 %vm840_vm5, %v2063_v39  ;;  %v2287_v39 = vld [vmem:[#allocation4 + $0x688] sm:$0xff]  ;;  %v6445_v56 = vpack.c.bf16 %v2312_v55, %v2311_v53 }
 0xe41   : > { %5375 = vmatmul.mubr.msk.f32.gmra.mrb[34].mxu0 %vm840_vm5, %v2064_v41  ;;  %v2288_v41 = vld [vmem:[#allocation4 + $0x690] sm:$0xff]  ;;  %v2319_v55 = vld [vmem:[#allocation4 + $0x788] sm:$0xff] }
 0xe42   : > { %6366 = vmatpush3.bf16.msra.mxu0 %v6365_v40  ;;  %5447 = vmatprep.mubr.msk.f32.mxu0 %vm7008_vm0, %v7007_v1 }
 0xe43   : > { %6367 = vmatprep.subr.bf16.mxu0 %v7006_v0 }
 0xe46   : > { %6369 = vmatpush3.bf16.msra.mxu0 %v6368_v15  ;;  %v2291_v15 = vld [vmem:[#allocation4 + $0x6a8] sm:$0xff] }
 0xe47   : > { %6370 = vmatprep.subr.bf16.mxu0 %v7006_v0 }
 0xe4a   : > { %6372 = vmatpush3.bf16.msra.mxu0 %v6371_v46  ;;  %v2292_v46 = vld [vmem:[#allocation4 + $0x6b0] sm:$0xff] }
 0xe4b   : > { %6373 = vmatprep.subr.bf16.mxu0 %v7006_v0 }
 0xe4e   : > { %6375 = vmatpush3.bf16.msra.mxu0 %v6374_v61  ;;  %v6409_v61 = vpack.c.bf16 %v2293_v47, %v2292_v46  ;;  %v2314_v47 = vld [vmem:[#allocation4 + $0x760] sm:$0xff] }
 0xe4f   : > { %6376 = vmatprep.subr.bf16.mxu0 %v7006_v0  ;;  %v6462_v49 = vpack.c.bf16 %v2315_v48, %v2314_v47  ;;  %v2857_v47 = vld [vmem:[#allocation4 + $0x938] sm:$0xff] }
 0xe52   : > { %6378 = vmatpush3.bf16.msra.mxu0 %v6377_v51  ;;  %v2294_v51 = vld [vmem:[#allocation4 + $0x6c0] sm:$0xff] }
 0xe53   : > { %6379 = vmatprep.subr.bf16.mxu0 %v7006_v0 }
 0xe56   : > { %6381 = vmatpush3.bf16.msra.mxu0 %v6380_v54  ;;  %v6413_v54 = vpack.c.bf16 %v2295_v52, %v2294_v51  ;;  %v2316_v51 = vld [vmem:[#allocation4 + $0x770] sm:$0xff]  ;;  %v2317_v52 = vld [vmem:[#allocation4 + $0x778] sm:$0xff] }
 0xe57   : > { %6382 = vmatprep.subr.bf16.mxu0 %v7006_v0  ;;  %v6465_v53 = vpack.c.bf16 %v2317_v52, %v2316_v51  ;;  %v2860_v51 = vld [vmem:[#allocation4 + $0x950] sm:$0xff]  ;;  %v2861_v52 = vld [vmem:[#allocation4 + $0x958] sm:$0xff] }
 0xe5a   : > { %6384 = vmatpush3.bf16.msra.mxu0 %v6383_v57  ;;  %v4418_v57 = vld [vmem:[#allocation4 + $0x5c0] ss:$0 sm:$0xff] }
 0xe5b   : > { %6418 = vmatprep.subr.bf16.mxu0 %v6417_v5 }
 0xe5d   : > { %5448 = vmatmul.mubr.f32.vlgmr.msra.gmra.mrb[36].mxu0 %v7294_v17  ;;  %v6425_v17 = vpack.c.bf16 %v2302_v8, %v2301_v13 }
 0xe5e   : > { %6420 = vmatpush3.bf16.msra.mxu0 %v6417_v5 }
 0xe5f   : > { %6422 = vmatprep.subr.bf16.mxu0 %v6421_v11 }
 0xe62   : > { %6424 = vmatpush3.bf16.msra.mxu0 %v6421_v11 }
 0xe63   : > { %6426 = vmatprep.subr.bf16.mxu0 %v6425_v17 }
 0xe66   : > { %6428 = vmatpush3.bf16.msra.mxu0 %v6425_v17 }
 0xe67   : > { %6430 = vmatprep.subr.bf16.mxu0 %v6429_v18 }
 0xe6a   : > { %6432 = vmatpush3.bf16.msra.mxu0 %v6429_v18  ;;  %v4421_v18 = vld [vmem:[#allocation4 + $0x758] ss:$0 sm:$0xff] }
 0xe6b   : > { %6434 = vmatprep.subr.bf16.mxu0 %v6433_v20 }
 0xe6e   : > { %6436 = vmatpush3.bf16.msra.mxu0 %v6433_v20 }
 0xe6f   : > { %6438 = vmatprep.subr.bf16.mxu0 %v6437_v22 }
 0xe72   : > { %6440 = vmatpush3.bf16.msra.mxu0 %v6437_v22 }
 0xe73   : > { %6442 = vmatprep.subr.bf16.mxu0 %v6441_v50 }
 0xe76   : > { %6444 = vmatpush3.bf16.msra.mxu0 %v6441_v50 }
 0xe77   : > { %6446 = vmatprep.subr.bf16.mxu0 %v6445_v56 }
 0xe7a   : > { %6448 = vmatpush3.bf16.msra.mxu0 %v6445_v56 }
 0xe7b   : > { %6455 = vmatprep.subr.bf16.mxu0 %v7006_v0 }
 0xf10   : > { %v5373_v23 = vpop.f32.mrb[32].mxu0 }
 0xf11   : > { %v2143_v29 = vpop.f32.mrb[33].mxu0  ;;  %v7339_v31 = vadd.f32 %v5373_v23, %v7301_v26  ;;  %v2286_v26 = vld [vmem:[#allocation4 + $0x680] sm:$0xff] }
 0xf12   : > { %v7336_v30 = vadd.f32 %v2143_v29, %v7291_v16  ;;  %v6393_v16 = vpack.c.bf16 %v2285_v35, %v2284_v34  ;;  %v6397_v40 = vpack.c.bf16 %v2287_v39, %v2286_v26  ;;  %v4419_v26 = vld [vmem:[#allocation4 + $0x648] ss:$0 sm:$0xff] }
 0xf14   : > { %v5376_v33 = vpop.f32.mrb[34].mxu0  ;;  %5409 = vmatprep.mubr.f32.mxu1 %v7336_v30 }
 0xf15   : > { %v2153_v36 = vpop.f32.mrb[35].mxu0  ;;  %5410 = vmatmul.mubr.f32.vlgmr.msra.gmra.mrb[22].mxu1 %v7339_v31  ;;  %v7347_v38 = vadd.f32 %v5376_v33, %v7304_v27  ;;  %v6405_v27 = vpack.c.bf16 %v2291_v15, %v2290_v43 }
 0xf16   : > { %v7344_v37 = vadd.f32 %v2153_v36, %v7299_v25  ;;  %6388 = vmatpush3.bf16.msra.mxu1 %v6385_v3  ;;  %v6401_v25 = vpack.c.bf16 %v2289_v42, %v2288_v41 }
 0xf17   : > { %6390 = vmatprep.subr.bf16.mxu1 %v6389_v32 }
 0xf18   : > { %5412 = vmatprep.mubr.f32.mxu1 %v7344_v37 }
 0xf19   : > { %5413 = vmatmul.mubr.f32.gmra.mrb[24].mxu1 %v7347_v38 }
 0xf1a   : > { %6392 = vmatpush3.bf16.msra.mxu1 %v6389_v32 }
 0xf1b   : > { %6394 = vmatprep.subr.bf16.mxu1 %v6393_v16 }
 0xf1e   : > { %6396 = vmatpush3.bf16.msra.mxu1 %v6393_v16 }
 0xf1f   : > { %6398 = vmatprep.subr.bf16.mxu1 %v6397_v40 }
 0xf22   : > { %6400 = vmatpush3.bf16.msra.mxu1 %v6397_v40 }
 0xf23   : > { %6402 = vmatprep.subr.bf16.mxu1 %v6401_v25 }
 0xf26   : > { %6404 = vmatpush3.bf16.msra.mxu1 %v6401_v25 }
 0xf27   : > { %6406 = vmatprep.subr.bf16.mxu1 %v6405_v27 }
 0xf2a   : > { %6408 = vmatpush3.bf16.msra.mxu1 %v6405_v27 }
 0xf2b   : > { %6410 = vmatprep.subr.bf16.mxu1 %v6409_v61 }
 0xf2e   : > { %6412 = vmatpush3.bf16.msra.mxu1 %v6409_v61 }
 0xf2f   : > { %6414 = vmatprep.subr.bf16.mxu1 %v6413_v54 }
 0xf30   : > { %v7351_v44 = vpop.f32.mrb[36].mxu0 }
 0xf31   : > { %v5449_v45 = vpop.f32.mrb[37].mxu0  ;;  %v7368_v39 = vadd.f32 %v4419_v26, %v7351_v44  ;;  %v2850_v26 = vld [vmem:[#allocation4 + $0x900] sm:$0xff] }
 0xf32   : > { %6416 = vmatpush3.bf16.msra.mxu1 %v6413_v54  ;;  %v2318_v54 = vld [vmem:[#allocation4 + $0x780] sm:$0xff] }
 0xf33   : > { %6449 = vmatprep.subr.bf16.mxu1 %v7006_v0  ;;  %v6468_v56 = vpack.c.bf16 %v2319_v55, %v2318_v54  ;;  %v2833_v54 = vld [vmem:[#allocation4 + $0x878] sm:$0xff]  ;;  %v2834_v55 = vld [vmem:[#allocation4 + $0x880] sm:$0xff] }
 0xfe8   : > { %v5411_v58 = vpop.f32.mrb[22].mxu1 }
 0xfe9   : > { %v2242_v59 = vadd.f32 %v5411_v58, %v4418_v57  ;;  %v2236_v60 = vpop.f32.mrb[23].mxu1  ;;  %v2321_v58 = vld [vmem:[#allocation4 + $0x798] sm:$0xff] }
 0xfea   : > { %v2237_v62 = vadd.f32 %v4418_v57, %v2236_v60  ;;  %v2322_v60 = vld [vmem:[#allocation4 + $0x7a0] sm:$0xff] }
 0xfeb   : > { %v2256_v63 = vmax.f32 %v2242_v59, 0.0 }
 0xfec   : > { %v2255_v2 = vmax.f32 %v2237_v62, 0.0  ;;  %v5414_v3 = vpop.f32.mrb[24].mxu1  ;;  %v2323_v62 = vld [vmem:[#allocation4 + $0x7a8] sm:$0xff] }
 0xfed   : > { %v2252_v4 = vadd.f32 %v5414_v3, %v4418_v57  ;;  %v2246_v5 = vpop.f32.mrb[25].mxu1  ;;  %v2260_v11 = vadd.f32 %v2256_v63, %v7339_v31  ;;  %v6474_v63 = vpack.c.bf16 %v2323_v62, %v2322_v60  ;;  %v2325_v3 = vld [vmem:[#allocation4 + $0x7b8] sm:$0xff]  ;;  %v2835_v60 = vld [vmem:[#allocation4 + $0x888] sm:$0xff]  ;;  %v2836_v62 = vld [vmem:[#allocation4 + $0x890] sm:$0xff] }
 0xfee   : > { %v2259_v7 = vadd.f32 %v2255_v2, %v7336_v30  ;;  %v2247_v9 = vadd.f32 %v4418_v57, %v2246_v5  ;;  %v2320_v57 = vld [vmem:[#allocation4 + $0x790] sm:$0xff]  ;;  %v2326_v5 = vld [vmem:[#allocation4 + $0x7c0] sm:$0xff] }
 0xfef   : > { %v2258_v13 = vmax.f32 %v2252_v4, 0.0  ;;  %v6471_v59 = vpack.c.bf16 %v2321_v58, %v2320_v57  ;;  %v2324_v2 = vld [vmem:[#allocation4 + $0x7b0] sm:$0xff]  ;;  %v6510_v57 = vpack.c.bf16 %v2834_v55, %v2833_v54  ;;  %v2869_v54 = vld [vmem:[#allocation4 + $0x998] sm:$0xff] }
 0xff0   : > { %v2257_v8 = vmax.f32 %v2247_v9, 0.0  ;;  %5482 = vmatprep.mubr.f32.mxu1 %v2259_v7  ;;  %5520 = vmatprep.mubr.f32.mxu0 %v2259_v7  ;;  %v6477_v4 = vpack.c.bf16 %v2325_v3, %v2324_v2  ;;  %v2327_v7 = vld [vmem:[#allocation4 + $0x7c8] sm:$0xff]  ;;  %v2837_v2 = vld [vmem:[#allocation4 + $0x898] sm:$0xff]  ;;  %v2838_v3 = vld [vmem:[#allocation4 + $0x8a0] sm:$0xff] }
 0xff1   : > { %5483 = vmatmul.mubr.f32.vlgmr.msra.gmra.mrb[26].mxu1 %v2260_v11  ;;  %5521 = vmatmul.mubr.f32.vlgmr.msra.gmra.mrb[38].mxu0 %v2260_v11  ;;  %v2262_v14 = vadd.f32 %v2258_v13, %v7347_v38  ;;  %v6480_v9 = vpack.c.bf16 %v2327_v7, %v2326_v5  ;;  %v2328_v11 = vld [vmem:[#allocation4 + $0x7d0] sm:$0xff]  ;;  %v2329_v13 = vld [vmem:[#allocation4 + $0x7d8] sm:$0xff]  ;;  %v2839_v5 = vld [vmem:[#allocation4 + $0x8a8] sm:$0xff] }
 0xff2   : > { %v2261_v17 = vadd.f32 %v2257_v8, %v7344_v37  ;;  %v6483_v8 = vpack.c.bf16 %v2329_v13, %v2328_v11  ;;  %v2840_v7 = vld [vmem:[#allocation4 + $0x8b0] sm:$0xff]  ;;  %v2842_v11 = vld [vmem:[#allocation4 + $0x8c0] sm:$0xff] }
 0xff4   : > { %5485 = vmatprep.mubr.f32.mxu1 %v2261_v17  ;;  %5523 = vmatprep.mubr.f32.mxu0 %v2261_v17  ;;  %v2816_v17 = vld [vmem:[#allocation4 + $0x7f0] sm:$0xff] }
 0xff5   : > { %5486 = vmatmul.mubr.f32.gmra.mrb[28].mxu1 %v2262_v14  ;;  %5524 = vmatmul.mubr.f32.gmra.mrb[40].mxu0 %v2262_v14  ;;  %v2817_v14 = vld [vmem:[#allocation4 + $0x7f8] sm:$0xff] }
 0xff6   : > { %5534 = vmatprep.mubr.msk.f32.mxu1 %vm7008_vm0, %v7007_v1  ;;  %5545 = vmatprep.mubr.msk.f32.mxu0 %vm7008_vm0, %v7007_v1 }
0x10c4   : > { %v5484_v10 = vpop.f32.mrb[26].mxu1  ;;  %v5522_v19 = vpop.f32.mrb[38].mxu0 }
0x10c5   : > { %v2481_v20 = vadd.f32 %v5484_v10, %v4420_v12  ;;  %v2570_v6 = vadd.f32 %v5522_v19, %v4421_v18  ;;  %v2475_v21 = vpop.f32.mrb[27].mxu1  ;;  %v2564_v22 = vpop.f32.mrb[39].mxu0  ;;  %v2819_v10 = vld [vmem:[#allocation4 + $0x808] sm:$0xff] }
0x10c6   : > { %v2476_v23 = vadd.f32 %v4420_v12, %v2475_v21  ;;  %v2565_v24 = vadd.f32 %v4421_v18, %v2564_v22  ;;  %v2822_v22 = vld [vmem:[#allocation4 + $0x820] sm:$0xff] }
0x10c8   : > { %v6450_v28 = vpack.c.bf16 %v2481_v20, %v2476_v23  ;;  %v6456_v29 = vpack.c.bf16 %v2570_v6, %v2565_v24  ;;  %v5487_v30 = vpop.f32.mrb[28].mxu1  ;;  %v5525_v31 = vpop.f32.mrb[40].mxu0  ;;  %v2820_v20 = vld [vmem:[#allocation4 + $0x810] sm:$0xff]  ;;  %v2821_v6 = vld [vmem:[#allocation4 + $0x818] sm:$0xff]  ;;  %v2823_v23 = vld [vmem:[#allocation4 + $0x828] sm:$0xff] }
0x10c9   : > { %v2491_v32 = vadd.f32 %v5487_v30, %v4420_v12  ;;  %v2580_v33 = vadd.f32 %v5525_v31, %v4421_v18  ;;  %v2485_v34 = vpop.f32.mrb[29].mxu1  ;;  %v2574_v35 = vpop.f32.mrb[41].mxu0  ;;  %v6492_v21 = vpack.c.bf16 %v2821_v6, %v2820_v20  ;;  %v6495_v24 = vpack.c.bf16 %v2823_v23, %v2822_v22  ;;  %v2826_v31 = vld [vmem:[#allocation4 + $0x840] sm:$0xff]  ;;  %v2863_v20 = vld [vmem:[#allocation4 + $0x968] sm:$0xff]  ;;  %v2848_v22 = vld [vmem:[#allocation4 + $0x8f0] sm:$0xff] }
0x10ca   : > { %v2486_v36 = vadd.f32 %v4420_v12, %v2485_v34  ;;  %v2575_v37 = vadd.f32 %v4421_v18, %v2574_v35  ;;  %6451 = vmatpush3.bf16.xpose.msra.mxu1 %v6450_v28  ;;  %6457 = vmatpush3.bf16.msra.mxu0 %v6456_v29  ;;  %v2818_v12 = vld [vmem:[#allocation4 + $0x800] sm:$0xff]  ;;  %v6486_v18 = vpack.c.bf16 %v2817_v14, %v2816_v17  ;;  %v2824_v28 = vld [vmem:[#allocation4 + $0x830] sm:$0xff]  ;;  %v2825_v29 = vld [vmem:[#allocation4 + $0x838] sm:$0xff] }
0x10cb   : > { %6458 = vmatprep.subr.bf16.mxu0 %v7006_v0  ;;  %6452 = vmatprep.subr.bf16.mxu1 %v7006_v0  ;;  %v6489_v19 = vpack.c.bf16 %v2819_v10, %v2818_v12  ;;  %v6498_v30 = vpack.c.bf16 %v2825_v29, %v2824_v28  ;;  %v2828_v34 = vld [vmem:[#allocation4 + $0x850] sm:$0xff]  ;;  %v2829_v35 = vld [vmem:[#allocation4 + $0x858] sm:$0xff]  ;;  %v2862_v10 = vld [vmem:[#allocation4 + $0x960] sm:$0xff] }
0x10cc   : > { %v6453_v38 = vpack.c.bf16 %v2491_v32, %v2486_v36  ;;  %v6459_v16 = vpack.c.bf16 %v2580_v33, %v2575_v37  ;;  %v2827_v32 = vld [vmem:[#allocation4 + $0x848] sm:$0xff]  ;;  %v6504_v36 = vpack.c.bf16 %v2829_v35, %v2828_v34  ;;  %v2830_v37 = vld [vmem:[#allocation4 + $0x860] sm:$0xff]  ;;  %v2844_v17 = vld [vmem:[#allocation4 + $0x8d0] sm:$0xff]  ;;  %v6552_v6 = vpack.c.bf16 %v2863_v20, %v2862_v10 }
0x10cd   : > { %v6501_v33 = vpack.c.bf16 %v2827_v32, %v2826_v31  ;;  %v2845_v12 = vld [vmem:[#allocation4 + $0x8d8] sm:$0xff]  ;;  %v2864_v23 = vld [vmem:[#allocation4 + $0x970] sm:$0xff]  ;;  %v4423_v32 = vld [vmem:[#allocation4 + $0x7e0] ss:$0 sm:$0xff] }
0x10ce   : > { %6460 = vmatpush3.bf16.msra.mxu0 %v6459_v16  ;;  %v2865_v28 = vld [vmem:[#allocation4 + $0x978] sm:$0xff]  ;;  %v2882_v10 = vld [vmem:[#allocation4 + $0xa00] sm:$0xff]  ;;  %v3331_v20 = vld [vmem:[#allocation4 + $0xa10] sm:$0xff] }
0x10cf   : > { %6461 = vmatprep.subr.bf16.mxu0 %v7006_v0  ;;  %v6555_v29 = vpack.c.bf16 %v2865_v28, %v2864_v23  ;;  %v3334_v23 = vld [vmem:[#allocation4 + $0xa28] sm:$0xff]  ;;  %v3335_v28 = vld [vmem:[#allocation4 + $0xa30] sm:$0xff] }
0x10d2   : > { %6454 = vmatpush3.bf16.xpose.msra.mxu1 %v6453_v38  ;;  %v2831_v38 = vld [vmem:[#allocation4 + $0x868] sm:$0xff] }
0x10d3   : > { %6485 = vmatprep.subr.bf16.mxu1 %v7006_v0  ;;  %v6507_v16 = vpack.c.bf16 %v2831_v38, %v2830_v37  ;;  %v4424_v38 = vld [vmem:[#allocation4 + $0x8f8] ss:$0 sm:$0xff] }
0x10d9   : > { %5535 = vmatmul.mubr.f32.vlgmr.msra.gmra.mrb[30].mxu1 %v7368_v39 }
0x10da   : > { %5615 = vmatprep.mubr.msk.f32.mxu1 %vm7008_vm0, %v7007_v1  ;;  %6487 = vmatpush3.bf16.msra.mxu1 %v6486_v18  ;;  %v2846_v18 = vld [vmem:[#allocation4 + $0x8e0] sm:$0xff] }
0x10db   : > { %6488 = vmatprep.subr.bf16.mxu1 %v7006_v0 }
0x10de   : > { %6490 = vmatpush3.bf16.msra.mxu1 %v6489_v19  ;;  %v6528_v19 = vpack.c.bf16 %v2846_v18, %v2845_v12  ;;  %v2881_v18 = vld [vmem:[#allocation4 + $0x9f8] sm:$0xff] }
0x10df   : > { %6491 = vmatprep.subr.bf16.mxu1 %v7006_v0 }
0x10e2   : > { %6493 = vmatpush3.bf16.msra.mxu1 %v6492_v21  ;;  %v2847_v21 = vld [vmem:[#allocation4 + $0x8e8] sm:$0xff] }
0x10e3   : > { %6494 = vmatprep.subr.bf16.mxu1 %v7006_v0 }
0x10e6   : > { %6496 = vmatpush3.bf16.msra.mxu1 %v6495_v24  ;;  %v6531_v24 = vpack.c.bf16 %v2848_v22, %v2847_v21  ;;  %v3333_v22 = vld [vmem:[#allocation4 + $0xa20] sm:$0xff] }
0x10e7   : > { %6497 = vmatprep.subr.bf16.mxu1 %v7006_v0 }
0x10ea   : > { %6499 = vmatpush3.bf16.msra.mxu1 %v6498_v30 }
0x10eb   : > { %6500 = vmatprep.subr.bf16.mxu1 %v7006_v0 }
0x10ee   : > { %6502 = vmatpush3.bf16.msra.mxu1 %v6501_v33 }
0x10ef   : > { %6503 = vmatprep.subr.bf16.mxu1 %v7006_v0 }
0x10f2   : > { %6505 = vmatpush3.bf16.msra.mxu1 %v6504_v36 }
0x10f3   : > { %6506 = vmatprep.subr.bf16.mxu1 %v7006_v0 }
0x10f6   : > { %6508 = vmatpush3.bf16.msra.mxu1 %v6507_v16  ;;  %v2832_v16 = vld [vmem:[#allocation4 + $0x870] sm:$0x1] }
0x10f7   : > { %6533 = vmatprep.subr.bf16.mxu1 %v7006_v0 }
0x11ac   : > { %v2649_v40 = vpop.f32.mrb[30].mxu1 }
0x11ad   : > { %v2653_v41 = vmul.f32 0.088388346, %v2649_v40  ;;  %v5536_v42 = vpop.f32.mrb[31].mxu1  ;;  %v2851_v40 = vld [vmem:[#allocation4 + $0x908] sm:$0xff] }
0x11ae   : > { %v6534_v42 = vpack.c.bf16 %v2851_v40, %v2850_v26 }
0x11af   : > { %v2654_v25 = vsel %vm389_vm4, %v2653_v41, -inf }
0x11b0   : > { %2655 = vmax.xlane.f32.xlu0 %v2654_v25  ;;  %v2852_v25 = vld [vmem:[#allocation4 + $0x910] sm:$0xff] }
0x123d   : > { %v2656_v43 = vpop.xlane.xlu0 %2655 }
0x123e   : > { %v2657_v15 = vsub.f32 %v2653_v41, %v2656_v43  ;;  %v2815_v41 = vld [vmem:[#allocation4 + $0x7e8] sm:$0x1]  ;;  %v2853_v43 = vld [vmem:[#allocation4 + $0x918] sm:$0xff] }
0x123f   : > { %5616 = vmatmul.mubr.f32.vlgmr.msra.gmra.mrb[32].mxu1 %v2815_v41 }
0x1240   : > { %v2658_v27 = vmul.f32 1.442695, %v2657_v15  ;;  %6535 = vmatpush3.bf16.msra.mxu1 %v6534_v42  ;;  %v6537_v15 = vpack.c.bf16 %v2853_v43, %v2852_v25  ;;  %5685 = vmatprep.mubr.msk.f32.mxu1 %vm7008_vm0, %v7007_v1 }
0x1241   : > { %6536 = vmatprep.subr.bf16.mxu1 %v7006_v0 }
0x1242   : > { %6888 = vpow2.f32 %v2658_v27  ;;  %v2854_v27 = vld [vmem:[#allocation4 + $0x920] sm:$0xff] }
0x1244   : > { %6538 = vmatpush3.bf16.msra.mxu1 %v6537_v15  ;;  %v4425_v15 = vld [vmem:[#allocation4 + $0x980] ss:$0 sm:$0xff] }
0x1245   : > { %6539 = vmatprep.subr.bf16.mxu1 %v7006_v0 }
0x124c   : > { %v6889_v45 = vpop.eup %6888 }
0x124d   : > { %v2660_v46 = vsel %vm389_vm4, %v6889_v45, 0.0 }
0x124e   : > { %2661 = vadd.xlane.f32.xlu1 %v2660_v46 }
0x12db   : > { %v2662_v44 = vpop.xlane.xlu1 %2661 }
0x12dc   : > { %6890 = vrcp.f32 %v2662_v44  ;;  %v2856_v44 = vld [vmem:[#allocation4 + $0x930] sm:$0xff] }
0x12dd   : > { %v6543_v48 = vpack.c.bf16 %v2857_v47, %v2856_v44 }
0x12e6   : > { %v6891_v61 = vpop.eup %6890 }
0x12e7   : > { %v2664_v50 = vmul.f32 %v6891_v61, %v6889_v45  ;;  %v2855_v45 = vld [vmem:[#allocation4 + $0x928] sm:$0xff]  ;;  %v2858_v61 = vld [vmem:[#allocation4 + $0x940] sm:$0xff] }
0x12e8   : > { %v6540_v46 = vpack.c.bf16 %v2855_v45, %v2854_v27 }
0x12e9   : > { %5546 = vmatmul.mubr.msk.f32.vlgmr.msra.gmra.mrb[42].mxu0 %vm389_vm4, %v2664_v50 }
0x12ea   : > { %6463 = vmatpush3.bf16.msra.mxu0 %v6462_v49  ;;  %5580 = vmatprep.mubr.msk.f32.mxu0 %vm7008_vm0, %v7007_v1  ;;  %v2859_v49 = vld [vmem:[#allocation4 + $0x948] sm:$0xff] }
0x12eb   : > { %6464 = vmatprep.subr.bf16.mxu0 %v7006_v0  ;;  %6541 = vmatpush3.bf16.msra.mxu1 %v6540_v46  ;;  %v6546_v50 = vpack.c.bf16 %v2859_v49, %v2858_v61 }
0x12ec   : > { %6542 = vmatprep.subr.bf16.mxu1 %v7006_v0 }
0x12ee   : > { %6466 = vmatpush3.bf16.msra.mxu0 %v6465_v53  ;;  %v6549_v53 = vpack.c.bf16 %v2861_v52, %v2860_v51  ;;  %v2867_v52 = vld [vmem:[#allocation4 + $0x988] sm:$0xff] }
0x12ef   : > { %6467 = vmatprep.subr.bf16.mxu0 %v7006_v0  ;;  %6544 = vmatpush3.bf16.msra.mxu1 %v6543_v48 }
0x12f0   : > { %6545 = vmatprep.subr.bf16.mxu1 %v7006_v0 }
0x12f2   : > { %6469 = vmatpush3.bf16.msra.mxu0 %v6468_v56 }
0x12f3   : > { %6470 = vmatprep.subr.bf16.mxu0 %v7006_v0  ;;  %6547 = vmatpush3.bf16.msra.mxu1 %v6546_v50 }
0x12f4   : > { %6548 = vmatprep.subr.bf16.mxu1 %v7006_v0 }
0x12f6   : > { %6472 = vmatpush3.bf16.msra.mxu0 %v6471_v59 }
0x12f7   : > { %6473 = vmatprep.subr.bf16.mxu0 %v7006_v0  ;;  %6550 = vmatpush3.bf16.msra.mxu1 %v6549_v53  ;;  %v2868_v53 = vld [vmem:[#allocation4 + $0x990] sm:$0xff] }
0x12f8   : > { %6551 = vmatprep.subr.bf16.mxu1 %v7006_v0  ;;  %v6558_v55 = vpack.c.bf16 %v2868_v53, %v2867_v52  ;;  %v3355_v52 = vld [vmem:[#allocation4 + $0xad0] sm:$0xff]  ;;  %v3356_v53 = vld [vmem:[#allocation4 + $0xad8] sm:$0xff] }
0x12fa   : > { %6475 = vmatpush3.bf16.msra.mxu0 %v6474_v63  ;;  %v6513_v63 = vpack.c.bf16 %v2836_v62, %v2835_v60  ;;  %v2873_v62 = vld [vmem:[#allocation4 + $0x9b8] sm:$0xff] }
0x12fb   : > { %6476 = vmatprep.subr.bf16.mxu0 %v7006_v0  ;;  %6553 = vmatpush3.bf16.msra.mxu1 %v6552_v6  ;;  %v3332_v6 = vld [vmem:[#allocation4 + $0xa18] sm:$0xff] }
0x12fc   : > { %6554 = vmatprep.subr.bf16.mxu1 %v7006_v0  ;;  %v6582_v21 = vpack.c.bf16 %v3332_v6, %v3331_v20  ;;  %v3369_v6 = vld [vmem:[#allocation4 + $0xb40] sm:$0xff] }
0x12fe   : > { %6478 = vmatpush3.bf16.msra.mxu0 %v6477_v4  ;;  %v6516_v4 = vpack.c.bf16 %v2838_v3, %v2837_v2  ;;  %v2875_v3 = vld [vmem:[#allocation4 + $0x9c8] sm:$0xff] }
0x12ff   : > { %6479 = vmatprep.subr.bf16.mxu0 %v7006_v0  ;;  %6556 = vmatpush3.bf16.msra.mxu1 %v6555_v29  ;;  %v3336_v29 = vld [vmem:[#allocation4 + $0xa38] sm:$0xff] }
0x1300   : > { %6557 = vmatprep.subr.bf16.mxu1 %v7006_v0 }
0x1302   : > { %6481 = vmatpush3.bf16.msra.mxu0 %v6480_v9  ;;  %v2841_v9 = vld [vmem:[#allocation4 + $0x8b8] sm:$0xff] }
0x1303   : > { %6482 = vmatprep.subr.bf16.mxu0 %v7006_v0  ;;  %v6522_v13 = vpack.c.bf16 %v2842_v11, %v2841_v9  ;;  %v2879_v11 = vld [vmem:[#allocation4 + $0x9e8] sm:$0xff] }
0x1306   : > { %6484 = vmatpush3.bf16.msra.mxu0 %v6483_v8  ;;  %v2843_v8 = vld [vmem:[#allocation4 + $0x8c8] sm:$0xff] }
0x1307   : > { %6509 = vmatprep.subr.bf16.mxu0 %v7006_v0  ;;  %v6525_v14 = vpack.c.bf16 %v2844_v17, %v2843_v8 }
0x1312   : > { %v2950_v30 = vpop.f32.mrb[32].mxu1 }
0x1313   : > { %v5617_v31 = vpop.f32.mrb[33].mxu1  ;;  %v7419_v43 = vadd.f32 %v2950_v30, %v2832_v16  ;;  %v6588_v30 = vpack.c.bf16 %v3336_v29, %v3335_v28  ;;  %v3373_v29 = vld [vmem:[#allocation4 + $0xb60] sm:$0xff] }
0x1314   : > { %v3337_v31 = vld [vmem:[#allocation4 + $0xa40] sm:$0xff] }
0x13bc   : > { %v2734_v56 = vpop.f32.mrb[42].mxu0 }
0x13bd   : > { %v2738_v58 = vadd.f32 %v2734_v56, %v7368_v39  ;;  %v5547_v59 = vpop.f32.mrb[43].mxu0  ;;  %v6519_v39 = vpack.c.bf16 %v2840_v7, %v2839_v5  ;;  %v2870_v56 = vld [vmem:[#allocation4 + $0x9a0] sm:$0xff]  ;;  %v2877_v7 = vld [vmem:[#allocation4 + $0x9d8] sm:$0xff] }
0x13be   : > { %v2872_v59 = vld [vmem:[#allocation4 + $0x9b0] sm:$0xff] }
0x13bf   : > { %5581 = vmatmul.mubr.f32.vlgmr.msra.gmra.mrb[44].mxu0 %v2738_v58 }
0x13c0   : > { %6511 = vmatpush3.bf16.msra.mxu0 %v6510_v57  ;;  %5650 = vmatprep.mubr.msk.f32.mxu0 %vm7008_vm0, %v7007_v1  ;;  %v6561_v57 = vpack.c.bf16 %v2870_v56, %v2869_v54  ;;  %v3357_v54 = vld [vmem:[#allocation4 + $0xae0] sm:$0xff]  ;;  %v3358_v56 = vld [vmem:[#allocation4 + $0xae8] sm:$0xff] }
0x13c1   : > { %6512 = vmatprep.subr.bf16.mxu0 %v7006_v0 }
0x13c4   : > { %6514 = vmatpush3.bf16.msra.mxu0 %v6513_v63  ;;  %v2874_v63 = vld [vmem:[#allocation4 + $0x9c0] sm:$0xff] }
0x13c5   : > { %6515 = vmatprep.subr.bf16.mxu0 %v7006_v0  ;;  %v6567_v2 = vpack.c.bf16 %v2874_v63, %v2873_v62  ;;  %v3345_v63 = vld [vmem:[#allocation4 + $0xa80] sm:$0xff] }
0x13c8   : > { %6517 = vmatpush3.bf16.msra.mxu0 %v6516_v4  ;;  %v2876_v4 = vld [vmem:[#allocation4 + $0x9d0] sm:$0xff] }
0x13c9   : > { %6518 = vmatprep.subr.bf16.mxu0 %v7006_v0  ;;  %v6570_v5 = vpack.c.bf16 %v2876_v4, %v2875_v3  ;;  %v3362_v4 = vld [vmem:[#allocation4 + $0xb08] sm:$0xff] }
0x13cc   : > { %6520 = vmatpush3.bf16.msra.mxu0 %v6519_v39  ;;  %v2878_v39 = vld [vmem:[#allocation4 + $0x9e0] sm:$0xff] }
0x13cd   : > { %6521 = vmatprep.subr.bf16.mxu0 %v7006_v0  ;;  %v6573_v9 = vpack.c.bf16 %v2878_v39, %v2877_v7  ;;  %v2883_v39 = vld [vmem:[#allocation4 + $0xa08] sm:$0x1] }
0x13d0   : > { %6523 = vmatpush3.bf16.msra.mxu0 %v6522_v13  ;;  %v2880_v13 = vld [vmem:[#allocation4 + $0x9f0] sm:$0xff] }
0x13d1   : > { %6524 = vmatprep.subr.bf16.mxu0 %v7006_v0  ;;  %v6576_v8 = vpack.c.bf16 %v2880_v13, %v2879_v11 }
0x13d4   : > { %6526 = vmatpush3.bf16.msra.mxu0 %v6525_v14 }
0x13d5   : > { %6527 = vmatprep.subr.bf16.mxu0 %v7006_v0 }
0x13d8   : > { %6529 = vmatpush3.bf16.msra.mxu0 %v6528_v19  ;;  %v6579_v19 = vpack.c.bf16 %v2882_v10, %v2881_v18  ;;  %v3367_v10 = vld [vmem:[#allocation4 + $0xb30] sm:$0xff] }
0x13d9   : > { %6530 = vmatprep.subr.bf16.mxu0 %v7006_v0 }
0x13dc   : > { %6532 = vmatpush3.bf16.msra.mxu0 %v6531_v24  ;;  %v6585_v24 = vpack.c.bf16 %v3334_v23, %v3333_v22  ;;  %v3371_v23 = vld [vmem:[#allocation4 + $0xb50] sm:$0xff] }
0x13dd   : > { %5688 = vmatprep.subr.mxu0 %v7007_v1 }
0x1492   : > { %v2809_v33 = vpop.f32.mrb[44].mxu0 }
0x1493   : > { %v2810_v34 = vadd.f32 %v4423_v32, %v2809_v33  ;;  %v5582_v35 = vpop.f32.mrb[45].mxu0  ;;  %v3338_v32 = vld [vmem:[#allocation4 + $0xa48] sm:$0xff] }
0x1494   : > { %v6591_v33 = vpack.c.bf16 %v3338_v32, %v3337_v31  ;;  %v3340_v35 = vld [vmem:[#allocation4 + $0xa58] sm:$0xff]  ;;  %v3375_v32 = vld [vmem:[#allocation4 + $0xb70] sm:$0xff] }
0x1495   : > { %v2813_v36 = vmax.f32 %v2810_v34, 0.0  ;;  %v3339_v34 = vld [vmem:[#allocation4 + $0xa50] sm:$0xff] }
0x1497   : > { %v2814_v37 = vadd.f32 %v2813_v36, %v2738_v58  ;;  %v2871_v58 = vld [vmem:[#allocation4 + $0x9a8] sm:$0xff]  ;;  %v6594_v36 = vpack.c.bf16 %v3340_v35, %v3339_v34  ;;  %v3377_v35 = vld [vmem:[#allocation4 + $0xb80] sm:$0xff] }
0x1498   : > { %v6564_v60 = vpack.c.bf16 %v2872_v59, %v2871_v58  ;;  %v3360_v59 = vld [vmem:[#allocation4 + $0xaf8] sm:$0xff] }
0x1499   : > { %5651 = vmatmul.mubr.f32.vlgmr.msra.gmra.mrb[46].mxu0 %v2814_v37  ;;  %5686 = vmatmul.mubr.f32.vlgmr.msra.gmra.mrb[34].mxu1 %v2814_v37  ;;  %v3341_v37 = vld [vmem:[#allocation4 + $0xa60] sm:$0xff] }
0x149a   : > { %5690 = vmatprep.mubr.msk.f32.mxu0 %vm7008_vm0, %v7007_v1  ;;  %5730 = vmatprep.mubr.msk.f32.mxu1 %vm7008_vm0, %v7007_v1 }
0x149b   : > { %6559 = vmatpush3.bf16.msra.mxu1 %v6558_v55  ;;  %v6618_v55 = vpack.c.bf16 %v3357_v54, %v3356_v53  ;;  %v3385_v54 = vld [vmem:[#allocation4 + $0xbc0] sm:$0xff] }
0x149c   : > { %6560 = vmatprep.subr.bf16.mxu1 %v7006_v0 }
0x149f   : > { %6562 = vmatpush3.bf16.msra.mxu1 %v6561_v57  ;;  %v3359_v57 = vld [vmem:[#allocation4 + $0xaf0] sm:$0xff] }
0x14a0   : > { %6563 = vmatprep.subr.bf16.mxu1 %v7006_v0  ;;  %v6621_v58 = vpack.c.bf16 %v3359_v57, %v3358_v56  ;;  %v3386_v56 = vld [vmem:[#allocation4 + $0xbc8] sm:$0xff]  ;;  %v3387_v57 = vld [vmem:[#allocation4 + $0xbd0] sm:$0xff] }
0x14a3   : > { %6565 = vmatpush3.bf16.msra.mxu1 %v6564_v60  ;;  %v3361_v60 = vld [vmem:[#allocation4 + $0xb00] sm:$0xff] }
0x14a4   : > { %6566 = vmatprep.subr.bf16.mxu1 %v7006_v0  ;;  %v6624_v62 = vpack.c.bf16 %v3361_v60, %v3360_v59  ;;  %v3388_v59 = vld [vmem:[#allocation4 + $0xbd8] sm:$0xff]  ;;  %v3389_v60 = vld [vmem:[#allocation4 + $0xbe0] sm:$0xff] }
0x14a7   : > { %6568 = vmatpush3.bf16.msra.mxu1 %v6567_v2  ;;  %v3346_v2 = vld [vmem:[#allocation4 + $0xa88] sm:$0xff] }
0x14a8   : > { %6569 = vmatprep.subr.bf16.mxu1 %v7006_v0  ;;  %v6603_v3 = vpack.c.bf16 %v3346_v2, %v3345_v63  ;;  %v3390_v63 = vld [vmem:[#allocation4 + $0xbe8] sm:$0xff]  ;;  %v3391_v2 = vld [vmem:[#allocation4 + $0xbf0] sm:$0xff] }
0x14ab   : > { %6571 = vmatpush3.bf16.msra.mxu1 %v6570_v5  ;;  %v3363_v5 = vld [vmem:[#allocation4 + $0xb10] sm:$0xff] }
0x14ac   : > { %6572 = vmatprep.subr.bf16.mxu1 %v7006_v0  ;;  %v6627_v7 = vpack.c.bf16 %v3363_v5, %v3362_v4  ;;  %v3392_v4 = vld [vmem:[#allocation4 + $0xbf8] sm:$0xff]  ;;  %v3393_v5 = vld [vmem:[#allocation4 + $0xc00] sm:$0xff] }
0x14af   : > { %6574 = vmatpush3.bf16.msra.mxu1 %v6573_v9 }
0x14b0   : > { %6575 = vmatprep.subr.bf16.mxu1 %v7006_v0 }
0x14b3   : > { %6577 = vmatpush3.bf16.msra.mxu1 %v6576_v8  ;;  %v3365_v8 = vld [vmem:[#allocation4 + $0xb20] sm:$0xff] }
0x14b4   : > { %6578 = vmatprep.subr.bf16.mxu1 %v7006_v0 }
0x14b7   : > { %6580 = vmatpush3.bf16.msra.mxu1 %v6579_v19  ;;  %v3368_v19 = vld [vmem:[#allocation4 + $0xb38] sm:$0xff] }
0x14b8   : > { %6605 = vmatprep.subr.bf16.mxu1 %v7006_v0  ;;  %v6633_v20 = vpack.c.bf16 %v3368_v19, %v3367_v10  ;;  %v3396_v19 = vld [vmem:[#allocation4 + $0xc18] sm:$0xff] }
0x156c   : > { %v3024_v26 = vpop.f32.mrb[46].mxu0  ;;  %v3098_v40 = vpop.f32.mrb[34].mxu1 }
0x156d   : > { %v3025_v41 = vadd.f32 %v4424_v38, %v3024_v26  ;;  %v5652_v42 = vpop.f32.mrb[47].mxu0  ;;  %v5687_v25 = vpop.f32.mrb[35].mxu1  ;;  %v3099_v27 = vadd.f32 %v4425_v15, %v3098_v40  ;;  %v3342_v38 = vld [vmem:[#allocation4 + $0xa68] sm:$0xff]  ;;  %v3343_v26 = vld [vmem:[#allocation4 + $0xa70] sm:$0xff]  ;;  %v3344_v40 = vld [vmem:[#allocation4 + $0xa78] sm:$0xff] }
0x156e   : > { %v6597_v16 = vpack.c.bf16 %v3342_v38, %v3341_v37  ;;  %v3348_v42 = vld [vmem:[#allocation4 + $0xa98] sm:$0xff]  ;;  %v3349_v25 = vld [vmem:[#allocation4 + $0xaa0] sm:$0xff]  ;;  %v3379_v38 = vld [vmem:[#allocation4 + $0xb90] sm:$0xff] }
0x156f   : > { %5689 = vmatpush3.xpose.msra.mxu0 %v3025_v41  ;;  %v6600_v41 = vpack.c.bf16 %v3344_v40, %v3343_v26  ;;  %v3347_v40 = vld [vmem:[#allocation4 + $0xa90] sm:$0x1] }
0x1570   : > { %5693 = vmatprep.subr.mxu0 %v7007_v1 }
0x1572   : > { %5691 = vmatmul.mubr.f32.vlgmr.msra.gmra.mrb[48].mxu0 %v7419_v43 }
0x1573   : > { %5694 = vmatpush3.msra.mxu0 %v3099_v27  ;;  %5695 = vmatprep.mubr.msk.f32.mxu0 %vm7008_vm0, %v7007_v1  ;;  %v6606_v27 = vpack.c.bf16 %v3349_v25, %v3348_v42 }
0x1574   : > { %6581 = vmatprep.subr.bf16.mxu0 %v7006_v0 }
0x1645   : > { %v3168_v45 = vpop.f32.mrb[48].mxu0 }
0x1646   : > { %v3172_v46 = vmul.f32 0.088388346, %v3168_v45  ;;  %v5692_v44 = vpop.f32.mrb[49].mxu0 }
0x1647   : > { %v3350_v44 = vld [vmem:[#allocation4 + $0xaa8] sm:$0xff] }
0x1648   : > { %v3174_v47 = vsel %vm3173_vm6, %v3172_v46, -inf }
0x1649   : > { %3175 = vmax.xlane.f32.xlu0 %v3174_v47  ;;  %v3351_v47 = vld [vmem:[#allocation4 + $0xab0] sm:$0xff] }
0x16d6   : > { %v3176_v48 = vpop.xlane.xlu0 %3175 }
0x16d7   : > { %v3177_v61 = vsub.f32 %v3172_v46, %v3176_v48  ;;  %v6609_v48 = vpack.c.bf16 %v3351_v47, %v3350_v44 }
0x16d9   : > { %v3178_v49 = vmul.f32 1.442695, %v3177_v61  ;;  %v3352_v61 = vld [vmem:[#allocation4 + $0xab8] sm:$0xff] }
0x16db   : > { %6892 = vpow2.f32 %v3178_v49  ;;  %v3353_v49 = vld [vmem:[#allocation4 + $0xac0] sm:$0xff] }
0x16e5   : > { %v6893_v50 = vpop.eup %6892 }
0x16e6   : > { %v3180_v51 = vsel %vm3173_vm6, %v6893_v50, 0.0 }
0x16e7   : > { %3181 = vadd.xlane.f32.xlu1 %v3180_v51  ;;  %v3354_v51 = vld [vmem:[#allocation4 + $0xac8] sm:$0xff] }
0x1774   : > { %v3182_v17 = vpop.xlane.xlu1 %3181 }
0x1775   : > { %6894 = vrcp.f32 %v3182_v17  ;;  %v3366_v17 = vld [vmem:[#allocation4 + $0xb28] sm:$0xff] }
0x177f   : > { %v6895_v14 = vpop.eup %6894 }
0x1780   : > { %v3184_v12 = vmul.f32 %v6895_v14, %v6893_v50  ;;  %v6612_v50 = vpack.c.bf16 %v3353_v49, %v3352_v61 }
0x1782   : > { %5696 = vmatmul.mubr.msk.f32.vlgmr.msra.gmra.mrb[50].mxu0 %vm840_vm5, %v3184_v12  ;;  %v6630_v12 = vpack.c.bf16 %v3366_v17, %v3365_v8 }
0x1783   : > { %5765 = vmatprep.mubr.msk.f32.mxu0 %vm7008_vm0, %v7007_v1  ;;  %6583 = vmatpush3.bf16.msra.mxu0 %v6582_v21  ;;  %v3370_v21 = vld [vmem:[#allocation4 + $0xb48] sm:$0xff] }
0x1784   : > { %6584 = vmatprep.subr.bf16.mxu0 %v7006_v0  ;;  %v6636_v22 = vpack.c.bf16 %v3370_v21, %v3369_v6  ;;  %v3771_v21 = vld [vmem:[#allocation4 + $0xc30] sm:$0xff] }
0x1787   : > { %6586 = vmatpush3.bf16.msra.mxu0 %v6585_v24  ;;  %v3372_v24 = vld [vmem:[#allocation4 + $0xb58] sm:$0xff] }
0x1788   : > { %6587 = vmatprep.subr.bf16.mxu0 %v7006_v0  ;;  %v6639_v28 = vpack.c.bf16 %v3372_v24, %v3371_v23  ;;  %v3773_v24 = vld [vmem:[#allocation4 + $0xc40] sm:$0xff] }
0x178b   : > { %6589 = vmatpush3.bf16.msra.mxu0 %v6588_v30  ;;  %v3374_v30 = vld [vmem:[#allocation4 + $0xb68] sm:$0xff] }
0x178c   : > { %6590 = vmatprep.subr.bf16.mxu0 %v7006_v0  ;;  %v6642_v31 = vpack.c.bf16 %v3374_v30, %v3373_v29  ;;  %v3775_v30 = vld [vmem:[#allocation4 + $0xc50] sm:$0xff] }
0x178f   : > { %6592 = vmatpush3.bf16.msra.mxu0 %v6591_v33  ;;  %v3376_v33 = vld [vmem:[#allocation4 + $0xb78] sm:$0xff] }
0x1790   : > { %6593 = vmatprep.subr.bf16.mxu0 %v7006_v0  ;;  %v6645_v34 = vpack.c.bf16 %v3376_v33, %v3375_v32  ;;  %v3777_v33 = vld [vmem:[#allocation4 + $0xc60] sm:$0xff] }
0x1793   : > { %6595 = vmatpush3.bf16.msra.mxu0 %v6594_v36  ;;  %v3378_v36 = vld [vmem:[#allocation4 + $0xb88] sm:$0xff] }
0x1794   : > { %6596 = vmatprep.subr.bf16.mxu0 %v7006_v0  ;;  %v6648_v37 = vpack.c.bf16 %v3378_v36, %v3377_v35  ;;  %v3779_v36 = vld [vmem:[#allocation4 + $0xc70] sm:$0xff] }
0x1797   : > { %6598 = vmatpush3.bf16.msra.mxu0 %v6597_v16  ;;  %v3380_v16 = vld [vmem:[#allocation4 + $0xb98] sm:$0xff] }
0x1798   : > { %6599 = vmatprep.subr.bf16.mxu0 %v7006_v0  ;;  %v6651_v26 = vpack.c.bf16 %v3380_v16, %v3379_v38  ;;  %v3781_v16 = vld [vmem:[#allocation4 + $0xc80] sm:$0xff] }
0x179b   : > { %6601 = vmatpush3.bf16.msra.mxu0 %v6600_v41  ;;  %v3364_v41 = vld [vmem:[#allocation4 + $0xb18] sm:$0x1] }
0x179c   : > { %6602 = vmatprep.subr.bf16.mxu0 %v7006_v0 }
0x179f   : > { %6604 = vmatpush3.bf16.msra.mxu0 %v6603_v3  ;;  %v6666_v3 = vpack.c.bf16 %v3391_v2, %v3390_v63  ;;  %v3801_v63 = vld [vmem:[#allocation4 + $0xd20] sm:$0xff] }
0x17a0   : > { %6629 = vmatprep.subr.bf16.mxu0 %v7006_v0 }
0x1855   : > { %v3254_v15 = vpop.f32.mrb[50].mxu0 }
0x1856   : > { %v3258_v45 = vadd.f32 %v3254_v15, %v7419_v43  ;;  %v5697_v46 = vpop.f32.mrb[51].mxu0  ;;  %v6615_v43 = vpack.c.bf16 %v3355_v52, %v3354_v51  ;;  %v3382_v51 = vld [vmem:[#allocation4 + $0xba8] sm:$0xff]  ;;  %v3383_v52 = vld [vmem:[#allocation4 + $0xbb0] sm:$0xff] }
0x1857   : > { %v6654_v53 = vpack.c.bf16 %v3383_v52, %v3382_v51  ;;  %v3792_v51 = vld [vmem:[#allocation4 + $0xcd8] sm:$0xff]  ;;  %v3793_v52 = vld [vmem:[#allocation4 + $0xce0] sm:$0xff] }
0x1858   : > { %5731 = vmatmul.mubr.f32.vlgmr.msra.gmra.mrb[36].mxu1 %v3258_v45 }
0x1859   : > { %6607 = vmatpush3.bf16.msra.mxu1 %v6606_v27  ;;  %5800 = vmatprep.mubr.msk.f32.mxu1 %vm7008_vm0, %v7007_v1 }
0x185a   : > { %6608 = vmatprep.subr.bf16.mxu1 %v7006_v0 }
0x185d   : > { %6610 = vmatpush3.bf16.msra.mxu1 %v6609_v48  ;;  %v3381_v48 = vld [vmem:[#allocation4 + $0xba0] sm:$0x1] }
0x185e   : > { %6611 = vmatprep.subr.bf16.mxu1 %v7006_v0 }
0x1861   : > { %6613 = vmatpush3.bf16.msra.mxu1 %v6612_v50 }
0x1862   : > { %6614 = vmatprep.subr.bf16.mxu1 %v7006_v0 }
0x1865   : > { %6616 = vmatpush3.bf16.msra.mxu1 %v6615_v43  ;;  %v3384_v43 = vld [vmem:[#allocation4 + $0xbb8] sm:$0xff] }
0x1866   : > { %6617 = vmatprep.subr.bf16.mxu1 %v7006_v0 }
0x1869   : > { %6619 = vmatpush3.bf16.msra.mxu1 %v6618_v55  ;;  %v6657_v55 = vpack.c.bf16 %v3385_v54, %v3384_v43  ;;  %v6708_v43 = vpack.c.bf16 %v3793_v52, %v3792_v51  ;;  %v3795_v54 = vld [vmem:[#allocation4 + $0xcf0] sm:$0xff] }
0x186a   : > { %6620 = vmatprep.subr.bf16.mxu1 %v7006_v0 }
0x186d   : > { %6622 = vmatpush3.bf16.msra.mxu1 %v6621_v58  ;;  %v6660_v58 = vpack.c.bf16 %v3387_v57, %v3386_v56  ;;  %v3797_v56 = vld [vmem:[#allocation4 + $0xd00] sm:$0xff] }
0x186e   : > { %6623 = vmatprep.subr.bf16.mxu1 %v7006_v0 }
0x1871   : > { %6625 = vmatpush3.bf16.msra.mxu1 %v6624_v62  ;;  %v6663_v62 = vpack.c.bf16 %v3389_v60, %v3388_v59  ;;  %v3799_v59 = vld [vmem:[#allocation4 + $0xd10] sm:$0xff] }
0x1872   : > { %6626 = vmatprep.subr.bf16.mxu1 %v7006_v0 }
0x1875   : > { %6628 = vmatpush3.bf16.msra.mxu1 %v6627_v7  ;;  %v6669_v7 = vpack.c.bf16 %v3393_v5, %v3392_v4  ;;  %v3786_v4 = vld [vmem:[#allocation4 + $0xca8] sm:$0xff] }
0x1876   : > { %5838 = vmatprep.subr.mxu1 %v7007_v1 }
0x192b   : > { %v3325_v9 = vpop.f32.mrb[36].mxu1 }
0x192c   : > { %v3326_v11 = vadd.f32 %v3325_v9, %v2883_v39  ;;  %v5732_v13 = vpop.f32.mrb[37].mxu1  ;;  %v3394_v39 = vld [vmem:[#allocation4 + $0xc08] sm:$0xff]  ;;  %v3395_v9 = vld [vmem:[#allocation4 + $0xc10] sm:$0xff] }
0x192e   : > { %v3329_v14 = vmax.f32 %v3326_v11, 0.0  ;;  %v6672_v11 = vpack.c.bf16 %v3395_v9, %v3394_v39  ;;  %v3803_v39 = vld [vmem:[#allocation4 + $0xd30] sm:$0xff] }
0x1930   : > { %v3330_v18 = vadd.f32 %v3329_v14, %v3258_v45 }
0x1932   : > { %5766 = vmatmul.mubr.f32.vlgmr.msra.gmra.mrb[52].mxu0 %v3330_v18  ;;  %5801 = vmatmul.mubr.f32.vlgmr.msra.gmra.mrb[38].mxu1 %v3330_v18 }
0x1933   : > { %6631 = vmatpush3.bf16.msra.mxu0 %v6630_v12  ;;  %5835 = vmatprep.mubr.msk.f32.mxu0 %vm7008_vm0, %v7007_v1 }
0x1934   : > { %6632 = vmatprep.subr.bf16.mxu0 %v7006_v0  ;;  %5840 = vmatprep.mubr.msk.f32.mxu1 %vm7008_vm0, %v7007_v1 }
0x1937   : > { %6634 = vmatpush3.bf16.msra.mxu0 %v6633_v20  ;;  %v3397_v20 = vld [vmem:[#allocation4 + $0xc20] sm:$0xff] }
0x1938   : > { %6635 = vmatprep.subr.bf16.mxu0 %v7006_v0  ;;  %v6675_v6 = vpack.c.bf16 %v3397_v20, %v3396_v19  ;;  %v3807_v20 = vld [vmem:[#allocation4 + $0xd50] sm:$0xff] }
0x193b   : > { %6637 = vmatpush3.bf16.msra.mxu0 %v6636_v22  ;;  %v3772_v22 = vld [vmem:[#allocation4 + $0xc38] sm:$0xff] }
0x193c   : > { %6638 = vmatprep.subr.bf16.mxu0 %v7006_v0  ;;  %v6678_v23 = vpack.c.bf16 %v3772_v22, %v3771_v21  ;;  %v3809_v22 = vld [vmem:[#allocation4 + $0xd60] sm:$0xff] }
0x193f   : > { %6640 = vmatpush3.bf16.msra.mxu0 %v6639_v28  ;;  %v3774_v28 = vld [vmem:[#allocation4 + $0xc48] sm:$0xff] }
0x1940   : > { %6641 = vmatprep.subr.bf16.mxu0 %v7006_v0  ;;  %v6681_v29 = vpack.c.bf16 %v3774_v28, %v3773_v24  ;;  %v3811_v28 = vld [vmem:[#allocation4 + $0xd70] sm:$0xff] }
0x1943   : > { %6643 = vmatpush3.bf16.msra.mxu0 %v6642_v31  ;;  %v3776_v31 = vld [vmem:[#allocation4 + $0xc58] sm:$0xff] }
0x1944   : > { %6644 = vmatprep.subr.bf16.mxu0 %v7006_v0  ;;  %v6684_v32 = vpack.c.bf16 %v3776_v31, %v3775_v30  ;;  %v3813_v31 = vld [vmem:[#allocation4 + $0xd80] sm:$0xff] }
0x1947   : > { %6646 = vmatpush3.bf16.msra.mxu0 %v6645_v34  ;;  %v3778_v34 = vld [vmem:[#allocation4 + $0xc68] sm:$0xff] }
0x1948   : > { %6647 = vmatprep.subr.bf16.mxu0 %v7006_v0  ;;  %v6687_v35 = vpack.c.bf16 %v3778_v34, %v3777_v33  ;;  %v3815_v34 = vld [vmem:[#allocation4 + $0xd90] sm:$0xff] }
0x194b   : > { %6649 = vmatpush3.bf16.msra.mxu0 %v6648_v37  ;;  %v3780_v37 = vld [vmem:[#allocation4 + $0xc78] sm:$0xff] }
0x194c   : > { %6650 = vmatprep.subr.bf16.mxu0 %v7006_v0  ;;  %v6690_v38 = vpack.c.bf16 %v3780_v37, %v3779_v36  ;;  %v3817_v37 = vld [vmem:[#allocation4 + $0xda0] sm:$0xff] }
0x194f   : > { %6652 = vmatpush3.bf16.msra.mxu0 %v6651_v26  ;;  %v3782_v26 = vld [vmem:[#allocation4 + $0xc88] sm:$0xff] }
0x1950   : > { %6653 = vmatprep.subr.bf16.mxu0 %v7006_v0 }
0x1952   : > { %5836 = vmatmul.mubr.f32.vlgmr.msra.gmra.mrb[54].mxu0 %v3330_v18 }
0x1953   : > { %5875 = vmatprep.mubr.msk.f32.mxu0 %vm7008_vm0, %v7007_v1  ;;  %6655 = vmatpush3.bf16.msra.mxu0 %v6654_v53  ;;  %v3794_v53 = vld [vmem:[#allocation4 + $0xce8] sm:$0xff] }
0x1954   : > { %6656 = vmatprep.subr.bf16.mxu0 %v7006_v0 }
0x1957   : > { %6658 = vmatpush3.bf16.msra.mxu0 %v6657_v55  ;;  %v3796_v55 = vld [vmem:[#allocation4 + $0xcf8] sm:$0xff] }
0x1958   : > { %6659 = vmatprep.subr.bf16.mxu0 %v7006_v0  ;;  %v6714_v57 = vpack.c.bf16 %v3797_v56, %v3796_v55  ;;  %v3825_v56 = vld [vmem:[#allocation4 + $0xde0] sm:$0xff] }
0x195b   : > { %6661 = vmatpush3.bf16.msra.mxu0 %v6660_v58  ;;  %v3798_v58 = vld [vmem:[#allocation4 + $0xd08] sm:$0xff] }
0x195c   : > { %6662 = vmatprep.subr.bf16.mxu0 %v7006_v0  ;;  %v6717_v60 = vpack.c.bf16 %v3799_v59, %v3798_v58  ;;  %v3826_v58 = vld [vmem:[#allocation4 + $0xde8] sm:$0xff]  ;;  %v3827_v59 = vld [vmem:[#allocation4 + $0xdf0] sm:$0xff] }
0x195f   : > { %6664 = vmatpush3.bf16.msra.mxu0 %v6663_v62  ;;  %v3800_v62 = vld [vmem:[#allocation4 + $0xd18] sm:$0xff] }
0x1960   : > { %6665 = vmatprep.subr.bf16.mxu0 %v7006_v0  ;;  %v6720_v2 = vpack.c.bf16 %v3801_v63, %v3800_v62  ;;  %v3828_v62 = vld [vmem:[#allocation4 + $0xdf8] sm:$0xff]  ;;  %v3829_v63 = vld [vmem:[#allocation4 + $0xe00] sm:$0xff] }
0x1963   : > { %6667 = vmatpush3.bf16.msra.mxu0 %v6666_v3  ;;  %v3785_v3 = vld [vmem:[#allocation4 + $0xca0] sm:$0xff] }
0x1964   : > { %6668 = vmatprep.subr.bf16.mxu0 %v7006_v0  ;;  %v6699_v5 = vpack.c.bf16 %v3786_v4, %v3785_v3  ;;  %v3830_v3 = vld [vmem:[#allocation4 + $0xe08] sm:$0xff]  ;;  %v3831_v4 = vld [vmem:[#allocation4 + $0xe10] sm:$0xff] }
0x1967   : > { %6670 = vmatpush3.bf16.msra.mxu0 %v6669_v7  ;;  %v3802_v7 = vld [vmem:[#allocation4 + $0xd28] sm:$0xff] }
0x1968   : > { %6671 = vmatprep.subr.bf16.mxu0 %v7006_v0  ;;  %v6723_v9 = vpack.c.bf16 %v3803_v39, %v3802_v7  ;;  %v3832_v7 = vld [vmem:[#allocation4 + $0xe18] sm:$0xff]  ;;  %v3833_v39 = vld [vmem:[#allocation4 + $0xe20] sm:$0xff] }
0x196b   : > { %6673 = vmatpush3.bf16.msra.mxu0 %v6672_v11  ;;  %v3398_v11 = vld [vmem:[#allocation4 + $0xc28] sm:$0x1] }
0x196c   : > { %6674 = vmatprep.subr.bf16.mxu0 %v7006_v0 }
0x196f   : > { %6676 = vmatpush3.bf16.msra.mxu0 %v6675_v6  ;;  %v3808_v6 = vld [vmem:[#allocation4 + $0xd58] sm:$0xff] }
0x1970   : > { %6701 = vmatprep.subr.bf16.mxu0 %v7006_v0  ;;  %v6729_v21 = vpack.c.bf16 %v3808_v6, %v3807_v20  ;;  %v3836_v6 = vld [vmem:[#allocation4 + $0xe38] sm:$0xff] }
0x1a05   : > { %v3465_v42 = vpop.f32.mrb[52].mxu0  ;;  %v3535_v25 = vpop.f32.mrb[38].mxu1 }
0x1a06   : > { %v7470_v15 = vadd.f32 %v3465_v42, %v3347_v40  ;;  %v3536_v27 = vadd.f32 %v3535_v25, %v3364_v41  ;;  %v5767_v45 = vpop.f32.mrb[53].mxu0  ;;  %v5802_v46 = vpop.f32.mrb[39].mxu1  ;;  %v6693_v40 = vpack.c.bf16 %v3782_v26, %v3781_v16  ;;  %v3783_v41 = vld [vmem:[#allocation4 + $0xc90] sm:$0xff]  ;;  %v3784_v42 = vld [vmem:[#allocation4 + $0xc98] sm:$0xff] }
0x1a07   : > { %v6696_v25 = vpack.c.bf16 %v3784_v42, %v3783_v41  ;;  %v3789_v45 = vld [vmem:[#allocation4 + $0xcc0] sm:$0xff]  ;;  %v3819_v26 = vld [vmem:[#allocation4 + $0xdb0] sm:$0xff] }
0x1a08   : > { %v3609_v44 = vmul.f32 %v3536_v27, %v7470_v15  ;;  %v3788_v27 = vld [vmem:[#allocation4 + $0xcb8] sm:$0xff]  ;;  %v3787_v42 = vld [vmem:[#allocation4 + $0xcb0] sm:$0x1] }
0x1a0a   : > { %v3611_v47 = vsel %vm3610_vm7, %v3609_v44, 0.0  ;;  %v6702_v44 = vpack.c.bf16 %v3789_v45, %v3788_v27 }
0x1a0b   : > { %3612 = vadd.xlane.f32.xlu0 %v3611_v47 }
0x1a25   : > { %v3605_v61 = vpop.f32.mrb[54].mxu0 }
0x1a26   : > { %v3606_v49 = vadd.f32 %v3605_v61, %v3381_v48  ;;  %v5837_v50 = vpop.f32.mrb[55].mxu0  ;;  %v3790_v61 = vld [vmem:[#allocation4 + $0xcc8] sm:$0xff] }
0x1a28   : > { %5839 = vmatpush3.msk.msra.mxu1 %vm3610_vm7, %v3606_v49  ;;  %v3791_v49 = vld [vmem:[#allocation4 + $0xcd0] sm:$0xff] }
0x1a29   : > { %6677 = vmatprep.subr.bf16.mxu1 %v7006_v0  ;;  %v6705_v50 = vpack.c.bf16 %v3791_v49, %v3790_v61 }
0x1a98   : > { %v3613_v13 = vpop.xlane.xlu0 %3612 }
0x1a99   : > { %v3614_v8 = vmul.f32 0.088388346, %v3613_v13 }
0x1a9b   : > { %v3615_v17 = vsub.f32 %v3614_v8, %v3614_v8 }
0x1a9d   : > { %v3616_v14 = vmul.f32 1.442695, %v3615_v17 }
0x1a9f   : > { %6896 = vpow2.f32 %v3616_v14  ;;  %v3805_v14 = vld [vmem:[#allocation4 + $0xd40] sm:$0xff] }
0x1aa9   : > { %v6897_v12 = vpop.eup %6896 }
0x1aaa   : > { %6898 = vrcp.f32 %v6897_v12 }
0x1ab4   : > { %v6899_v18 = vpop.eup %6898 }
0x1ab5   : > { %v3620_v10 = vmul.f32 %v6899_v18, %v6897_v12  ;;  %v3806_v12 = vld [vmem:[#allocation4 + $0xd48] sm:$0xff] }
0x1ab7   : > { %5841 = vmatmul.mubr.msk.f32.vlgmr.msra.gmra.mrb[40].mxu1 %vm3621_vm8, %v3620_v10  ;;  %v6726_v10 = vpack.c.bf16 %v3806_v12, %v3805_v14 }
0x1ab8   : > { %5910 = vmatprep.mubr.msk.f32.mxu1 %vm7008_vm0, %v7007_v1  ;;  %6679 = vmatpush3.bf16.msra.mxu1 %v6678_v23  ;;  %v3810_v23 = vld [vmem:[#allocation4 + $0xd68] sm:$0xff] }
0x1ab9   : > { %6680 = vmatprep.subr.bf16.mxu1 %v7006_v0  ;;  %v6732_v24 = vpack.c.bf16 %v3810_v23, %v3809_v22  ;;  %v4209_v23 = vld [vmem:[#allocation4 + $0xe50] sm:$0xff] }
0x1abc   : > { %6682 = vmatpush3.bf16.msra.mxu1 %v6681_v29  ;;  %v3812_v29 = vld [vmem:[#allocation4 + $0xd78] sm:$0xff] }
0x1abd   : > { %6683 = vmatprep.subr.bf16.mxu1 %v7006_v0  ;;  %v6735_v30 = vpack.c.bf16 %v3812_v29, %v3811_v28  ;;  %v4211_v28 = vld [vmem:[#allocation4 + $0xe60] sm:$0xff] }
0x1ac0   : > { %6685 = vmatpush3.bf16.msra.mxu1 %v6684_v32  ;;  %v3814_v32 = vld [vmem:[#allocation4 + $0xd88] sm:$0xff] }
0x1ac1   : > { %6686 = vmatprep.subr.bf16.mxu1 %v7006_v0  ;;  %v6738_v33 = vpack.c.bf16 %v3814_v32, %v3813_v31  ;;  %v4213_v32 = vld [vmem:[#allocation4 + $0xe70] sm:$0xff] }
0x1ac4   : > { %6688 = vmatpush3.bf16.msra.mxu1 %v6687_v35  ;;  %v3816_v35 = vld [vmem:[#allocation4 + $0xd98] sm:$0xff] }
0x1ac5   : > { %6689 = vmatprep.subr.bf16.mxu1 %v7006_v0  ;;  %v6741_v36 = vpack.c.bf16 %v3816_v35, %v3815_v34  ;;  %v4216_v35 = vld [vmem:[#allocation4 + $0xe88] sm:$0xff] }
0x1ac8   : > { %6691 = vmatpush3.bf16.msra.mxu1 %v6690_v38  ;;  %v3818_v38 = vld [vmem:[#allocation4 + $0xda8] sm:$0xff] }
0x1ac9   : > { %6692 = vmatprep.subr.bf16.mxu1 %v7006_v0  ;;  %v6744_v16 = vpack.c.bf16 %v3818_v38, %v3817_v37  ;;  %v4217_v37 = vld [vmem:[#allocation4 + $0xe90] sm:$0xff]  ;;  %v4218_v38 = vld [vmem:[#allocation4 + $0xe98] sm:$0xff] }
0x1acc   : > { %6694 = vmatpush3.bf16.msra.mxu1 %v6693_v40  ;;  %v3820_v40 = vld [vmem:[#allocation4 + $0xdb8] sm:$0xff] }
0x1acd   : > { %6695 = vmatprep.subr.bf16.mxu1 %v7006_v0  ;;  %v6747_v41 = vpack.c.bf16 %v3820_v40, %v3819_v26  ;;  %v4219_v26 = vld [vmem:[#allocation4 + $0xea0] sm:$0xff]  ;;  %v4220_v40 = vld [vmem:[#allocation4 + $0xea8] sm:$0xff] }
0x1ad0   : > { %6697 = vmatpush3.bf16.msra.mxu1 %v6696_v25  ;;  %v3804_v25 = vld [vmem:[#allocation4 + $0xd38] sm:$0x1] }
0x1ad1   : > { %6698 = vmatprep.subr.bf16.mxu1 %v7006_v0 }
0x1ad4   : > { %6700 = vmatpush3.bf16.msra.mxu1 %v6699_v5  ;;  %v6762_v5 = vpack.c.bf16 %v3831_v4, %v3830_v3 }
0x1ad5   : > { %6725 = vmatprep.subr.bf16.mxu1 %v7006_v0 }
0x1b8a   : > { %v3694_v46 = vpop.f32.mrb[40].mxu1 }
0x1b8b   : > { %v3698_v47 = vadd.f32 %v3694_v46, %v7470_v15  ;;  %v5842_v48 = vpop.f32.mrb[41].mxu1  ;;  %v6711_v15 = vpack.c.bf16 %v3795_v54, %v3794_v53  ;;  %v3822_v53 = vld [vmem:[#allocation4 + $0xdc8] sm:$0xff]  ;;  %v3823_v54 = vld [vmem:[#allocation4 + $0xdd0] sm:$0xff] }
0x1b8c   : > { %v6750_v55 = vpack.c.bf16 %v3823_v54, %v3822_v53 }
0x1b8d   : > { %5876 = vmatmul.mubr.f32.vlgmr.msra.gmra.mrb[56].mxu0 %v3698_v47 }
0x1b8e   : > { %6703 = vmatpush3.bf16.msra.mxu0 %v6702_v44  ;;  %5945 = vmatprep.mubr.msk.f32.mxu0 %vm7008_vm0, %v7007_v1 }
0x1b8f   : > { %6704 = vmatprep.subr.bf16.mxu0 %v7006_v0 }
0x1b92   : > { %6706 = vmatpush3.bf16.msra.mxu0 %v6705_v50  ;;  %v3821_v50 = vld [vmem:[#allocation4 + $0xdc0] sm:$0x1] }
0x1b93   : > { %6707 = vmatprep.subr.bf16.mxu0 %v7006_v0 }
0x1b96   : > { %6709 = vmatpush3.bf16.msra.mxu0 %v6708_v43 }
0x1b97   : > { %6710 = vmatprep.subr.bf16.mxu0 %v7006_v0 }
0x1b9a   : > { %6712 = vmatpush3.bf16.msra.mxu0 %v6711_v15  ;;  %v3824_v15 = vld [vmem:[#allocation4 + $0xdd8] sm:$0xff] }
0x1b9b   : > { %6713 = vmatprep.subr.bf16.mxu0 %v7006_v0 }
0x1b9e   : > { %6715 = vmatpush3.bf16.msra.mxu0 %v6714_v57  ;;  %v6753_v57 = vpack.c.bf16 %v3825_v56, %v3824_v15 }
0x1b9f   : > { %6716 = vmatprep.subr.bf16.mxu0 %v7006_v0 }
0x1ba2   : > { %6718 = vmatpush3.bf16.msra.mxu0 %v6717_v60  ;;  %v6756_v60 = vpack.c.bf16 %v3827_v59, %v3826_v58 }
0x1ba3   : > { %6719 = vmatprep.subr.bf16.mxu0 %v7006_v0 }
0x1ba6   : > { %6721 = vmatpush3.bf16.msra.mxu0 %v6720_v2  ;;  %v6759_v2 = vpack.c.bf16 %v3829_v63, %v3828_v62 }
0x1ba7   : > { %6722 = vmatprep.subr.bf16.mxu0 %v7006_v0 }
0x1baa   : > { %6724 = vmatpush3.bf16.msra.mxu0 %v6723_v9  ;;  %v6765_v9 = vpack.c.bf16 %v3833_v39, %v3832_v7 }
0x1bab   : > { %5983 = vmatprep.subr.mxu0 %v7007_v1 }
0x1c60   : > { %v3765_v13 = vpop.f32.mrb[56].mxu0 }
0x1c61   : > { %v3766_v8 = vadd.f32 %v3765_v13, %v3398_v11  ;;  %v5877_v17 = vpop.f32.mrb[57].mxu0  ;;  %v3834_v11 = vld [vmem:[#allocation4 + $0xe28] sm:$0xff]  ;;  %v3835_v13 = vld [vmem:[#allocation4 + $0xe30] sm:$0xff] }
0x1c63   : > { %v3769_v18 = vmax.f32 %v3766_v8, 0.0  ;;  %v6768_v8 = vpack.c.bf16 %v3835_v13, %v3834_v11 }
0x1c65   : > { %v3770_v19 = vadd.f32 %v3769_v18, %v3698_v47 }
0x1c67   : > { %5911 = vmatmul.mubr.f32.vlgmr.msra.gmra.mrb[42].mxu1 %v3770_v19  ;;  %5946 = vmatmul.mubr.f32.vlgmr.msra.gmra.mrb[58].mxu0 %v3770_v19 }
0x1c68   : > { %6727 = vmatpush3.bf16.msra.mxu1 %v6726_v10  ;;  %5980 = vmatprep.mubr.msk.f32.mxu1 %vm7008_vm0, %v7007_v1 }
0x1c69   : > { %6728 = vmatprep.subr.bf16.mxu1 %v7006_v0  ;;  %5985 = vmatprep.mubr.msk.f32.mxu0 %vm7008_vm0, %v7007_v1 }
0x1c6c   : > { %6730 = vmatpush3.bf16.msra.mxu1 %v6729_v21  ;;  %v3837_v21 = vld [vmem:[#allocation4 + $0xe40] sm:$0xff] }
0x1c6d   : > { %6731 = vmatprep.subr.bf16.mxu1 %v7006_v0  ;;  %v6771_v22 = vpack.c.bf16 %v3837_v21, %v3836_v6 }
0x1c70   : > { %6733 = vmatpush3.bf16.msra.mxu1 %v6732_v24  ;;  %v4210_v24 = vld [vmem:[#allocation4 + $0xe58] sm:$0xff] }
0x1c71   : > { %6734 = vmatprep.subr.bf16.mxu1 %v7006_v0  ;;  %v6774_v29 = vpack.c.bf16 %v4210_v24, %v4209_v23 }
0x1c74   : > { %6736 = vmatpush3.bf16.msra.mxu1 %v6735_v30  ;;  %v4212_v30 = vld [vmem:[#allocation4 + $0xe68] sm:$0xff] }
0x1c75   : > { %6737 = vmatprep.subr.bf16.mxu1 %v7006_v0  ;;  %v6777_v31 = vpack.c.bf16 %v4212_v30, %v4211_v28 }
0x1c78   : > { %6739 = vmatpush3.bf16.msra.mxu1 %v6738_v33  ;;  %v4214_v33 = vld [vmem:[#allocation4 + $0xe78] sm:$0xff] }
0x1c79   : > { %6740 = vmatprep.subr.bf16.mxu1 %v7006_v0  ;;  %v6780_v34 = vpack.c.bf16 %v4214_v33, %v4213_v32 }
0x1c7c   : > { %6742 = vmatpush3.bf16.msra.mxu1 %v6741_v36 }
0x1c7d   : > { %6743 = vmatprep.subr.bf16.mxu1 %v7006_v0 }
0x1c80   : > { %6745 = vmatpush3.bf16.msra.mxu1 %v6744_v16  ;;  %v6786_v16 = vpack.c.bf16 %v4218_v38, %v4217_v37 }
0x1c81   : > { %6746 = vmatprep.subr.bf16.mxu1 %v7006_v0 }
0x1c84   : > { %6748 = vmatpush3.bf16.msra.mxu1 %v6747_v41  ;;  %v6789_v41 = vpack.c.bf16 %v4220_v40, %v4219_v26 }
0x1c85   : > { %6749 = vmatprep.subr.bf16.mxu1 %v7006_v0 }
0x1c87   : > { %5981 = vmatmul.mubr.f32.vlgmr.msra.gmra.mrb[44].mxu1 %v3770_v19 }
0x1c88   : > { %6020 = vmatprep.mubr.msk.f32.mxu1 %vm7008_vm0, %v7007_v1  ;;  %6751 = vmatpush3.bf16.msra.mxu1 %v6750_v55 }
0x1c89   : > { %6752 = vmatprep.subr.bf16.mxu1 %v7006_v0 }
0x1c8c   : > { %6754 = vmatpush3.bf16.msra.mxu1 %v6753_v57 }
0x1c8d   : > { %6755 = vmatprep.subr.bf16.mxu1 %v7006_v0 }
0x1c90   : > { %6757 = vmatpush3.bf16.msra.mxu1 %v6756_v60 }
0x1c91   : > { %6758 = vmatprep.subr.bf16.mxu1 %v7006_v0 }
0x1c94   : > { %6760 = vmatpush3.bf16.msra.mxu1 %v6759_v2 }
0x1c95   : > { %6761 = vmatprep.subr.bf16.mxu1 %v7006_v0 }
0x1c98   : > { %6763 = vmatpush3.bf16.msra.mxu1 %v6762_v5 }
0x1c99   : > { %6764 = vmatprep.subr.bf16.mxu1 %v7006_v0 }
0x1c9c   : > { %6766 = vmatpush3.bf16.msra.mxu1 %v6765_v9 }
0x1c9d   : > { %6767 = vmatprep.subr.bf16.mxu1 %v7006_v0 }
0x1ca0   : > { %6769 = vmatpush3.bf16.msra.mxu1 %v6768_v8 }
0x1ca1   : > { %6770 = vmatprep.subr.bf16.mxu1 %v7006_v0 }
0x1ca4   : > { %6772 = vmatpush3.bf16.msra.mxu1 %v6771_v22 }
0x1d3a   : > { %v3905_v27 = vpop.f32.mrb[42].mxu1  ;;  %v3975_v45 = vpop.f32.mrb[58].mxu0 }
0x1d3b   : > { %v7520_v46 = vadd.f32 %v3905_v27, %v3787_v42  ;;  %v3976_v44 = vadd.f32 %v3975_v45, %v3804_v25  ;;  %v5912_v47 = vpop.f32.mrb[43].mxu1  ;;  %v5947_v48 = vpop.f32.mrb[59].mxu0  ;;  %v4221_v45 = vld [vmem:[#allocation4 + $0xeb0] sm:$0xff] }
0x1d3c   : > { %v4223_v48 = vld [vmem:[#allocation4 + $0xec0] sm:$0xff] }
0x1d3d   : > { %v4049_v61 = vmul.f32 %v3976_v44, %v7520_v46  ;;  %v4222_v44 = vld [vmem:[#allocation4 + $0xeb8] sm:$0xff] }
0x1d3e   : > { %v6792_v47 = vpack.c.bf16 %v4222_v44, %v4221_v45 }
0x1d3f   : > { %v4050_v49 = vsel %vm3610_vm7, %v4049_v61, 0.0  ;;  %v4224_v61 = vld [vmem:[#allocation4 + $0xec8] sm:$0xff] }
0x1d40   : > { %4051 = vadd.xlane.f32.xlu1 %v4050_v49  ;;  %v6795_v49 = vpack.c.bf16 %v4224_v61, %v4223_v48 }
0x1d5a   : > { %v4045_v51 = vpop.f32.mrb[44].mxu1 }
0x1d5b   : > { %v4046_v52 = vadd.f32 %v4045_v51, %v3821_v50  ;;  %v5982_v43 = vpop.f32.mrb[45].mxu1  ;;  %v3838_v50 = vld [vmem:[#allocation4 + $0xe48] sm:$0x1] }
0x1d5d   : > { %5984 = vmatpush3.msk.msra.mxu0 %vm3610_vm7, %v4046_v52 }
0x1d5e   : > { %6773 = vmatprep.subr.bf16.mxu0 %v7006_v0 }
0x1dcd   : > { %v4052_v17 = vpop.xlane.xlu1 %4051 }
0x1dce   : > { %v4053_v14 = vmul.f32 0.088388346, %v4052_v17 }
0x1dd0   : > { %v4054_v12 = vsub.f32 %v4053_v14, %v4053_v14 }
0x1dd2   : > { %v4055_v18 = vmul.f32 1.442695, %v4054_v12 }
0x1dd4   : > { %6900 = vpow2.f32 %v4055_v18 }
0x1dde   : > { %v6901_v10 = vpop.eup %6900 }
0x1ddf   : > { %6902 = vrcp.f32 %v6901_v10 }
0x1de9   : > { %v6903_v19 = vpop.eup %6902 }
0x1dea   : > { %v4059_v20 = vmul.f32 %v6903_v19, %v6901_v10 }
0x1dec   : > { %5986 = vmatmul.mubr.msk.f32.vlgmr.msra.gmra.mrb[60].mxu0 %vm3621_vm8, %v4059_v20 }
0x1ded   : > { %6055 = vmatprep.mubr.msk.f32.mxu0 %vm7008_vm0, %v7007_v1  ;;  %6775 = vmatpush3.bf16.msra.mxu0 %v6774_v29  ;;  %v4215_v1 = vld [vmem:[#allocation4 + $0xe80] sm:$0xff] }
0x1dee   : > { %6776 = vmatprep.subr.bf16.mxu0 %v7006_v0  ;;  %v6783_v36 = vpack.c.bf16 %v4216_v35, %v4215_v1 }
0x1df1   : > { %6778 = vmatpush3.bf16.msra.mxu0 %v6777_v31 }
0x1df2   : > { %6779 = vmatprep.subr.bf16.mxu0 %v7006_v0 }
0x1df5   : > { %6781 = vmatpush3.bf16.msra.mxu0 %v6780_v34 }
0x1df6   : > { %6782 = vmatprep.subr.bf16.mxu0 %v7006_v0 }
0x1df9   : > { %6784 = vmatpush3.bf16.msra.mxu0 %v6783_v36 }
0x1dfa   : > { %6785 = vmatprep.subr.bf16.mxu0 %v7006_v0 }
0x1dfd   : > { %6787 = vmatpush3.bf16.msra.mxu0 %v6786_v16 }
0x1dfe   : > { %6788 = vmatprep.subr.bf16.mxu0 %v7006_v0 }
0x1e01   : > { %6790 = vmatpush3.bf16.msra.mxu0 %v6789_v41 }
0x1e02   : > { %6791 = vmatprep.subr.bf16.mxu0 %v7006_v0 }
0x1e05   : > { %6793 = vmatpush3.bf16.msra.mxu0 %v6792_v47 }
0x1e06   : > { %6794 = vmatprep.subr.bf16.mxu0 %v7006_v0 }
0x1e09   : > { %6796 = vmatpush3.bf16.msra.mxu0 %v6795_v49 }
0x1ebf   : > { %v4132_v42 = vpop.f32.mrb[60].mxu0 }
0x1ec0   : > { %v4136_v25 = vadd.f32 %v4132_v42, %v7520_v46  ;;  %v5987_v27 = vpop.f32.mrb[61].mxu0  ;;  %v4225_v46 = vld [vmem:[#allocation4 + $0xed0] sm:$0x1] }
0x1ec2   : > { %6021 = vmatmul.mubr.f32.vlgmr.msra.gmra.mrb[46].mxu1 %v4136_v25 }
0x1f95   : > { %v4203_v51 = vpop.f32.mrb[46].mxu1 }
0x1f96   : > { %v4204_v52 = vadd.f32 %v4203_v51, %v3838_v50  ;;  %v6022_v43 = vpop.f32.mrb[47].mxu1 }
0x1f98   : > { %v4207_v53 = vmax.f32 %v4204_v52, 0.0 }
0x1f9a   : > { %v4208_v54 = vadd.f32 %v4207_v53, %v4136_v25 }
0x1f9c   : > { %6056 = vmatmul.mubr.f32.vlgmr.msra.gmra.mrb[62].mxu0 %v4208_v54 }
0x206f   : > { %v4292_v15 = vpop.f32.mrb[62].mxu0 }
0x2070   : > { %v4293_v55 = vadd.f32 %v4292_v15, %v4225_v46  ;;  %v6057_v0 = vpop.f32.mrb[63].mxu0 }
0x2072   : > { %4297 = vst.msk [vmem:[%s215_s23] sm:$0x1] %vm4296_vm9, %v4293_v55 }
0x2073 PF: > { %p14_p8 = scmp.ge.s32.totalorder %s7073_s22, 4   ;;  %s7576_s12 = smov %s6992_s13 }
0x2074   : > { %s7577_s13 = smov %s6996_s14  ;;  %s7578_s14 = smov %s7099_s10 }
0x2075   : > { %s7579_s15 = smov %s7073_s22  ;;  %16 = sbr.rel (!%p14_p8) target bundleno = 4 (0x4), region = 79 }
0x207c   :  { %4315 = vsyncpa [#allocation3], 1 }
0x207d   :  { %4317 = vsyncpa [#allocation3 + $0x1], 1 }
0x207e   :  { %4318 = vsyncpa [#allocation5], 1 }

</bundles_post_ra>
